<compile_context>
chip_gen: v5e
topology: v5e:2x2
jax: 0.10.0
libtpu: 0.0.40
codegen_flags: <defaults>
</compile_context>

<pallas_src>
import math

import jax
import jax.numpy as jnp
import numpy as np
from jax import lax
from jax.experimental import pallas as pl
from jax.experimental.pallas import tpu as pltpu

U = 128   # units (embed dim / hidden dim)
V = 256   # vocab_size
B = 2     # batch
T = 8     # target sequence length
S = 8     # context sequence length

BF = jnp.bfloat16
F32 = jnp.float32


def _lstm_cell(gates, c):
    # PyTorch gate order: i, f, g, o   (gates: (rows, 4U) f32)
    i = jax.nn.sigmoid(gates[:, 0 * U:1 * U])
    f = jax.nn.sigmoid(gates[:, 1 * U:2 * U])
    g = jnp.tanh(gates[:, 2 * U:3 * U])
    o = jax.nn.sigmoid(gates[:, 3 * U:4 * U])
    c_new = f * c + i * g
    h_new = o * jnp.tanh(c_new)
    return h_new, c_new


def decoder_kernel(
    ids_ref,                      # (T*B, 1) int32    time-major target ids
    ctx_ref,                      # (B, S, U)  bf16
    emb_ref,                      # (V, U)     bf16
    wih1_ref, whh1_ref, b1_ref,   # (U, 4U) bf16, (U, 4U) bf16, (1, 4U) f32
    wq_ref, bq_ref,               # (U, U) bf16, (1, U) f32
    wkv_ref, bkv_ref,             # (U, 2U) bf16, (1, 2U) f32   fused K|V
    wo_ref, bo_ref,               # (U, U) bf16, (1, U) f32
    ln_g_ref, ln_b_ref,           # (1, U) f32, (1, U) f32
    wih2_ref, whh2_ref, b2_ref,   # (U, 4U) bf16, (U, 4U) bf16, (1, 4U) f32
    wl_ref, bl_ref,               # (U, V) bf16, (1, V) f32
    out_ref,                      # (T*B, V) f32  time-major log-probs
):
    # ---- embedding gather as a one-hot matmul (time-major rows t*B + b) ----
    ids = ids_ref[...]                                             # (T*B, 1)
    onehot = (lax.broadcasted_iota(jnp.int32, (T * B, V), 1) == ids).astype(BF)
    x = jnp.dot(onehot, emb_ref[...], preferred_element_type=F32)  # (T*B, U)

    # ---- preLSTM (train=True path: h0 = c0 = 0) -------------------------
    # input projection for all timesteps at once; only h@Whh stays serial.
    pre1 = (jnp.dot(x.astype(BF), wih1_ref[...],
                    preferred_element_type=F32) + b1_ref[...])     # (T*B, 4U)
    h = jnp.zeros((B, U), F32)
    c = jnp.zeros((B, U), F32)
    hs1 = []
    for t in range(T):                                             # unrolled
        gates = pre1[t * B:(t + 1) * B, :] + jnp.dot(
            h.astype(BF), whh1_ref[...], preferred_element_type=F32)
        h, c = _lstm_cell(gates, c)
        hs1.append(h)
    h1 = jnp.concatenate(hs1, axis=0)                    # (T*B, U) time-major

    # ---- single-head cross attention (query = preLSTM out, k/v = context) --
    ctx = ctx_ref[...].reshape(B * S, U)                           # bf16
    q = (jnp.dot(h1.astype(BF), wq_ref[...],
                 preferred_element_type=F32) + bq_ref[...])        # (T*B, U)
    kv = (jnp.dot(ctx, wkv_ref[...],
                  preferred_element_type=F32) + bkv_ref[...])      # (B*S, 2U)
    k3 = kv[:, :U].reshape(B, S, U).astype(BF)
    v3 = kv[:, U:2 * U].reshape(B, S, U).astype(BF)
    q3 = jnp.transpose(q.reshape(T, B, U), (1, 0, 2)).astype(BF)   # (B, T, U)

    scale = 1.0 / math.sqrt(U)
    s = jnp.einsum('btu,bsu->bts', q3, k3,
                   preferred_element_type=F32) * scale             # (B, T, S)
    s = s - jnp.max(s, axis=-1, keepdims=True)
    p = jnp.exp(s)
    p = p * pl.reciprocal(jnp.sum(p, axis=-1, keepdims=True), approx=True)
    attn = jnp.einsum('bts,bsu->btu', p.astype(BF), v3,
                      preferred_element_type=F32)                  # (B, T, U)
    attn = jnp.transpose(attn, (1, 0, 2)).reshape(T * B, U)        # time-major
    attn = (jnp.dot(attn.astype(BF), wo_ref[...],
                    preferred_element_type=F32) + bo_ref[...])

    # ---- residual + LayerNorm (eps = 1e-5, biased variance like PyTorch) ---
    y = attn + h1
    mean = jnp.mean(y, axis=-1, keepdims=True)
    var = jnp.mean((y - mean) ** 2, axis=-1, keepdims=True)
    y = (y - mean) * lax.rsqrt(var + 1e-5) * ln_g_ref[...] + ln_b_ref[...]

    # ---- postLSTM: precompute input projection, unrolled recurrence --------
    pre2 = (jnp.dot(y.astype(BF), wih2_ref[...],
                    preferred_element_type=F32) + b2_ref[...])     # (T*B, 4U)
    h = jnp.zeros((B, U), F32)
    c = jnp.zeros((B, U), F32)
    hs2 = []
    for t in range(T):
        gates = pre2[t * B:(t + 1) * B, :] + jnp.dot(
            h.astype(BF), whh2_ref[...], preferred_element_type=F32)
        h, c = _lstm_cell(gates, c)
        hs2.append(h)
    h2 = jnp.concatenate(hs2, axis=0)                    # (T*B, U) time-major

    # ---- linear + log softmax ----
    logits = (jnp.dot(h2.astype(BF), wl_ref[...],
                      preferred_element_type=F32) + bl_ref[...])   # (T*B, V)
    m = jnp.max(logits, axis=-1, keepdims=True)
    z = logits - m
    lse = jnp.log(jnp.sum(jnp.exp(z), axis=-1, keepdims=True))
    out_ref[...] = z - lse


@jax.jit
def decoder_forward(params, context, target_ids):
    p = params
    wih1_T = p["wih1"].T.astype(BF)
    whh1_T = p["whh1"].T.astype(BF)
    b1 = (p["bih1"] + p["bhh1"]).reshape(1, 4 * U)
    wq, wk, wv = jnp.split(p["in_proj_w"], 3, axis=0)
    bq, bk, bv = jnp.split(p["in_proj_b"], 3)
    wq_T = wq.T.astype(BF)
    wkv_T = jnp.concatenate([wk.T, wv.T], axis=1).astype(BF)       # (U, 2U)
    bkv = jnp.concatenate([bk, bv]).reshape(1, 2 * U)
    wo_T = p["out_proj_w"].T.astype(BF)
    wih2_T = p["wih2"].T.astype(BF)
    whh2_T = p["whh2"].T.astype(BF)
    b2 = (p["bih2"] + p["bhh2"]).reshape(1, 4 * U)
    wl_T = p["wl"].T.astype(BF)

    # time-major row order (rows = t*B + b) for the ids driving the one-hot.
    ids_tm = target_ids.astype(jnp.int32).T.reshape(T * B, 1)

    args = (
        ids_tm,
        context.astype(BF),
        p["emb"].astype(BF),
        wih1_T, whh1_T, b1,
        wq_T, bq.reshape(1, U),
        wkv_T, bkv,
        wo_T, p["out_proj_b"].reshape(1, U),
        p["ln_g"].reshape(1, U), p["ln_b"].reshape(1, U),
        wih2_T, whh2_T, b2,
        wl_T, p["bl"].reshape(1, V),
    )

    # Grid-less call: everything whole-array resident in VMEM, no pipelining.
    vmem_spec = pl.BlockSpec(memory_space=pltpu.MemorySpace.VMEM)
    out_tm = pl.pallas_call(
        decoder_kernel,
        out_shape=jax.ShapeDtypeStruct((T * B, V), jnp.float32),
        in_specs=[vmem_spec] * len(args),
        out_specs=vmem_spec,
    )(*args)

    # layout plumbing back to batch-major (B, T, V) outside the kernel.
    return out_tm.reshape(T, B, V).transpose(1, 0, 2)


# ---------------- deterministic parameter init + pure-JAX reference ----------

def init_params(key):
    ks = jax.random.split(key, 14)
    s = 1.0 / math.sqrt(U)

    def w(k, shape, scale):
        return jax.random.normal(k, shape, jnp.float32) * scale

    emb = w(ks[0], (V, U), 0.02).at[0].set(0.0)   # padding_idx=0 -> zero row
    return dict(
        emb=emb,
        wih1=w(ks[1], (4 * U, U), s), whh1=w(ks[2], (4 * U, U), s),
        bih1=w(ks[3], (4 * U,), s), bhh1=w(ks[4], (4 * U,), s),
        in_proj_w=w(ks[5], (3 * U, U), s), in_proj_b=w(ks[6], (3 * U,), s),
        out_proj_w=w(ks[7], (U, U), s), out_proj_b=jnp.zeros((U,), jnp.float32),
        ln_g=jnp.ones((U,), jnp.float32), ln_b=jnp.zeros((U,), jnp.float32),
        wih2=w(ks[8], (4 * U, U), s), whh2=w(ks[9], (4 * U, U), s),
        bih2=w(ks[10], (4 * U,), s), bhh2=w(ks[11], (4 * U,), s),
        wl=w(ks[12], (V, U), s), bl=w(ks[13], (V,), s),
    )


def _lstm_ref(x, w_ih_T, w_hh_T, bias):
    def step(carry, x_t):
        h, c = carry
        gates = x_t[None, :] @ w_ih_T + h @ w_hh_T + bias
        h, c = _lstm_cell(gates, c)
        return (h, c), h[0]
    init = (jnp.zeros((1, U), jnp.float32), jnp.zeros((1, U), jnp.float32))
    _, hs = lax.scan(step, init, x)
    return hs


def reference_forward(params, context, target_ids):
    p = params

    def one(ctx, ids):
        x = p["emb"][ids]
        h1 = _lstm_ref(x, p["wih1"].T, p["whh1"].T,
                       (p["bih1"] + p["bhh1"])[None, :])
        wq, wk, wv = jnp.split(p["in_proj_w"], 3, axis=0)
        bq, bk, bv = jnp.split(p["in_proj_b"], 3)
        q = h1 @ wq.T + bq
        k = ctx @ wk.T + bk
        v = ctx @ wv.T + bv
        a = jax.nn.softmax((q @ k.T) / math.sqrt(U), axis=-1)
        att = (a @ v) @ p["out_proj_w"].T + p["out_proj_b"]
        y = att + h1
        mean = y.mean(-1, keepdims=True)
        var = ((y - mean) ** 2).mean(-1, keepdims=True)
        y = (y - mean) / jnp.sqrt(var + 1e-5) * p["ln_g"] + p["ln_b"]
        h2 = _lstm_ref(y, p["wih2"].T, p["whh2"].T,
                       (p["bih2"] + p["bhh2"])[None, :])
        logits = h2 @ p["wl"].T + p["bl"]
        return jax.nn.log_softmax(logits, axis=-1)

    return jax.vmap(one)(context, target_ids)


if __name__ == "__main__":
    key = jax.random.PRNGKey(0)
    k_param, k_ctx, k_ids = jax.random.split(key, 3)

    params = init_params(k_param)
    context = jax.random.normal(k_ctx, (B, S, U), jnp.float32)
    target_ids = jax.random.randint(k_ids, (B, T), 0, V, jnp.int32)

    out = decoder_forward(params, context, target_ids)
    out = jax.block_until_ready(out)

    ref = reference_forward(params, context, target_ids)
    np.testing.assert_allclose(np.asarray(out), np.asarray(ref),
                               rtol=5e-2, atol=5e-2)
    assert out.shape == (B, T, V)
    print("KERNEL_OK")
</pallas_src>

<mosaic_0001>
module attributes {stable_mosaic.version = 11 : i64} {
  func.func @decoder_kernel(%arg0: memref<16x1xi32, #tpu.memory_space<vmem>>, %arg1: memref<2x8x128xbf16, #tpu.memory_space<vmem>>, %arg2: memref<256x128xbf16, #tpu.memory_space<vmem>>, %arg3: memref<128x512xbf16, #tpu.memory_space<vmem>>, %arg4: memref<128x512xbf16, #tpu.memory_space<vmem>>, %arg5: memref<1x512xf32, #tpu.memory_space<vmem>>, %arg6: memref<128x128xbf16, #tpu.memory_space<vmem>>, %arg7: memref<1x128xf32, #tpu.memory_space<vmem>>, %arg8: memref<128x256xbf16, #tpu.memory_space<vmem>>, %arg9: memref<1x256xf32, #tpu.memory_space<vmem>>, %arg10: memref<128x128xbf16, #tpu.memory_space<vmem>>, %arg11: memref<1x128xf32, #tpu.memory_space<vmem>>, %arg12: memref<1x128xf32, #tpu.memory_space<vmem>>, %arg13: memref<1x128xf32, #tpu.memory_space<vmem>>, %arg14: memref<128x512xbf16, #tpu.memory_space<vmem>>, %arg15: memref<128x512xbf16, #tpu.memory_space<vmem>>, %arg16: memref<1x512xf32, #tpu.memory_space<vmem>>, %arg17: memref<128x256xbf16, #tpu.memory_space<vmem>>, %arg18: memref<1x256xf32, #tpu.memory_space<vmem>>, %arg19: memref<16x256xf32, #tpu.memory_space<vmem>>) attributes {dimension_semantics = [], scalar_prefetch = 0 : i64, scratch_operands = 0 : i64, tpu.core_type = #tpu.core_type<tc>} {
    %c0 = arith.constant 0 : index
    %c0_0 = arith.constant 0 : index
    %0 = vector.load %arg0[%c0, %c0_0] : memref<16x1xi32, #tpu.memory_space<vmem>>, vector<16x1xi32>
    %1 = tpu.iota {dimensions = array<i32: 1>} : vector<16x256xi32>
    %2 = vector.broadcast %0 : vector<16x1xi32> to vector<16x256xi32>
    %3 = arith.cmpi eq, %1, %2 : vector<16x256xi32>
    %4 = arith.extui %3 : vector<16x256xi1> to vector<16x256xi32>
    %5 = arith.sitofp %4 : vector<16x256xi32> to vector<16x256xf32>
    %6 = arith.truncf %5 : vector<16x256xf32> to vector<16x256xbf16>
    %c0_1 = arith.constant 0 : index
    %c0_2 = arith.constant 0 : index
    %7 = vector.load %arg2[%c0_1, %c0_2] : memref<256x128xbf16, #tpu.memory_space<vmem>>, vector<256x128xbf16>
    %cst = arith.constant dense<0.000000e+00> : vector<16x128xf32>
    %8 = tpu.matmul %6, %7, %cst {dimension_numbers = #tpu.dot_dimension_numbers<[1], [0], [0], [1], [0, 0, 1, 1], [], []>} : vector<16x256xbf16>, vector<256x128xbf16>, vector<16x128xf32> -> vector<16x128xf32>
    %9 = arith.truncf %8 : vector<16x128xf32> to vector<16x128xbf16>
    %c0_3 = arith.constant 0 : index
    %c0_4 = arith.constant 0 : index
    %10 = vector.load %arg3[%c0_3, %c0_4] : memref<128x512xbf16, #tpu.memory_space<vmem>>, vector<128x512xbf16>
    %cst_5 = arith.constant dense<0.000000e+00> : vector<16x512xf32>
    %11 = tpu.matmul %9, %10, %cst_5 {dimension_numbers = #tpu.dot_dimension_numbers<[1], [0], [0], [1], [0, 0, 1, 1], [], []>} : vector<16x128xbf16>, vector<128x512xbf16>, vector<16x512xf32> -> vector<16x512xf32>
    %c0_6 = arith.constant 0 : index
    %c0_7 = arith.constant 0 : index
    %12 = vector.load %arg5[%c0_6, %c0_7] : memref<1x512xf32, #tpu.memory_space<vmem>>, vector<1x512xf32>
    %13 = vector.broadcast %12 : vector<1x512xf32> to vector<16x512xf32>
    %14 = arith.addf %11, %13 : vector<16x512xf32>
    %cst_8 = arith.constant 0.000000e+00 : f32
    %15 = vector.broadcast %cst_8 : f32 to vector<2x128xf32>
    %cst_9 = arith.constant 0.000000e+00 : f32
    %16 = vector.broadcast %cst_9 : f32 to vector<2x128xf32>
    %17 = vector.extract_strided_slice %14 {offsets = [0, 0], sizes = [2, 512], strides = [1, 1]} : vector<16x512xf32> to vector<2x512xf32>
    %18 = arith.truncf %15 : vector<2x128xf32> to vector<2x128xbf16>
    %c0_10 = arith.constant 0 : index
    %c0_11 = arith.constant 0 : index
    %19 = vector.load %arg4[%c0_10, %c0_11] : memref<128x512xbf16, #tpu.memory_space<vmem>>, vector<128x512xbf16>
    %cst_12 = arith.constant dense<0.000000e+00> : vector<2x512xf32>
    %20 = tpu.matmul %18, %19, %cst_12 {dimension_numbers = #tpu.dot_dimension_numbers<[1], [0], [0], [1], [0, 0, 1, 1], [], []>} : vector<2x128xbf16>, vector<128x512xbf16>, vector<2x512xf32> -> vector<2x512xf32>
    %21 = arith.addf %17, %20 : vector<2x512xf32>
    %22 = vector.extract_strided_slice %21 {offsets = [0, 0], sizes = [2, 128], strides = [1, 1]} : vector<2x512xf32> to vector<2x128xf32>
    %23 = arith.negf %22 : vector<2x128xf32>
    %24 = math.exp %23 : vector<2x128xf32>
    %cst_13 = arith.constant 1.000000e+00 : f32
    %25 = vector.broadcast %cst_13 : f32 to vector<2x128xf32>
    %26 = arith.addf %25, %24 : vector<2x128xf32>
    %27 = arith.divf %25, %26 : vector<2x128xf32>
    %28 = vector.extract_strided_slice %21 {offsets = [0, 128], sizes = [2, 128], strides = [1, 1]} : vector<2x512xf32> to vector<2x128xf32>
    %29 = arith.negf %28 : vector<2x128xf32>
    %30 = math.exp %29 : vector<2x128xf32>
    %cst_14 = arith.constant 1.000000e+00 : f32
    %31 = vector.broadcast %cst_14 : f32 to vector<2x128xf32>
    %32 = arith.addf %31, %30 : vector<2x128xf32>
    %33 = arith.divf %31, %32 : vector<2x128xf32>
    %34 = vector.extract_strided_slice %21 {offsets = [0, 256], sizes = [2, 128], strides = [1, 1]} : vector<2x512xf32> to vector<2x128xf32>
    %35 = math.tanh %34 : vector<2x128xf32>
    %36 = vector.extract_strided_slice %21 {offsets = [0, 384], sizes = [2, 128], strides = [1, 1]} : vector<2x512xf32> to vector<2x128xf32>
    %37 = arith.negf %36 : vector<2x128xf32>
    %38 = math.exp %37 : vector<2x128xf32>
    %cst_15 = arith.constant 1.000000e+00 : f32
    %39 = vector.broadcast %cst_15 : f32 to vector<2x128xf32>
    %40 = arith.addf %39, %38 : vector<2x128xf32>
    %41 = arith.divf %39, %40 : vector<2x128xf32>
    %42 = arith.mulf %33, %16 : vector<2x128xf32>
    %43 = arith.mulf %27, %35 : vector<2x128xf32>
    %44 = arith.addf %42, %43 : vector<2x128xf32>
    %45 = math.tanh %44 : vector<2x128xf32>
    %46 = arith.mulf %41, %45 : vector<2x128xf32>
    %47 = vector.extract_strided_slice %14 {offsets = [2, 0], sizes = [2, 512], strides = [1, 1]} : vector<16x512xf32> to vector<2x512xf32>
    %48 = arith.truncf %46 : vector<2x128xf32> to vector<2x128xbf16>
    %c0_16 = arith.constant 0 : index
    %c0_17 = arith.constant 0 : index
    %49 = vector.load %arg4[%c0_16, %c0_17] : memref<128x512xbf16, #tpu.memory_space<vmem>>, vector<128x512xbf16>
    %cst_18 = arith.constant dense<0.000000e+00> : vector<2x512xf32>
    %50 = tpu.matmul %48, %49, %cst_18 {dimension_numbers = #tpu.dot_dimension_numbers<[1], [0], [0], [1], [0, 0, 1, 1], [], []>} : vector<2x128xbf16>, vector<128x512xbf16>, vector<2x512xf32> -> vector<2x512xf32>
    %51 = arith.addf %47, %50 : vector<2x512xf32>
    %52 = vector.extract_strided_slice %51 {offsets = [0, 0], sizes = [2, 128], strides = [1, 1]} : vector<2x512xf32> to vector<2x128xf32>
    %53 = arith.negf %52 : vector<2x128xf32>
    %54 = math.exp %53 : vector<2x128xf32>
    %cst_19 = arith.constant 1.000000e+00 : f32
    %55 = vector.broadcast %cst_19 : f32 to vector<2x128xf32>
    %56 = arith.addf %55, %54 : vector<2x128xf32>
    %57 = arith.divf %55, %56 : vector<2x128xf32>
    %58 = vector.extract_strided_slice %51 {offsets = [0, 128], sizes = [2, 128], strides = [1, 1]} : vector<2x512xf32> to vector<2x128xf32>
    %59 = arith.negf %58 : vector<2x128xf32>
    %60 = math.exp %59 : vector<2x128xf32>
    %cst_20 = arith.constant 1.000000e+00 : f32
    %61 = vector.broadcast %cst_20 : f32 to vector<2x128xf32>
    %62 = arith.addf %61, %60 : vector<2x128xf32>
    %63 = arith.divf %61, %62 : vector<2x128xf32>
    %64 = vector.extract_strided_slice %51 {offsets = [0, 256], sizes = [2, 128], strides = [1, 1]} : vector<2x512xf32> to vector<2x128xf32>
    %65 = math.tanh %64 : vector<2x128xf32>
    %66 = vector.extract_strided_slice %51 {offsets = [0, 384], sizes = [2, 128], strides = [1, 1]} : vector<2x512xf32> to vector<2x128xf32>
    %67 = arith.negf %66 : vector<2x128xf32>
    %68 = math.exp %67 : vector<2x128xf32>
    %cst_21 = arith.constant 1.000000e+00 : f32
    %69 = vector.broadcast %cst_21 : f32 to vector<2x128xf32>
    %70 = arith.addf %69, %68 : vector<2x128xf32>
    %71 = arith.divf %69, %70 : vector<2x128xf32>
    %72 = arith.mulf %63, %44 : vector<2x128xf32>
    %73 = arith.mulf %57, %65 : vector<2x128xf32>
    %74 = arith.addf %72, %73 : vector<2x128xf32>
    %75 = math.tanh %74 : vector<2x128xf32>
    %76 = arith.mulf %71, %75 : vector<2x128xf32>
    %77 = vector.extract_strided_slice %14 {offsets = [4, 0], sizes = [2, 512], strides = [1, 1]} : vector<16x512xf32> to vector<2x512xf32>
    %78 = arith.truncf %76 : vector<2x128xf32> to vector<2x128xbf16>
    %c0_22 = arith.constant 0 : index
    %c0_23 = arith.constant 0 : index
    %79 = vector.load %arg4[%c0_22, %c0_23] : memref<128x512xbf16, #tpu.memory_space<vmem>>, vector<128x512xbf16>
    %cst_24 = arith.constant dense<0.000000e+00> : vector<2x512xf32>
    %80 = tpu.matmul %78, %79, %cst_24 {dimension_numbers = #tpu.dot_dimension_numbers<[1], [0], [0], [1], [0, 0, 1, 1], [], []>} : vector<2x128xbf16>, vector<128x512xbf16>, vector<2x512xf32> -> vector<2x512xf32>
    %81 = arith.addf %77, %80 : vector<2x512xf32>
    %82 = vector.extract_strided_slice %81 {offsets = [0, 0], sizes = [2, 128], strides = [1, 1]} : vector<2x512xf32> to vector<2x128xf32>
    %83 = arith.negf %82 : vector<2x128xf32>
    %84 = math.exp %83 : vector<2x128xf32>
    %cst_25 = arith.constant 1.000000e+00 : f32
    %85 = vector.broadcast %cst_25 : f32 to vector<2x128xf32>
    %86 = arith.addf %85, %84 : vector<2x128xf32>
    %87 = arith.divf %85, %86 : vector<2x128xf32>
    %88 = vector.extract_strided_slice %81 {offsets = [0, 128], sizes = [2, 128], strides = [1, 1]} : vector<2x512xf32> to vector<2x128xf32>
    %89 = arith.negf %88 : vector<2x128xf32>
    %90 = math.exp %89 : vector<2x128xf32>
    %cst_26 = arith.constant 1.000000e+00 : f32
    %91 = vector.broadcast %cst_26 : f32 to vector<2x128xf32>
    %92 = arith.addf %91, %90 : vector<2x128xf32>
    %93 = arith.divf %91, %92 : vector<2x128xf32>
    %94 = vector.extract_strided_slice %81 {offsets = [0, 256], sizes = [2, 128], strides = [1, 1]} : vector<2x512xf32> to vector<2x128xf32>
    %95 = math.tanh %94 : vector<2x128xf32>
    %96 = vector.extract_strided_slice %81 {offsets = [0, 384], sizes = [2, 128], strides = [1, 1]} : vector<2x512xf32> to vector<2x128xf32>
    %97 = arith.negf %96 : vector<2x128xf32>
    %98 = math.exp %97 : vector<2x128xf32>
    %cst_27 = arith.constant 1.000000e+00 : f32
    %99 = vector.broadcast %cst_27 : f32 to vector<2x128xf32>
    %100 = arith.addf %99, %98 : vector<2x128xf32>
    %101 = arith.divf %99, %100 : vector<2x128xf32>
    %102 = arith.mulf %93, %74 : vector<2x128xf32>
    %103 = arith.mulf %87, %95 : vector<2x128xf32>
    %104 = arith.addf %102, %103 : vector<2x128xf32>
    %105 = math.tanh %104 : vector<2x128xf32>
    %106 = arith.mulf %101, %105 : vector<2x128xf32>
    %107 = vector.extract_strided_slice %14 {offsets = [6, 0], sizes = [2, 512], strides = [1, 1]} : vector<16x512xf32> to vector<2x512xf32>
    %108 = arith.truncf %106 : vector<2x128xf32> to vector<2x128xbf16>
    %c0_28 = arith.constant 0 : index
    %c0_29 = arith.constant 0 : index
    %109 = vector.load %arg4[%c0_28, %c0_29] : memref<128x512xbf16, #tpu.memory_space<vmem>>, vector<128x512xbf16>
    %cst_30 = arith.constant dense<0.000000e+00> : vector<2x512xf32>
    %110 = tpu.matmul %108, %109, %cst_30 {dimension_numbers = #tpu.dot_dimension_numbers<[1], [0], [0], [1], [0, 0, 1, 1], [], []>} : vector<2x128xbf16>, vector<128x512xbf16>, vector<2x512xf32> -> vector<2x512xf32>
    %111 = arith.addf %107, %110 : vector<2x512xf32>
    %112 = vector.extract_strided_slice %111 {offsets = [0, 0], sizes = [2, 128], strides = [1, 1]} : vector<2x512xf32> to vector<2x128xf32>
    %113 = arith.negf %112 : vector<2x128xf32>
    %114 = math.exp %113 : vector<2x128xf32>
    %cst_31 = arith.constant 1.000000e+00 : f32
    %115 = vector.broadcast %cst_31 : f32 to vector<2x128xf32>
    %116 = arith.addf %115, %114 : vector<2x128xf32>
    %117 = arith.divf %115, %116 : vector<2x128xf32>
    %118 = vector.extract_strided_slice %111 {offsets = [0, 128], sizes = [2, 128], strides = [1, 1]} : vector<2x512xf32> to vector<2x128xf32>
    %119 = arith.negf %118 : vector<2x128xf32>
    %120 = math.exp %119 : vector<2x128xf32>
    %cst_32 = arith.constant 1.000000e+00 : f32
    %121 = vector.broadcast %cst_32 : f32 to vector<2x128xf32>
    %122 = arith.addf %121, %120 : vector<2x128xf32>
    %123 = arith.divf %121, %122 : vector<2x128xf32>
    %124 = vector.extract_strided_slice %111 {offsets = [0, 256], sizes = [2, 128], strides = [1, 1]} : vector<2x512xf32> to vector<2x128xf32>
    %125 = math.tanh %124 : vector<2x128xf32>
    %126 = vector.extract_strided_slice %111 {offsets = [0, 384], sizes = [2, 128], strides = [1, 1]} : vector<2x512xf32> to vector<2x128xf32>
    %127 = arith.negf %126 : vector<2x128xf32>
    %128 = math.exp %127 : vector<2x128xf32>
    %cst_33 = arith.constant 1.000000e+00 : f32
    %129 = vector.broadcast %cst_33 : f32 to vector<2x128xf32>
    %130 = arith.addf %129, %128 : vector<2x128xf32>
    %131 = arith.divf %129, %130 : vector<2x128xf32>
    %132 = arith.mulf %123, %104 : vector<2x128xf32>
    %133 = arith.mulf %117, %125 : vector<2x128xf32>
    %134 = arith.addf %132, %133 : vector<2x128xf32>
    %135 = math.tanh %134 : vector<2x128xf32>
    %136 = arith.mulf %131, %135 : vector<2x128xf32>
    %137 = vector.extract_strided_slice %14 {offsets = [8, 0], sizes = [2, 512], strides = [1, 1]} : vector<16x512xf32> to vector<2x512xf32>
    %138 = arith.truncf %136 : vector<2x128xf32> to vector<2x128xbf16>
    %c0_34 = arith.constant 0 : index
    %c0_35 = arith.constant 0 : index
    %139 = vector.load %arg4[%c0_34, %c0_35] : memref<128x512xbf16, #tpu.memory_space<vmem>>, vector<128x512xbf16>
    %cst_36 = arith.constant dense<0.000000e+00> : vector<2x512xf32>
    %140 = tpu.matmul %138, %139, %cst_36 {dimension_numbers = #tpu.dot_dimension_numbers<[1], [0], [0], [1], [0, 0, 1, 1], [], []>} : vector<2x128xbf16>, vector<128x512xbf16>, vector<2x512xf32> -> vector<2x512xf32>
    %141 = arith.addf %137, %140 : vector<2x512xf32>
    %142 = vector.extract_strided_slice %141 {offsets = [0, 0], sizes = [2, 128], strides = [1, 1]} : vector<2x512xf32> to vector<2x128xf32>
    %143 = arith.negf %142 : vector<2x128xf32>
    %144 = math.exp %143 : vector<2x128xf32>
    %cst_37 = arith.constant 1.000000e+00 : f32
    %145 = vector.broadcast %cst_37 : f32 to vector<2x128xf32>
    %146 = arith.addf %145, %144 : vector<2x128xf32>
    %147 = arith.divf %145, %146 : vector<2x128xf32>
    %148 = vector.extract_strided_slice %141 {offsets = [0, 128], sizes = [2, 128], strides = [1, 1]} : vector<2x512xf32> to vector<2x128xf32>
    %149 = arith.negf %148 : vector<2x128xf32>
    %150 = math.exp %149 : vector<2x128xf32>
    %cst_38 = arith.constant 1.000000e+00 : f32
    %151 = vector.broadcast %cst_38 : f32 to vector<2x128xf32>
    %152 = arith.addf %151, %150 : vector<2x128xf32>
    %153 = arith.divf %151, %152 : vector<2x128xf32>
    %154 = vector.extract_strided_slice %141 {offsets = [0, 256], sizes = [2, 128], strides = [1, 1]} : vector<2x512xf32> to vector<2x128xf32>
    %155 = math.tanh %154 : vector<2x128xf32>
    %156 = vector.extract_strided_slice %141 {offsets = [0, 384], sizes = [2, 128], strides = [1, 1]} : vector<2x512xf32> to vector<2x128xf32>
    %157 = arith.negf %156 : vector<2x128xf32>
    %158 = math.exp %157 : vector<2x128xf32>
    %cst_39 = arith.constant 1.000000e+00 : f32
    %159 = vector.broadcast %cst_39 : f32 to vector<2x128xf32>
    %160 = arith.addf %159, %158 : vector<2x128xf32>
    %161 = arith.divf %159, %160 : vector<2x128xf32>
    %162 = arith.mulf %153, %134 : vector<2x128xf32>
    %163 = arith.mulf %147, %155 : vector<2x128xf32>
    %164 = arith.addf %162, %163 : vector<2x128xf32>
    %165 = math.tanh %164 : vector<2x128xf32>
    %166 = arith.mulf %161, %165 : vector<2x128xf32>
    %167 = vector.extract_strided_slice %14 {offsets = [10, 0], sizes = [2, 512], strides = [1, 1]} : vector<16x512xf32> to vector<2x512xf32>
    %168 = arith.truncf %166 : vector<2x128xf32> to vector<2x128xbf16>
    %c0_40 = arith.constant 0 : index
    %c0_41 = arith.constant 0 : index
    %169 = vector.load %arg4[%c0_40, %c0_41] : memref<128x512xbf16, #tpu.memory_space<vmem>>, vector<128x512xbf16>
    %cst_42 = arith.constant dense<0.000000e+00> : vector<2x512xf32>
    %170 = tpu.matmul %168, %169, %cst_42 {dimension_numbers = #tpu.dot_dimension_numbers<[1], [0], [0], [1], [0, 0, 1, 1], [], []>} : vector<2x128xbf16>, vector<128x512xbf16>, vector<2x512xf32> -> vector<2x512xf32>
    %171 = arith.addf %167, %170 : vector<2x512xf32>
    %172 = vector.extract_strided_slice %171 {offsets = [0, 0], sizes = [2, 128], strides = [1, 1]} : vector<2x512xf32> to vector<2x128xf32>
    %173 = arith.negf %172 : vector<2x128xf32>
    %174 = math.exp %173 : vector<2x128xf32>
    %cst_43 = arith.constant 1.000000e+00 : f32
    %175 = vector.broadcast %cst_43 : f32 to vector<2x128xf32>
    %176 = arith.addf %175, %174 : vector<2x128xf32>
    %177 = arith.divf %175, %176 : vector<2x128xf32>
    %178 = vector.extract_strided_slice %171 {offsets = [0, 128], sizes = [2, 128], strides = [1, 1]} : vector<2x512xf32> to vector<2x128xf32>
    %179 = arith.negf %178 : vector<2x128xf32>
    %180 = math.exp %179 : vector<2x128xf32>
    %cst_44 = arith.constant 1.000000e+00 : f32
    %181 = vector.broadcast %cst_44 : f32 to vector<2x128xf32>
    %182 = arith.addf %181, %180 : vector<2x128xf32>
    %183 = arith.divf %181, %182 : vector<2x128xf32>
    %184 = vector.extract_strided_slice %171 {offsets = [0, 256], sizes = [2, 128], strides = [1, 1]} : vector<2x512xf32> to vector<2x128xf32>
    %185 = math.tanh %184 : vector<2x128xf32>
    %186 = vector.extract_strided_slice %171 {offsets = [0, 384], sizes = [2, 128], strides = [1, 1]} : vector<2x512xf32> to vector<2x128xf32>
    %187 = arith.negf %186 : vector<2x128xf32>
    %188 = math.exp %187 : vector<2x128xf32>
    %cst_45 = arith.constant 1.000000e+00 : f32
    %189 = vector.broadcast %cst_45 : f32 to vector<2x128xf32>
    %190 = arith.addf %189, %188 : vector<2x128xf32>
    %191 = arith.divf %189, %190 : vector<2x128xf32>
    %192 = arith.mulf %183, %164 : vector<2x128xf32>
    %193 = arith.mulf %177, %185 : vector<2x128xf32>
    %194 = arith.addf %192, %193 : vector<2x128xf32>
    %195 = math.tanh %194 : vector<2x128xf32>
    %196 = arith.mulf %191, %195 : vector<2x128xf32>
    %197 = vector.extract_strided_slice %14 {offsets = [12, 0], sizes = [2, 512], strides = [1, 1]} : vector<16x512xf32> to vector<2x512xf32>
    %198 = arith.truncf %196 : vector<2x128xf32> to vector<2x128xbf16>
    %c0_46 = arith.constant 0 : index
    %c0_47 = arith.constant 0 : index
    %199 = vector.load %arg4[%c0_46, %c0_47] : memref<128x512xbf16, #tpu.memory_space<vmem>>, vector<128x512xbf16>
    %cst_48 = arith.constant dense<0.000000e+00> : vector<2x512xf32>
    %200 = tpu.matmul %198, %199, %cst_48 {dimension_numbers = #tpu.dot_dimension_numbers<[1], [0], [0], [1], [0, 0, 1, 1], [], []>} : vector<2x128xbf16>, vector<128x512xbf16>, vector<2x512xf32> -> vector<2x512xf32>
    %201 = arith.addf %197, %200 : vector<2x512xf32>
    %202 = vector.extract_strided_slice %201 {offsets = [0, 0], sizes = [2, 128], strides = [1, 1]} : vector<2x512xf32> to vector<2x128xf32>
    %203 = arith.negf %202 : vector<2x128xf32>
    %204 = math.exp %203 : vector<2x128xf32>
    %cst_49 = arith.constant 1.000000e+00 : f32
    %205 = vector.broadcast %cst_49 : f32 to vector<2x128xf32>
    %206 = arith.addf %205, %204 : vector<2x128xf32>
    %207 = arith.divf %205, %206 : vector<2x128xf32>
    %208 = vector.extract_strided_slice %201 {offsets = [0, 128], sizes = [2, 128], strides = [1, 1]} : vector<2x512xf32> to vector<2x128xf32>
    %209 = arith.negf %208 : vector<2x128xf32>
    %210 = math.exp %209 : vector<2x128xf32>
    %cst_50 = arith.constant 1.000000e+00 : f32
    %211 = vector.broadcast %cst_50 : f32 to vector<2x128xf32>
    %212 = arith.addf %211, %210 : vector<2x128xf32>
    %213 = arith.divf %211, %212 : vector<2x128xf32>
    %214 = vector.extract_strided_slice %201 {offsets = [0, 256], sizes = [2, 128], strides = [1, 1]} : vector<2x512xf32> to vector<2x128xf32>
    %215 = math.tanh %214 : vector<2x128xf32>
    %216 = vector.extract_strided_slice %201 {offsets = [0, 384], sizes = [2, 128], strides = [1, 1]} : vector<2x512xf32> to vector<2x128xf32>
    %217 = arith.negf %216 : vector<2x128xf32>
    %218 = math.exp %217 : vector<2x128xf32>
    %cst_51 = arith.constant 1.000000e+00 : f32
    %219 = vector.broadcast %cst_51 : f32 to vector<2x128xf32>
    %220 = arith.addf %219, %218 : vector<2x128xf32>
    %221 = arith.divf %219, %220 : vector<2x128xf32>
    %222 = arith.mulf %213, %194 : vector<2x128xf32>
    %223 = arith.mulf %207, %215 : vector<2x128xf32>
    %224 = arith.addf %222, %223 : vector<2x128xf32>
    %225 = math.tanh %224 : vector<2x128xf32>
    %226 = arith.mulf %221, %225 : vector<2x128xf32>
    %227 = vector.extract_strided_slice %14 {offsets = [14, 0], sizes = [2, 512], strides = [1, 1]} : vector<16x512xf32> to vector<2x512xf32>
    %228 = arith.truncf %226 : vector<2x128xf32> to vector<2x128xbf16>
    %c0_52 = arith.constant 0 : index
    %c0_53 = arith.constant 0 : index
    %229 = vector.load %arg4[%c0_52, %c0_53] : memref<128x512xbf16, #tpu.memory_space<vmem>>, vector<128x512xbf16>
    %cst_54 = arith.constant dense<0.000000e+00> : vector<2x512xf32>
    %230 = tpu.matmul %228, %229, %cst_54 {dimension_numbers = #tpu.dot_dimension_numbers<[1], [0], [0], [1], [0, 0, 1, 1], [], []>} : vector<2x128xbf16>, vector<128x512xbf16>, vector<2x512xf32> -> vector<2x512xf32>
    %231 = arith.addf %227, %230 : vector<2x512xf32>
    %232 = vector.extract_strided_slice %231 {offsets = [0, 0], sizes = [2, 128], strides = [1, 1]} : vector<2x512xf32> to vector<2x128xf32>
    %233 = arith.negf %232 : vector<2x128xf32>
    %234 = math.exp %233 : vector<2x128xf32>
    %cst_55 = arith.constant 1.000000e+00 : f32
    %235 = vector.broadcast %cst_55 : f32 to vector<2x128xf32>
    %236 = arith.addf %235, %234 : vector<2x128xf32>
    %237 = arith.divf %235, %236 : vector<2x128xf32>
    %238 = vector.extract_strided_slice %231 {offsets = [0, 128], sizes = [2, 128], strides = [1, 1]} : vector<2x512xf32> to vector<2x128xf32>
    %239 = arith.negf %238 : vector<2x128xf32>
    %240 = math.exp %239 : vector<2x128xf32>
    %cst_56 = arith.constant 1.000000e+00 : f32
    %241 = vector.broadcast %cst_56 : f32 to vector<2x128xf32>
    %242 = arith.addf %241, %240 : vector<2x128xf32>
    %243 = arith.divf %241, %242 : vector<2x128xf32>
    %244 = vector.extract_strided_slice %231 {offsets = [0, 256], sizes = [2, 128], strides = [1, 1]} : vector<2x512xf32> to vector<2x128xf32>
    %245 = math.tanh %244 : vector<2x128xf32>
    %246 = vector.extract_strided_slice %231 {offsets = [0, 384], sizes = [2, 128], strides = [1, 1]} : vector<2x512xf32> to vector<2x128xf32>
    %247 = arith.negf %246 : vector<2x128xf32>
    %248 = math.exp %247 : vector<2x128xf32>
    %cst_57 = arith.constant 1.000000e+00 : f32
    %249 = vector.broadcast %cst_57 : f32 to vector<2x128xf32>
    %250 = arith.addf %249, %248 : vector<2x128xf32>
    %251 = arith.divf %249, %250 : vector<2x128xf32>
    %252 = arith.mulf %243, %224 : vector<2x128xf32>
    %253 = arith.mulf %237, %245 : vector<2x128xf32>
    %254 = arith.addf %252, %253 : vector<2x128xf32>
    %255 = math.tanh %254 : vector<2x128xf32>
    %256 = arith.mulf %251, %255 : vector<2x128xf32>
    %257 = tpu.concatenate %46, %76, %106, %136, %166, %196, %226, %256 in 0 : vector<2x128xf32>, vector<2x128xf32>, vector<2x128xf32>, vector<2x128xf32>, vector<2x128xf32>, vector<2x128xf32>, vector<2x128xf32>, vector<2x128xf32> -> vector<16x128xf32>
    %c0_58 = arith.constant 0 : index
    %c0_59 = arith.constant 0 : index
    %c0_60 = arith.constant 0 : index
    %258 = vector.load %arg1[%c0_58, %c0_59, %c0_60] : memref<2x8x128xbf16, #tpu.memory_space<vmem>>, vector<2x8x128xbf16>
    %259 = vector.shape_cast %258 : vector<2x8x128xbf16> to vector<16x128xbf16>
    %260 = arith.truncf %257 : vector<16x128xf32> to vector<16x128xbf16>
    %c0_61 = arith.constant 0 : index
    %c0_62 = arith.constant 0 : index
    %261 = vector.load %arg6[%c0_61, %c0_62] : memref<128x128xbf16, #tpu.memory_space<vmem>>, vector<128x128xbf16>
    %cst_63 = arith.constant dense<0.000000e+00> : vector<16x128xf32>
    %262 = tpu.matmul %260, %261, %cst_63 {dimension_numbers = #tpu.dot_dimension_numbers<[1], [0], [0], [1], [0, 0, 1, 1], [], []>} : vector<16x128xbf16>, vector<128x128xbf16>, vector<16x128xf32> -> vector<16x128xf32>
    %c0_64 = arith.constant 0 : index
    %c0_65 = arith.constant 0 : index
    %263 = vector.load %arg7[%c0_64, %c0_65] : memref<1x128xf32, #tpu.memory_space<vmem>>, vector<1x128xf32>
    %264 = vector.broadcast %263 : vector<1x128xf32> to vector<16x128xf32>
    %265 = arith.addf %262, %264 : vector<16x128xf32>
    %c0_66 = arith.constant 0 : index
    %c0_67 = arith.constant 0 : index
    %266 = vector.load %arg8[%c0_66, %c0_67] : memref<128x256xbf16, #tpu.memory_space<vmem>>, vector<128x256xbf16>
    %cst_68 = arith.constant dense<0.000000e+00> : vector<16x256xf32>
    %267 = tpu.matmul %259, %266, %cst_68 {dimension_numbers = #tpu.dot_dimension_numbers<[1], [0], [0], [1], [0, 0, 1, 1], [], []>} : vector<16x128xbf16>, vector<128x256xbf16>, vector<16x256xf32> -> vector<16x256xf32>
    %c0_69 = arith.constant 0 : index
    %c0_70 = arith.constant 0 : index
    %268 = vector.load %arg9[%c0_69, %c0_70] : memref<1x256xf32, #tpu.memory_space<vmem>>, vector<1x256xf32>
    %269 = vector.broadcast %268 : vector<1x256xf32> to vector<16x256xf32>
    %270 = arith.addf %267, %269 : vector<16x256xf32>
    %271 = vector.extract_strided_slice %270 {offsets = [0, 0], sizes = [16, 128], strides = [1, 1]} : vector<16x256xf32> to vector<16x128xf32>
    %272 = vector.shape_cast %271 : vector<16x128xf32> to vector<2x8x128xf32>
    %273 = arith.truncf %272 : vector<2x8x128xf32> to vector<2x8x128xbf16>
    %274 = vector.extract_strided_slice %270 {offsets = [0, 128], sizes = [16, 128], strides = [1, 1]} : vector<16x256xf32> to vector<16x128xf32>
    %275 = vector.shape_cast %274 : vector<16x128xf32> to vector<2x8x128xf32>
    %276 = arith.truncf %275 : vector<2x8x128xf32> to vector<2x8x128xbf16>
    %277 = vector.shape_cast %265 : vector<16x128xf32> to vector<8x2x128xf32>
    %278 = tpu.transpose %277, [1, 0, 2] : vector<8x2x128xf32> -> vector<2x8x128xf32>
    %279 = arith.truncf %278 : vector<2x8x128xf32> to vector<2x8x128xbf16>
    "tpu.trace_start"() <{level = 10 : i32, message = "btu,bsu->bts"}> : () -> ()
    %cst_71 = arith.constant dense<0.000000e+00> : vector<2x8x8xf32>
    %280 = tpu.matmul %279, %273, %cst_71 {dimension_numbers = #tpu.dot_dimension_numbers<[2], [2], [1], [1], [0, 0, 0, 1, 1, 1], [0], [0]>} : vector<2x8x128xbf16>, vector<2x8x128xbf16>, vector<2x8x8xf32> -> vector<2x8x8xf32>
    "tpu.trace_stop"() : () -> ()
    %cst_72 = arith.constant 0.0883883461 : f32
    %281 = vector.broadcast %cst_72 : f32 to vector<2x8x8xf32>
    %282 = arith.mulf %280, %281 : vector<2x8x8xf32>
    %cst_73 = arith.constant dense<0xFF800000> : vector<2x8xf32>
    %283 = vector.multi_reduction <maximumf>, %282, %cst_73 [2] : vector<2x8x8xf32> to vector<2x8xf32>
    %284 = vector.shape_cast %283 : vector<2x8xf32> to vector<2x8x1xf32>
    %285 = vector.broadcast %284 : vector<2x8x1xf32> to vector<2x8x8xf32>
    %286 = arith.subf %282, %285 : vector<2x8x8xf32>
    %287 = math.exp %286 : vector<2x8x8xf32>
    %cst_74 = arith.constant dense<0.000000e+00> : vector<2x8xf32>
    %288 = vector.multi_reduction <add>, %287, %cst_74 [2] : vector<2x8x8xf32> to vector<2x8xf32>
    %289 = vector.shape_cast %288 : vector<2x8xf32> to vector<2x8x1xf32>
    %290 = tpu.reciprocal %289 {approx = true} : vector<2x8x1xf32> -> vector<2x8x1xf32>
    %291 = vector.broadcast %290 : vector<2x8x1xf32> to vector<2x8x8xf32>
    %292 = arith.mulf %287, %291 : vector<2x8x8xf32>
    %293 = arith.truncf %292 : vector<2x8x8xf32> to vector<2x8x8xbf16>
    "tpu.trace_start"() <{level = 10 : i32, message = "bts,bsu->btu"}> : () -> ()
    %cst_75 = arith.constant dense<0.000000e+00> : vector<2x8x128xf32>
    %294 = tpu.matmul %293, %276, %cst_75 {dimension_numbers = #tpu.dot_dimension_numbers<[2], [1], [1], [2], [0, 0, 0, 1, 1, 2], [0], [0]>} : vector<2x8x8xbf16>, vector<2x8x128xbf16>, vector<2x8x128xf32> -> vector<2x8x128xf32>
    "tpu.trace_stop"() : () -> ()
    %295 = tpu.transpose %294, [1, 0, 2] : vector<2x8x128xf32> -> vector<8x2x128xf32>
    %296 = vector.shape_cast %295 : vector<8x2x128xf32> to vector<16x128xf32>
    %297 = arith.truncf %296 : vector<16x128xf32> to vector<16x128xbf16>
    %c0_76 = arith.constant 0 : index
    %c0_77 = arith.constant 0 : index
    %298 = vector.load %arg10[%c0_76, %c0_77] : memref<128x128xbf16, #tpu.memory_space<vmem>>, vector<128x128xbf16>
    %cst_78 = arith.constant dense<0.000000e+00> : vector<16x128xf32>
    %299 = tpu.matmul %297, %298, %cst_78 {dimension_numbers = #tpu.dot_dimension_numbers<[1], [0], [0], [1], [0, 0, 1, 1], [], []>} : vector<16x128xbf16>, vector<128x128xbf16>, vector<16x128xf32> -> vector<16x128xf32>
    %c0_79 = arith.constant 0 : index
    %c0_80 = arith.constant 0 : index
    %300 = vector.load %arg11[%c0_79, %c0_80] : memref<1x128xf32, #tpu.memory_space<vmem>>, vector<1x128xf32>
    %301 = vector.broadcast %300 : vector<1x128xf32> to vector<16x128xf32>
    %302 = arith.addf %299, %301 : vector<16x128xf32>
    %303 = arith.addf %302, %257 : vector<16x128xf32>
    %cst_81 = arith.constant dense<0.000000e+00> : vector<16xf32>
    %304 = vector.multi_reduction <add>, %303, %cst_81 [1] : vector<16x128xf32> to vector<16xf32>
    %305 = vector.shape_cast %304 : vector<16xf32> to vector<16x1xf32>
    %cst_82 = arith.constant 1.280000e+02 : f32
    %306 = vector.broadcast %cst_82 : f32 to vector<16x1xf32>
    %307 = arith.divf %305, %306 : vector<16x1xf32>
    %308 = vector.broadcast %307 : vector<16x1xf32> to vector<16x128xf32>
    %309 = arith.subf %303, %308 : vector<16x128xf32>
    %310 = arith.mulf %309, %309 : vector<16x128xf32>
    %cst_83 = arith.constant dense<0.000000e+00> : vector<16xf32>
    %311 = vector.multi_reduction <add>, %310, %cst_83 [1] : vector<16x128xf32> to vector<16xf32>
    %312 = vector.shape_cast %311 : vector<16xf32> to vector<16x1xf32>
    %cst_84 = arith.constant 1.280000e+02 : f32
    %313 = vector.broadcast %cst_84 : f32 to vector<16x1xf32>
    %314 = arith.divf %312, %313 : vector<16x1xf32>
    %315 = vector.broadcast %307 : vector<16x1xf32> to vector<16x128xf32>
    %316 = arith.subf %303, %315 : vector<16x128xf32>
    %cst_85 = arith.constant 9.99999974E-6 : f32
    %317 = vector.broadcast %cst_85 : f32 to vector<16x1xf32>
    %318 = arith.addf %314, %317 : vector<16x1xf32>
    %319 = math.rsqrt %318 : vector<16x1xf32>
    %320 = vector.broadcast %319 : vector<16x1xf32> to vector<16x128xf32>
    %321 = arith.mulf %316, %320 : vector<16x128xf32>
    %c0_86 = arith.constant 0 : index
    %c0_87 = arith.constant 0 : index
    %322 = vector.load %arg12[%c0_86, %c0_87] : memref<1x128xf32, #tpu.memory_space<vmem>>, vector<1x128xf32>
    %323 = vector.broadcast %322 : vector<1x128xf32> to vector<16x128xf32>
    %324 = arith.mulf %321, %323 : vector<16x128xf32>
    %c0_88 = arith.constant 0 : index
    %c0_89 = arith.constant 0 : index
    %325 = vector.load %arg13[%c0_88, %c0_89] : memref<1x128xf32, #tpu.memory_space<vmem>>, vector<1x128xf32>
    %326 = vector.broadcast %325 : vector<1x128xf32> to vector<16x128xf32>
    %327 = arith.addf %324, %326 : vector<16x128xf32>
    %328 = arith.truncf %327 : vector<16x128xf32> to vector<16x128xbf16>
    %c0_90 = arith.constant 0 : index
    %c0_91 = arith.constant 0 : index
    %329 = vector.load %arg14[%c0_90, %c0_91] : memref<128x512xbf16, #tpu.memory_space<vmem>>, vector<128x512xbf16>
    %cst_92 = arith.constant dense<0.000000e+00> : vector<16x512xf32>
    %330 = tpu.matmul %328, %329, %cst_92 {dimension_numbers = #tpu.dot_dimension_numbers<[1], [0], [0], [1], [0, 0, 1, 1], [], []>} : vector<16x128xbf16>, vector<128x512xbf16>, vector<16x512xf32> -> vector<16x512xf32>
    %c0_93 = arith.constant 0 : index
    %c0_94 = arith.constant 0 : index
    %331 = vector.load %arg16[%c0_93, %c0_94] : memref<1x512xf32, #tpu.memory_space<vmem>>, vector<1x512xf32>
    %332 = vector.broadcast %331 : vector<1x512xf32> to vector<16x512xf32>
    %333 = arith.addf %330, %332 : vector<16x512xf32>
    %cst_95 = arith.constant 0.000000e+00 : f32
    %334 = vector.broadcast %cst_95 : f32 to vector<2x128xf32>
    %cst_96 = arith.constant 0.000000e+00 : f32
    %335 = vector.broadcast %cst_96 : f32 to vector<2x128xf32>
    %336 = vector.extract_strided_slice %333 {offsets = [0, 0], sizes = [2, 512], strides = [1, 1]} : vector<16x512xf32> to vector<2x512xf32>
    %337 = arith.truncf %334 : vector<2x128xf32> to vector<2x128xbf16>
    %c0_97 = arith.constant 0 : index
    %c0_98 = arith.constant 0 : index
    %338 = vector.load %arg15[%c0_97, %c0_98] : memref<128x512xbf16, #tpu.memory_space<vmem>>, vector<128x512xbf16>
    %cst_99 = arith.constant dense<0.000000e+00> : vector<2x512xf32>
    %339 = tpu.matmul %337, %338, %cst_99 {dimension_numbers = #tpu.dot_dimension_numbers<[1], [0], [0], [1], [0, 0, 1, 1], [], []>} : vector<2x128xbf16>, vector<128x512xbf16>, vector<2x512xf32> -> vector<2x512xf32>
    %340 = arith.addf %336, %339 : vector<2x512xf32>
    %341 = vector.extract_strided_slice %340 {offsets = [0, 0], sizes = [2, 128], strides = [1, 1]} : vector<2x512xf32> to vector<2x128xf32>
    %342 = arith.negf %341 : vector<2x128xf32>
    %343 = math.exp %342 : vector<2x128xf32>
    %cst_100 = arith.constant 1.000000e+00 : f32
    %344 = vector.broadcast %cst_100 : f32 to vector<2x128xf32>
    %345 = arith.addf %344, %343 : vector<2x128xf32>
    %346 = arith.divf %344, %345 : vector<2x128xf32>
    %347 = vector.extract_strided_slice %340 {offsets = [0, 128], sizes = [2, 128], strides = [1, 1]} : vector<2x512xf32> to vector<2x128xf32>
    %348 = arith.negf %347 : vector<2x128xf32>
    %349 = math.exp %348 : vector<2x128xf32>
    %cst_101 = arith.constant 1.000000e+00 : f32
    %350 = vector.broadcast %cst_101 : f32 to vector<2x128xf32>
    %351 = arith.addf %350, %349 : vector<2x128xf32>
    %352 = arith.divf %350, %351 : vector<2x128xf32>
    %353 = vector.extract_strided_slice %340 {offsets = [0, 256], sizes = [2, 128], strides = [1, 1]} : vector<2x512xf32> to vector<2x128xf32>
    %354 = math.tanh %353 : vector<2x128xf32>
    %355 = vector.extract_strided_slice %340 {offsets = [0, 384], sizes = [2, 128], strides = [1, 1]} : vector<2x512xf32> to vector<2x128xf32>
    %356 = arith.negf %355 : vector<2x128xf32>
    %357 = math.exp %356 : vector<2x128xf32>
    %cst_102 = arith.constant 1.000000e+00 : f32
    %358 = vector.broadcast %cst_102 : f32 to vector<2x128xf32>
    %359 = arith.addf %358, %357 : vector<2x128xf32>
    %360 = arith.divf %358, %359 : vector<2x128xf32>
    %361 = arith.mulf %352, %335 : vector<2x128xf32>
    %362 = arith.mulf %346, %354 : vector<2x128xf32>
    %363 = arith.addf %361, %362 : vector<2x128xf32>
    %364 = math.tanh %363 : vector<2x128xf32>
    %365 = arith.mulf %360, %364 : vector<2x128xf32>
    %366 = vector.extract_strided_slice %333 {offsets = [2, 0], sizes = [2, 512], strides = [1, 1]} : vector<16x512xf32> to vector<2x512xf32>
    %367 = arith.truncf %365 : vector<2x128xf32> to vector<2x128xbf16>
    %c0_103 = arith.constant 0 : index
    %c0_104 = arith.constant 0 : index
    %368 = vector.load %arg15[%c0_103, %c0_104] : memref<128x512xbf16, #tpu.memory_space<vmem>>, vector<128x512xbf16>
    %cst_105 = arith.constant dense<0.000000e+00> : vector<2x512xf32>
    %369 = tpu.matmul %367, %368, %cst_105 {dimension_numbers = #tpu.dot_dimension_numbers<[1], [0], [0], [1], [0, 0, 1, 1], [], []>} : vector<2x128xbf16>, vector<128x512xbf16>, vector<2x512xf32> -> vector<2x512xf32>
    %370 = arith.addf %366, %369 : vector<2x512xf32>
    %371 = vector.extract_strided_slice %370 {offsets = [0, 0], sizes = [2, 128], strides = [1, 1]} : vector<2x512xf32> to vector<2x128xf32>
    %372 = arith.negf %371 : vector<2x128xf32>
    %373 = math.exp %372 : vector<2x128xf32>
    %cst_106 = arith.constant 1.000000e+00 : f32
    %374 = vector.broadcast %cst_106 : f32 to vector<2x128xf32>
    %375 = arith.addf %374, %373 : vector<2x128xf32>
    %376 = arith.divf %374, %375 : vector<2x128xf32>
    %377 = vector.extract_strided_slice %370 {offsets = [0, 128], sizes = [2, 128], strides = [1, 1]} : vector<2x512xf32> to vector<2x128xf32>
    %378 = arith.negf %377 : vector<2x128xf32>
    %379 = math.exp %378 : vector<2x128xf32>
    %cst_107 = arith.constant 1.000000e+00 : f32
    %380 = vector.broadcast %cst_107 : f32 to vector<2x128xf32>
    %381 = arith.addf %380, %379 : vector<2x128xf32>
    %382 = arith.divf %380, %381 : vector<2x128xf32>
    %383 = vector.extract_strided_slice %370 {offsets = [0, 256], sizes = [2, 128], strides = [1, 1]} : vector<2x512xf32> to vector<2x128xf32>
    %384 = math.tanh %383 : vector<2x128xf32>
    %385 = vector.extract_strided_slice %370 {offsets = [0, 384], sizes = [2, 128], strides = [1, 1]} : vector<2x512xf32> to vector<2x128xf32>
    %386 = arith.negf %385 : vector<2x128xf32>
    %387 = math.exp %386 : vector<2x128xf32>
    %cst_108 = arith.constant 1.000000e+00 : f32
    %388 = vector.broadcast %cst_108 : f32 to vector<2x128xf32>
    %389 = arith.addf %388, %387 : vector<2x128xf32>
    %390 = arith.divf %388, %389 : vector<2x128xf32>
    %391 = arith.mulf %382, %363 : vector<2x128xf32>
    %392 = arith.mulf %376, %384 : vector<2x128xf32>
    %393 = arith.addf %391, %392 : vector<2x128xf32>
    %394 = math.tanh %393 : vector<2x128xf32>
    %395 = arith.mulf %390, %394 : vector<2x128xf32>
    %396 = vector.extract_strided_slice %333 {offsets = [4, 0], sizes = [2, 512], strides = [1, 1]} : vector<16x512xf32> to vector<2x512xf32>
    %397 = arith.truncf %395 : vector<2x128xf32> to vector<2x128xbf16>
    %c0_109 = arith.constant 0 : index
    %c0_110 = arith.constant 0 : index
    %398 = vector.load %arg15[%c0_109, %c0_110] : memref<128x512xbf16, #tpu.memory_space<vmem>>, vector<128x512xbf16>
    %cst_111 = arith.constant dense<0.000000e+00> : vector<2x512xf32>
    %399 = tpu.matmul %397, %398, %cst_111 {dimension_numbers = #tpu.dot_dimension_numbers<[1], [0], [0], [1], [0, 0, 1, 1], [], []>} : vector<2x128xbf16>, vector<128x512xbf16>, vector<2x512xf32> -> vector<2x512xf32>
    %400 = arith.addf %396, %399 : vector<2x512xf32>
    %401 = vector.extract_strided_slice %400 {offsets = [0, 0], sizes = [2, 128], strides = [1, 1]} : vector<2x512xf32> to vector<2x128xf32>
    %402 = arith.negf %401 : vector<2x128xf32>
    %403 = math.exp %402 : vector<2x128xf32>
    %cst_112 = arith.constant 1.000000e+00 : f32
    %404 = vector.broadcast %cst_112 : f32 to vector<2x128xf32>
    %405 = arith.addf %404, %403 : vector<2x128xf32>
    %406 = arith.divf %404, %405 : vector<2x128xf32>
    %407 = vector.extract_strided_slice %400 {offsets = [0, 128], sizes = [2, 128], strides = [1, 1]} : vector<2x512xf32> to vector<2x128xf32>
    %408 = arith.negf %407 : vector<2x128xf32>
    %409 = math.exp %408 : vector<2x128xf32>
    %cst_113 = arith.constant 1.000000e+00 : f32
    %410 = vector.broadcast %cst_113 : f32 to vector<2x128xf32>
    %411 = arith.addf %410, %409 : vector<2x128xf32>
    %412 = arith.divf %410, %411 : vector<2x128xf32>
    %413 = vector.extract_strided_slice %400 {offsets = [0, 256], sizes = [2, 128], strides = [1, 1]} : vector<2x512xf32> to vector<2x128xf32>
    %414 = math.tanh %413 : vector<2x128xf32>
    %415 = vector.extract_strided_slice %400 {offsets = [0, 384], sizes = [2, 128], strides = [1, 1]} : vector<2x512xf32> to vector<2x128xf32>
    %416 = arith.negf %415 : vector<2x128xf32>
    %417 = math.exp %416 : vector<2x128xf32>
    %cst_114 = arith.constant 1.000000e+00 : f32
    %418 = vector.broadcast %cst_114 : f32 to vector<2x128xf32>
    %419 = arith.addf %418, %417 : vector<2x128xf32>
    %420 = arith.divf %418, %419 : vector<2x128xf32>
    %421 = arith.mulf %412, %393 : vector<2x128xf32>
    %422 = arith.mulf %406, %414 : vector<2x128xf32>
    %423 = arith.addf %421, %422 : vector<2x128xf32>
    %424 = math.tanh %423 : vector<2x128xf32>
    %425 = arith.mulf %420, %424 : vector<2x128xf32>
    %426 = vector.extract_strided_slice %333 {offsets = [6, 0], sizes = [2, 512], strides = [1, 1]} : vector<16x512xf32> to vector<2x512xf32>
    %427 = arith.truncf %425 : vector<2x128xf32> to vector<2x128xbf16>
    %c0_115 = arith.constant 0 : index
    %c0_116 = arith.constant 0 : index
    %428 = vector.load %arg15[%c0_115, %c0_116] : memref<128x512xbf16, #tpu.memory_space<vmem>>, vector<128x512xbf16>
    %cst_117 = arith.constant dense<0.000000e+00> : vector<2x512xf32>
    %429 = tpu.matmul %427, %428, %cst_117 {dimension_numbers = #tpu.dot_dimension_numbers<[1], [0], [0], [1], [0, 0, 1, 1], [], []>} : vector<2x128xbf16>, vector<128x512xbf16>, vector<2x512xf32> -> vector<2x512xf32>
    %430 = arith.addf %426, %429 : vector<2x512xf32>
    %431 = vector.extract_strided_slice %430 {offsets = [0, 0], sizes = [2, 128], strides = [1, 1]} : vector<2x512xf32> to vector<2x128xf32>
    %432 = arith.negf %431 : vector<2x128xf32>
    %433 = math.exp %432 : vector<2x128xf32>
    %cst_118 = arith.constant 1.000000e+00 : f32
    %434 = vector.broadcast %cst_118 : f32 to vector<2x128xf32>
    %435 = arith.addf %434, %433 : vector<2x128xf32>
    %436 = arith.divf %434, %435 : vector<2x128xf32>
    %437 = vector.extract_strided_slice %430 {offsets = [0, 128], sizes = [2, 128], strides = [1, 1]} : vector<2x512xf32> to vector<2x128xf32>
    %438 = arith.negf %437 : vector<2x128xf32>
    %439 = math.exp %438 : vector<2x128xf32>
    %cst_119 = arith.constant 1.000000e+00 : f32
    %440 = vector.broadcast %cst_119 : f32 to vector<2x128xf32>
    %441 = arith.addf %440, %439 : vector<2x128xf32>
    %442 = arith.divf %440, %441 : vector<2x128xf32>
    %443 = vector.extract_strided_slice %430 {offsets = [0, 256], sizes = [2, 128], strides = [1, 1]} : vector<2x512xf32> to vector<2x128xf32>
    %444 = math.tanh %443 : vector<2x128xf32>
    %445 = vector.extract_strided_slice %430 {offsets = [0, 384], sizes = [2, 128], strides = [1, 1]} : vector<2x512xf32> to vector<2x128xf32>
    %446 = arith.negf %445 : vector<2x128xf32>
    %447 = math.exp %446 : vector<2x128xf32>
    %cst_120 = arith.constant 1.000000e+00 : f32
    %448 = vector.broadcast %cst_120 : f32 to vector<2x128xf32>
    %449 = arith.addf %448, %447 : vector<2x128xf32>
    %450 = arith.divf %448, %449 : vector<2x128xf32>
    %451 = arith.mulf %442, %423 : vector<2x128xf32>
    %452 = arith.mulf %436, %444 : vector<2x128xf32>
    %453 = arith.addf %451, %452 : vector<2x128xf32>
    %454 = math.tanh %453 : vector<2x128xf32>
    %455 = arith.mulf %450, %454 : vector<2x128xf32>
    %456 = vector.extract_strided_slice %333 {offsets = [8, 0], sizes = [2, 512], strides = [1, 1]} : vector<16x512xf32> to vector<2x512xf32>
    %457 = arith.truncf %455 : vector<2x128xf32> to vector<2x128xbf16>
    %c0_121 = arith.constant 0 : index
    %c0_122 = arith.constant 0 : index
    %458 = vector.load %arg15[%c0_121, %c0_122] : memref<128x512xbf16, #tpu.memory_space<vmem>>, vector<128x512xbf16>
    %cst_123 = arith.constant dense<0.000000e+00> : vector<2x512xf32>
    %459 = tpu.matmul %457, %458, %cst_123 {dimension_numbers = #tpu.dot_dimension_numbers<[1], [0], [0], [1], [0, 0, 1, 1], [], []>} : vector<2x128xbf16>, vector<128x512xbf16>, vector<2x512xf32> -> vector<2x512xf32>
    %460 = arith.addf %456, %459 : vector<2x512xf32>
    %461 = vector.extract_strided_slice %460 {offsets = [0, 0], sizes = [2, 128], strides = [1, 1]} : vector<2x512xf32> to vector<2x128xf32>
    %462 = arith.negf %461 : vector<2x128xf32>
    %463 = math.exp %462 : vector<2x128xf32>
    %cst_124 = arith.constant 1.000000e+00 : f32
    %464 = vector.broadcast %cst_124 : f32 to vector<2x128xf32>
    %465 = arith.addf %464, %463 : vector<2x128xf32>
    %466 = arith.divf %464, %465 : vector<2x128xf32>
    %467 = vector.extract_strided_slice %460 {offsets = [0, 128], sizes = [2, 128], strides = [1, 1]} : vector<2x512xf32> to vector<2x128xf32>
    %468 = arith.negf %467 : vector<2x128xf32>
    %469 = math.exp %468 : vector<2x128xf32>
    %cst_125 = arith.constant 1.000000e+00 : f32
    %470 = vector.broadcast %cst_125 : f32 to vector<2x128xf32>
    %471 = arith.addf %470, %469 : vector<2x128xf32>
    %472 = arith.divf %470, %471 : vector<2x128xf32>
    %473 = vector.extract_strided_slice %460 {offsets = [0, 256], sizes = [2, 128], strides = [1, 1]} : vector<2x512xf32> to vector<2x128xf32>
    %474 = math.tanh %473 : vector<2x128xf32>
    %475 = vector.extract_strided_slice %460 {offsets = [0, 384], sizes = [2, 128], strides = [1, 1]} : vector<2x512xf32> to vector<2x128xf32>
    %476 = arith.negf %475 : vector<2x128xf32>
    %477 = math.exp %476 : vector<2x128xf32>
    %cst_126 = arith.constant 1.000000e+00 : f32
    %478 = vector.broadcast %cst_126 : f32 to vector<2x128xf32>
    %479 = arith.addf %478, %477 : vector<2x128xf32>
    %480 = arith.divf %478, %479 : vector<2x128xf32>
    %481 = arith.mulf %472, %453 : vector<2x128xf32>
    %482 = arith.mulf %466, %474 : vector<2x128xf32>
    %483 = arith.addf %481, %482 : vector<2x128xf32>
    %484 = math.tanh %483 : vector<2x128xf32>
    %485 = arith.mulf %480, %484 : vector<2x128xf32>
    %486 = vector.extract_strided_slice %333 {offsets = [10, 0], sizes = [2, 512], strides = [1, 1]} : vector<16x512xf32> to vector<2x512xf32>
    %487 = arith.truncf %485 : vector<2x128xf32> to vector<2x128xbf16>
    %c0_127 = arith.constant 0 : index
    %c0_128 = arith.constant 0 : index
    %488 = vector.load %arg15[%c0_127, %c0_128] : memref<128x512xbf16, #tpu.memory_space<vmem>>, vector<128x512xbf16>
    %cst_129 = arith.constant dense<0.000000e+00> : vector<2x512xf32>
    %489 = tpu.matmul %487, %488, %cst_129 {dimension_numbers = #tpu.dot_dimension_numbers<[1], [0], [0], [1], [0, 0, 1, 1], [], []>} : vector<2x128xbf16>, vector<128x512xbf16>, vector<2x512xf32> -> vector<2x512xf32>
    %490 = arith.addf %486, %489 : vector<2x512xf32>
    %491 = vector.extract_strided_slice %490 {offsets = [0, 0], sizes = [2, 128], strides = [1, 1]} : vector<2x512xf32> to vector<2x128xf32>
    %492 = arith.negf %491 : vector<2x128xf32>
    %493 = math.exp %492 : vector<2x128xf32>
    %cst_130 = arith.constant 1.000000e+00 : f32
    %494 = vector.broadcast %cst_130 : f32 to vector<2x128xf32>
    %495 = arith.addf %494, %493 : vector<2x128xf32>
    %496 = arith.divf %494, %495 : vector<2x128xf32>
    %497 = vector.extract_strided_slice %490 {offsets = [0, 128], sizes = [2, 128], strides = [1, 1]} : vector<2x512xf32> to vector<2x128xf32>
    %498 = arith.negf %497 : vector<2x128xf32>
    %499 = math.exp %498 : vector<2x128xf32>
    %cst_131 = arith.constant 1.000000e+00 : f32
    %500 = vector.broadcast %cst_131 : f32 to vector<2x128xf32>
    %501 = arith.addf %500, %499 : vector<2x128xf32>
    %502 = arith.divf %500, %501 : vector<2x128xf32>
    %503 = vector.extract_strided_slice %490 {offsets = [0, 256], sizes = [2, 128], strides = [1, 1]} : vector<2x512xf32> to vector<2x128xf32>
    %504 = math.tanh %503 : vector<2x128xf32>
    %505 = vector.extract_strided_slice %490 {offsets = [0, 384], sizes = [2, 128], strides = [1, 1]} : vector<2x512xf32> to vector<2x128xf32>
    %506 = arith.negf %505 : vector<2x128xf32>
    %507 = math.exp %506 : vector<2x128xf32>
    %cst_132 = arith.constant 1.000000e+00 : f32
    %508 = vector.broadcast %cst_132 : f32 to vector<2x128xf32>
    %509 = arith.addf %508, %507 : vector<2x128xf32>
    %510 = arith.divf %508, %509 : vector<2x128xf32>
    %511 = arith.mulf %502, %483 : vector<2x128xf32>
    %512 = arith.mulf %496, %504 : vector<2x128xf32>
    %513 = arith.addf %511, %512 : vector<2x128xf32>
    %514 = math.tanh %513 : vector<2x128xf32>
    %515 = arith.mulf %510, %514 : vector<2x128xf32>
    %516 = vector.extract_strided_slice %333 {offsets = [12, 0], sizes = [2, 512], strides = [1, 1]} : vector<16x512xf32> to vector<2x512xf32>
    %517 = arith.truncf %515 : vector<2x128xf32> to vector<2x128xbf16>
    %c0_133 = arith.constant 0 : index
    %c0_134 = arith.constant 0 : index
    %518 = vector.load %arg15[%c0_133, %c0_134] : memref<128x512xbf16, #tpu.memory_space<vmem>>, vector<128x512xbf16>
    %cst_135 = arith.constant dense<0.000000e+00> : vector<2x512xf32>
    %519 = tpu.matmul %517, %518, %cst_135 {dimension_numbers = #tpu.dot_dimension_numbers<[1], [0], [0], [1], [0, 0, 1, 1], [], []>} : vector<2x128xbf16>, vector<128x512xbf16>, vector<2x512xf32> -> vector<2x512xf32>
    %520 = arith.addf %516, %519 : vector<2x512xf32>
    %521 = vector.extract_strided_slice %520 {offsets = [0, 0], sizes = [2, 128], strides = [1, 1]} : vector<2x512xf32> to vector<2x128xf32>
    %522 = arith.negf %521 : vector<2x128xf32>
    %523 = math.exp %522 : vector<2x128xf32>
    %cst_136 = arith.constant 1.000000e+00 : f32
    %524 = vector.broadcast %cst_136 : f32 to vector<2x128xf32>
    %525 = arith.addf %524, %523 : vector<2x128xf32>
    %526 = arith.divf %524, %525 : vector<2x128xf32>
    %527 = vector.extract_strided_slice %520 {offsets = [0, 128], sizes = [2, 128], strides = [1, 1]} : vector<2x512xf32> to vector<2x128xf32>
    %528 = arith.negf %527 : vector<2x128xf32>
    %529 = math.exp %528 : vector<2x128xf32>
    %cst_137 = arith.constant 1.000000e+00 : f32
    %530 = vector.broadcast %cst_137 : f32 to vector<2x128xf32>
    %531 = arith.addf %530, %529 : vector<2x128xf32>
    %532 = arith.divf %530, %531 : vector<2x128xf32>
    %533 = vector.extract_strided_slice %520 {offsets = [0, 256], sizes = [2, 128], strides = [1, 1]} : vector<2x512xf32> to vector<2x128xf32>
    %534 = math.tanh %533 : vector<2x128xf32>
    %535 = vector.extract_strided_slice %520 {offsets = [0, 384], sizes = [2, 128], strides = [1, 1]} : vector<2x512xf32> to vector<2x128xf32>
    %536 = arith.negf %535 : vector<2x128xf32>
    %537 = math.exp %536 : vector<2x128xf32>
    %cst_138 = arith.constant 1.000000e+00 : f32
    %538 = vector.broadcast %cst_138 : f32 to vector<2x128xf32>
    %539 = arith.addf %538, %537 : vector<2x128xf32>
    %540 = arith.divf %538, %539 : vector<2x128xf32>
    %541 = arith.mulf %532, %513 : vector<2x128xf32>
    %542 = arith.mulf %526, %534 : vector<2x128xf32>
    %543 = arith.addf %541, %542 : vector<2x128xf32>
    %544 = math.tanh %543 : vector<2x128xf32>
    %545 = arith.mulf %540, %544 : vector<2x128xf32>
    %546 = vector.extract_strided_slice %333 {offsets = [14, 0], sizes = [2, 512], strides = [1, 1]} : vector<16x512xf32> to vector<2x512xf32>
    %547 = arith.truncf %545 : vector<2x128xf32> to vector<2x128xbf16>
    %c0_139 = arith.constant 0 : index
    %c0_140 = arith.constant 0 : index
    %548 = vector.load %arg15[%c0_139, %c0_140] : memref<128x512xbf16, #tpu.memory_space<vmem>>, vector<128x512xbf16>
    %cst_141 = arith.constant dense<0.000000e+00> : vector<2x512xf32>
    %549 = tpu.matmul %547, %548, %cst_141 {dimension_numbers = #tpu.dot_dimension_numbers<[1], [0], [0], [1], [0, 0, 1, 1], [], []>} : vector<2x128xbf16>, vector<128x512xbf16>, vector<2x512xf32> -> vector<2x512xf32>
    %550 = arith.addf %546, %549 : vector<2x512xf32>
    %551 = vector.extract_strided_slice %550 {offsets = [0, 0], sizes = [2, 128], strides = [1, 1]} : vector<2x512xf32> to vector<2x128xf32>
    %552 = arith.negf %551 : vector<2x128xf32>
    %553 = math.exp %552 : vector<2x128xf32>
    %cst_142 = arith.constant 1.000000e+00 : f32
    %554 = vector.broadcast %cst_142 : f32 to vector<2x128xf32>
    %555 = arith.addf %554, %553 : vector<2x128xf32>
    %556 = arith.divf %554, %555 : vector<2x128xf32>
    %557 = vector.extract_strided_slice %550 {offsets = [0, 128], sizes = [2, 128], strides = [1, 1]} : vector<2x512xf32> to vector<2x128xf32>
    %558 = arith.negf %557 : vector<2x128xf32>
    %559 = math.exp %558 : vector<2x128xf32>
    %cst_143 = arith.constant 1.000000e+00 : f32
    %560 = vector.broadcast %cst_143 : f32 to vector<2x128xf32>
    %561 = arith.addf %560, %559 : vector<2x128xf32>
    %562 = arith.divf %560, %561 : vector<2x128xf32>
    %563 = vector.extract_strided_slice %550 {offsets = [0, 256], sizes = [2, 128], strides = [1, 1]} : vector<2x512xf32> to vector<2x128xf32>
    %564 = math.tanh %563 : vector<2x128xf32>
    %565 = vector.extract_strided_slice %550 {offsets = [0, 384], sizes = [2, 128], strides = [1, 1]} : vector<2x512xf32> to vector<2x128xf32>
    %566 = arith.negf %565 : vector<2x128xf32>
    %567 = math.exp %566 : vector<2x128xf32>
    %cst_144 = arith.constant 1.000000e+00 : f32
    %568 = vector.broadcast %cst_144 : f32 to vector<2x128xf32>
    %569 = arith.addf %568, %567 : vector<2x128xf32>
    %570 = arith.divf %568, %569 : vector<2x128xf32>
    %571 = arith.mulf %562, %543 : vector<2x128xf32>
    %572 = arith.mulf %556, %564 : vector<2x128xf32>
    %573 = arith.addf %571, %572 : vector<2x128xf32>
    %574 = math.tanh %573 : vector<2x128xf32>
    %575 = arith.mulf %570, %574 : vector<2x128xf32>
    %576 = tpu.concatenate %365, %395, %425, %455, %485, %515, %545, %575 in 0 : vector<2x128xf32>, vector<2x128xf32>, vector<2x128xf32>, vector<2x128xf32>, vector<2x128xf32>, vector<2x128xf32>, vector<2x128xf32>, vector<2x128xf32> -> vector<16x128xf32>
    %577 = arith.truncf %576 : vector<16x128xf32> to vector<16x128xbf16>
    %c0_145 = arith.constant 0 : index
    %c0_146 = arith.constant 0 : index
    %578 = vector.load %arg17[%c0_145, %c0_146] : memref<128x256xbf16, #tpu.memory_space<vmem>>, vector<128x256xbf16>
    %cst_147 = arith.constant dense<0.000000e+00> : vector<16x256xf32>
    %579 = tpu.matmul %577, %578, %cst_147 {dimension_numbers = #tpu.dot_dimension_numbers<[1], [0], [0], [1], [0, 0, 1, 1], [], []>} : vector<16x128xbf16>, vector<128x256xbf16>, vector<16x256xf32> -> vector<16x256xf32>
    %c0_148 = arith.constant 0 : index
    %c0_149 = arith.constant 0 : index
    %580 = vector.load %arg18[%c0_148, %c0_149] : memref<1x256xf32, #tpu.memory_space<vmem>>, vector<1x256xf32>
    %581 = vector.broadcast %580 : vector<1x256xf32> to vector<16x256xf32>
    %582 = arith.addf %579, %581 : vector<16x256xf32>
    %cst_150 = arith.constant dense<0xFF800000> : vector<16xf32>
    %583 = vector.multi_reduction <maximumf>, %582, %cst_150 [1] : vector<16x256xf32> to vector<16xf32>
    %584 = vector.shape_cast %583 : vector<16xf32> to vector<16x1xf32>
    %585 = vector.broadcast %584 : vector<16x1xf32> to vector<16x256xf32>
    %586 = arith.subf %582, %585 : vector<16x256xf32>
    %587 = math.exp %586 : vector<16x256xf32>
    %cst_151 = arith.constant dense<0.000000e+00> : vector<16xf32>
    %588 = vector.multi_reduction <add>, %587, %cst_151 [1] : vector<16x256xf32> to vector<16xf32>
    %589 = vector.shape_cast %588 : vector<16xf32> to vector<16x1xf32>
    %590 = math.log %589 : vector<16x1xf32>
    %591 = vector.broadcast %590 : vector<16x1xf32> to vector<16x256xf32>
    %592 = arith.subf %586, %591 : vector<16x256xf32>
    %c0_152 = arith.constant 0 : index
    %c0_153 = arith.constant 0 : index
    %593 = vector.load %arg19[%c0_152, %c0_153] : memref<16x256xf32, #tpu.memory_space<vmem>>, vector<16x256xf32>
    tpu.vector_store %arg19[%c0_152, %c0_153], %592 {strides = array<i32>} : memref<16x256xf32, #tpu.memory_space<vmem>>, vector<16x256xf32>,
    return
  }
}

</mosaic_0001>

<bundles_post_ra>
// kernel: decoder_forward.1
= control target key start
LH: loop header
LB: loop body
LE: loop exit
PB: predicated region body
PF: predicated region fallthrough
CT: control target
= control target key end

     0   :  { %v7630_v0 = vmov 0   ;;  %s7606_s0 = inlined_call_operand.vmem [shape: s32[16,1], index: 0, kind: input, shape index: {}]   ;;  %s7607_s2 = inlined_call_operand.vmem [shape: bf16[256,128], index: 2, kind: input, shape index: {}]   ;;  %s7608_s3 = inlined_call_operand.vmem [shape: bf16[128,512], index: 3, kind: input, shape index: {}]   ;;  %s7609_s4 = inlined_call_operand.vmem [shape: bf16[128,512], index: 4, kind: input, shape index: {}]   ;;  %s7610_s5 = inlined_call_operand.vmem [shape: f32[1,512], index: 5, kind: input, shape index: {}]   ;;  %s7611_s8 = inlined_call_operand.vmem [shape: bf16[128,256], index: 8, kind: input, shape index: {}]   ;;  %s7612_s6 = inlined_call_operand.vmem [shape: bf16[128,128], index: 6, kind: input, shape index: {}]   ;;  %s7613_s1 = inlined_call_operand.vmem [shape: bf16[2,8,128], index: 1, kind: input, shape index: {}]   ;;  %s7614_s7 = inlined_call_operand.vmem [shape: f32[1,128], index: 7, kind: input, shape index: {}]   ;;  %s7615_s9 = inlined_call_operand.vmem [shape: f32[1,256], index: 9, kind: input, shape index: {}]   ;;  %s7616_s10 = inlined_call_operand.vmem [shape: bf16[128,128], index: 10, kind: input, shape index: {}]   ;;  %s7617_s11 = inlined_call_operand.vmem [shape: f32[1,128], index: 11, kind: input, shape index: {}]   ;;  %s7618_s14 = inlined_call_operand.vmem [shape: bf16[128,512], index: 14, kind: input, shape index: {}]   ;;  %s7619_s12 = inlined_call_operand.vmem [shape: f32[1,128], index: 12, kind: input, shape index: {}]   ;;  %s7620_s13 = inlined_call_operand.vmem [shape: f32[1,128], index: 13, kind: input, shape index: {}]   ;;  %s7621_s15 = inlined_call_operand.vmem [shape: bf16[128,512], index: 15, kind: input, shape index: {}]   ;;  %s7622_s16 = inlined_call_operand.vmem [shape: f32[1,512], index: 16, kind: input, shape index: {}]   ;;  %s7623_s17 = inlined_call_operand.vmem [shape: bf16[128,256], index: 17, kind: input, shape index: {}]   ;;  %s7624_s18 = inlined_call_operand.vmem [shape: f32[1,256], index: 18, kind: input, shape index: {}]   ;;  %s7625_s19 = inlined_call_operand.vmem [shape: f32[16,256], index: 19, kind: output, shape index: {}]  }
   0x1   :  { %7643 = sst [smem:[#allocation8_spill]] %s7606_s0  ;;  %5113 = vset.pattern.permute.xlu0 %v7630_v0 }
   0x2   :  { %7644 = sst [smem:[#allocation9_spill]] %s7607_s2 }
   0x3   :  { %7645 = sst [smem:[#allocation10_spill]] %s7608_s3 }
   0x4   :  { %7646 = sst [smem:[#allocation11_spill]] %s7609_s4 }
   0x5   :  { %s7647_s20 = sld [smem:[#allocation8_spill]] }
   0x6   :  { %s7648_s22 = sld [smem:[#allocation9_spill]] }
   0x7   :  { %s7649_s27 = sld [smem:[#allocation10_spill]] }
   0x8   :  { %s7650_s0 = sld [smem:[#allocation11_spill]] }
   0xb   :  { %v63_v1 = vld [vmem:[%s7647_s20] sm:$0xff]  ;;  %v64_v6 = vld [vmem:[%s7647_s20 + $0x8] sm:$0xff] }
   0xc   :  { %v4922_v2 = vld [vmem:[%s7648_s22 + $0x38] sm:$0xff]  ;;  %69 = vperm.xlu0 %5113, %v63_v1   ;;  %v4921_v4 = vld [vmem:[%s7648_s22 + $0x30] sm:$0xff]  ;;  %v4920_v7 = vld [vmem:[%s7648_s22 + $0x28] sm:$0xff] }
   0xd   :  { %v4930_v3 = vld [vmem:[%s7648_s22 + $0x78] sm:$0xff]  ;;  %216 = vmatpush.bf16.msra.mxu0 %v4922_v2  ;;  %v4929_v5 = vld [vmem:[%s7648_s22 + $0x70] sm:$0xff]  ;;  %v4928_v8 = vld [vmem:[%s7648_s22 + $0x68] sm:$0xff] }
   0xe   :  { %230 = vmatpush.bf16.msra.mxu1 %v4930_v3  ;;  %v4919_v9 = vld [vmem:[%s7648_s22 + $0x20] sm:$0xff]  ;;  %v4918_v11 = vld [vmem:[%s7648_s22 + $0x18] sm:$0xff]  ;;  %v4917_v13 = vld [vmem:[%s7648_s22 + $0x10] sm:$0xff] }
   0xf   :  { %v4927_v10 = vld [vmem:[%s7648_s22 + $0x60] sm:$0xff]  ;;  %v4926_v12 = vld [vmem:[%s7648_s22 + $0x58] sm:$0xff]  ;;  %v4925_v14 = vld [vmem:[%s7648_s22 + $0x50] sm:$0xff] }
  0x10   :  { %v4916_v15 = vld [vmem:[%s7648_s22 + $0x8] sm:$0xff]  ;;  %v4915_v17 = vld [vmem:[%s7648_s22] sm:$0xff]  ;;  %v4961_v20 = vld [vmem:[%s7649_s27 + $0xec] sm:$0xf0] }
  0x11   :  { %217 = vmatpush.bf16.msra.mxu0 %v4921_v4  ;;  %v4924_v16 = vld [vmem:[%s7648_s22 + $0x48] sm:$0xff]  ;;  %v4923_v18 = vld [vmem:[%s7648_s22 + $0x40] sm:$0xff]  ;;  %v4269_v23 = vld [vmem:[%s7649_s27 + $0xf0] sm:$0xf0] }
  0x12   :  { %231 = vmatpush.bf16.msra.mxu1 %v4929_v5  ;;  %v4267_v19 = vld [vmem:[%s7649_s27 + $0xe0] sm:$0xf]  ;;  %v4959_v21 = vld [vmem:[%s7649_s27 + $0xe4] sm:$0xf]  ;;  %v4275_v24 = vld [vmem:[%s7649_s27 + $0xe8] sm:$0xf] }
  0x13   :  { %v4268_v22 = vor.u32 %v4961_v20, %v4267_v19  ;;  %v4962_v25 = vld [vmem:[%s7649_s27 + $0xf4] sm:$0xf0]  ;;  %v4272_v26 = vor.u32 %v4959_v21, %v4269_v23  ;;  %v4960_v28 = vld [vmem:[%s7649_s27 + $0xec] sm:$0xf]  ;;  %v4277_v29 = vld [vmem:[%s7649_s27 + $0xf8] sm:$0xf0] }
  0x14   :  { %72 = vperm.xlu0 %5113, %v64_v6   ;;  %v4276_v27 = vor.u32 %v4962_v25, %v4275_v24  ;;  %v4251_v30 = vld [vmem:[%s7649_s27 + $0xc0] sm:$0xf]  ;;  %v4280_v31 = vor.u32 %v4960_v28, %v4277_v29  ;;  %v4957_v32 = vld [vmem:[%s7649_s27 + $0xcc] sm:$0xf0]  ;;  %v4955_v33 = vld [vmem:[%s7649_s27 + $0xc4] sm:$0xf] }
  0x15   :  { %218 = vmatpush.bf16.msra.mxu0 %v4920_v7  ;;  %447 = vmatpush.bf16.msra.mxu2 %v4268_v22  ;;  %v4253_v34 = vld [vmem:[%s7649_s27 + $0xd0] sm:$0xf0]  ;;  %v4252_v35 = vor.u32 %v4957_v32, %v4251_v30  ;;  %v4259_v37 = vld [vmem:[%s7649_s27 + $0xc8] sm:$0xf]  ;;  %v4958_v38 = vld [vmem:[%s7649_s27 + $0xd4] sm:$0xf0] }
  0x16   :  { %232 = vmatpush.bf16.msra.mxu1 %v4928_v8  ;;  %461 = vmatpush.bf16.msra.mxu3 %v4272_v26  ;;  %v4256_v36 = vor.u32 %v4955_v33, %v4253_v34  ;;  %v4956_v39 = vld [vmem:[%s7649_s27 + $0xcc] sm:$0xf]  ;;  %v4260_v40 = vor.u32 %v4958_v38, %v4259_v37  ;;  %v4261_v41 = vld [vmem:[%s7649_s27 + $0xd8] sm:$0xf0]  ;;  %v4235_v42 = vld [vmem:[%s7649_s27 + $0xa0] sm:$0xf] }
  0x17   :  { %v4953_v43 = vld [vmem:[%s7649_s27 + $0xac] sm:$0xf0]  ;;  %v4264_v44 = vor.u32 %v4956_v39, %v4261_v41  ;;  %v4951_v45 = vld [vmem:[%s7649_s27 + $0xa4] sm:$0xf]  ;;  %v4237_v46 = vld [vmem:[%s7649_s27 + $0xb0] sm:$0xf0] }
  0x18   :  { %v4243_v47 = vld [vmem:[%s7649_s27 + $0xa8] sm:$0xf]  ;;  %v4236_v48 = vor.u32 %v4953_v43, %v4235_v42  ;;  %v4954_v49 = vld [vmem:[%s7649_s27 + $0xb4] sm:$0xf0]  ;;  %v4952_v50 = vld [vmem:[%s7649_s27 + $0xac] sm:$0xf]  ;;  %v4240_v52 = vor.u32 %v4951_v45, %v4237_v46 }
  0x19   :  { %219 = vmatpush.bf16.msra.mxu0 %v4919_v9  ;;  %448 = vmatpush.bf16.msra.mxu2 %v4252_v35  ;;  %v4245_v51 = vld [vmem:[%s7649_s27 + $0xb8] sm:$0xf0]  ;;  %v4244_v53 = vor.u32 %v4954_v49, %v4243_v47  ;;  %v4219_v54 = vld [vmem:[%s7649_s27 + $0x80] sm:$0xf]  ;;  %v4949_v55 = vld [vmem:[%s7649_s27 + $0x8c] sm:$0xf0] }
  0x1a   :  { %233 = vmatpush.bf16.msra.mxu1 %v4927_v10  ;;  %462 = vmatpush.bf16.msra.mxu3 %v4256_v36  ;;  %v4947_v56 = vld [vmem:[%s7649_s27 + $0x84] sm:$0xf]  ;;  %v4248_v57 = vor.u32 %v4952_v50, %v4245_v51  ;;  %v4221_v58 = vld [vmem:[%s7649_s27 + $0x90] sm:$0xf0]  ;;  %v4227_v59 = vld [vmem:[%s7649_s27 + $0x88] sm:$0xf]  ;;  %v4220_v63 = vor.u32 %v4949_v55, %v4219_v54 }
  0x1b   :  { %v4950_v60 = vld [vmem:[%s7649_s27 + $0x94] sm:$0xf0]  ;;  %v4948_v61 = vld [vmem:[%s7649_s27 + $0x8c] sm:$0xf]  ;;  %v4229_v62 = vld [vmem:[%s7649_s27 + $0x98] sm:$0xf0]  ;;  %v4224_v1 = vor.u32 %v4947_v56, %v4221_v58 }
  0x1c   :  { %v4228_v2 = vor.u32 %v4950_v60, %v4227_v59  ;;  %v4203_v3 = vld [vmem:[%s7649_s27 + $0x60] sm:$0xf]  ;;  %v4945_v4 = vld [vmem:[%s7649_s27 + $0x6c] sm:$0xf0]  ;;  %v4943_v5 = vld [vmem:[%s7649_s27 + $0x64] sm:$0xf]  ;;  %v4232_v6 = vor.u32 %v4948_v61, %v4229_v62 }
  0x1d   :  { %220 = vmatpush.bf16.msra.mxu0 %v4918_v11  ;;  %449 = vmatpush.bf16.msra.mxu2 %v4236_v48  ;;  %v4205_v7 = vld [vmem:[%s7649_s27 + $0x70] sm:$0xf0]  ;;  %v4211_v8 = vld [vmem:[%s7649_s27 + $0x68] sm:$0xf]  ;;  %v4946_v9 = vld [vmem:[%s7649_s27 + $0x74] sm:$0xf0] }
  0x1e   :  { %234 = vmatpush.bf16.msra.mxu1 %v4926_v12  ;;  %463 = vmatpush.bf16.msra.mxu3 %v4240_v52  ;;  %v4944_v10 = vld [vmem:[%s7649_s27 + $0x6c] sm:$0xf]  ;;  %v4213_v11 = vld [vmem:[%s7649_s27 + $0x78] sm:$0xf0]  ;;  %v65_v12 = vlaneseq  ;;  %v4189_v20 = vld [vmem:[%s7649_s27 + $0x50] sm:$0xf0] }
  0x1f   :  { %v4216_v19 = vor.u32 %v4944_v10, %v4213_v11  ;;  %v4195_v21 = vld [vmem:[%s7649_s27 + $0x48] sm:$0xf]  ;;  %v4942_v22 = vld [vmem:[%s7649_s27 + $0x54] sm:$0xf0]  ;;  %v4940_v23 = vld [vmem:[%s7649_s27 + $0x4c] sm:$0xf] }
  0x20   :  { %v4197_v24 = vld [vmem:[%s7649_s27 + $0x58] sm:$0xf0]  ;;  %v66_v25 = vand.u32 127, %v65_v12  ;;  %v4196_v29 = vor.u32 %v4942_v22, %v4195_v21  ;;  %v4171_v30 = vld [vmem:[%s7649_s27 + $0x20] sm:$0xf] }
  0x21   :  { %221 = vmatpush.bf16.msra.mxu0 %v4917_v13  ;;  %450 = vmatpush.bf16.msra.mxu2 %v4220_v63  ;;  %v4204_v13 = vor.u32 %v4945_v4, %v4203_v3  ;;  %v4935_v32 = vld [vmem:[%s7649_s27 + $0x24] sm:$0xf]  ;;  %v4200_v33 = vor.u32 %v4940_v23, %v4197_v24  ;;  %v4173_v34 = vld [vmem:[%s7649_s27 + $0x30] sm:$0xf0]  ;;  %v4179_v35 = vld [vmem:[%s7649_s27 + $0x28] sm:$0xf] }
  0x22   :  { %235 = vmatpush.bf16.msra.mxu1 %v4925_v14  ;;  %464 = vmatpush.bf16.msra.mxu3 %v4224_v1  ;;  %v4208_v14 = vor.u32 %v4943_v5, %v4205_v7  ;;  %v4938_v36 = vld [vmem:[%s7649_s27 + $0x34] sm:$0xf0]  ;;  %v4936_v37 = vld [vmem:[%s7649_s27 + $0x2c] sm:$0xf]  ;;  %v4181_v38 = vld [vmem:[%s7649_s27 + $0x38] sm:$0xf0]  ;;  %v4176_v42 = vor.u32 %v4935_v32, %v4173_v34 }
  0x23   :  { %v67_v39 = vadd.s32 128, %v66_v25  ;;  %v4155_v41 = vld [vmem:[%s7649_s27] sm:$0xf]  ;;  %v4180_v43 = vor.u32 %v4938_v36, %v4179_v35  ;;  %v4931_v45 = vld [vmem:[%s7649_s27 + $0x4] sm:$0xf]  ;;  %v4184_v47 = vor.u32 %v4936_v37, %v4181_v38 }
  0x24   :  { %v4157_v46 = vld [vmem:[%s7649_s27 + $0x10] sm:$0xf0]  ;;  %v4163_v48 = vld [vmem:[%s7649_s27 + $0x8] sm:$0xf]  ;;  %v4934_v49 = vld [vmem:[%s7649_s27 + $0x14] sm:$0xf0] }
  0x25   :  { %222 = vmatpush.bf16.msra.mxu0 %v4916_v15  ;;  %v4212_v15 = vor.u32 %v4946_v9, %v4211_v8  ;;  %451 = vmatpush.bf16.msra.mxu2 %v4204_v13  ;;  %v4932_v50 = vld [vmem:[%s7649_s27 + $0xc] sm:$0xf]  ;;  %v4165_v51 = vld [vmem:[%s7649_s27 + $0x18] sm:$0xf0]  ;;  %v4395_v52 = vld [vmem:[%s7650_s0 + $0xe0] sm:$0xf]  ;;  %v4160_v59 = vor.u32 %v4931_v45, %v4157_v46  ;;  %v4164_v63 = vor.u32 %v4934_v49, %v4163_v48 }
  0x26   :  { %236 = vmatpush.bf16.msra.mxu1 %v4924_v16  ;;  %v4187_v16 = vld [vmem:[%s7649_s27 + $0x40] sm:$0xf]  ;;  %465 = vmatpush.bf16.msra.mxu3 %v4208_v14  ;;  %v4991_v55 = vld [vmem:[%s7650_s0 + $0xe4] sm:$0xf]  ;;  %v4397_v56 = vld [vmem:[%s7650_s0 + $0xf0] sm:$0xf0]  ;;  %v4168_v1 = vor.u32 %v4932_v50, %v4165_v51 }
  0x27   :  { %v4994_v60 = vld [vmem:[%s7650_s0 + $0xf4] sm:$0xf0]  ;;  %v4992_v61 = vld [vmem:[%s7650_s0 + $0xec] sm:$0xf]  ;;  %v4405_v62 = vld [vmem:[%s7650_s0 + $0xf8] sm:$0xf0]  ;;  %v5778_v3 = vor.u32 %v4991_v55, %v4397_v56 }
  0x28   :  { %v5401_v4 = vmov 1.0|1.0   ;;  %v4379_v7 = vld [vmem:[%s7650_s0 + $0xc0] sm:$0xf]  ;;  %v4989_v8 = vld [vmem:[%s7650_s0 + $0xcc] sm:$0xf0] }
  0x29   :  { %223 = vmatpush.bf16.msra.mxu0 %v4915_v17  ;;  %v4941_v17 = vld [vmem:[%s7649_s27 + $0x4c] sm:$0xf0]  ;;  %v4987_v9 = vld [vmem:[%s7650_s0 + $0xc4] sm:$0xf]  ;;  %v5797_v10 = vor.u32 %v4989_v8, %v4379_v7  ;;  %v4381_v11 = vld [vmem:[%s7650_s0 + $0xd0] sm:$0xf0] }
  0x2a   :  { %237 = vmatpush.bf16.msra.mxu1 %v4923_v18  ;;  %v4939_v18 = vld [vmem:[%s7649_s27 + $0x44] sm:$0xf]  ;;  %v4188_v26 = vor.u32 %v4941_v17, %v4187_v16  ;;  %v4387_v12 = vld [vmem:[%s7650_s0 + $0xc8] sm:$0xf]  ;;  %v4990_v13 = vld [vmem:[%s7650_s0 + $0xd4] sm:$0xf0]  ;;  %v5808_v14 = vor.u32 %v4987_v9, %v4381_v11 }
  0x2b   :  { %v4192_v28 = vor.u32 %v4939_v18, %v4189_v20  ;;  %v4988_v16 = vld [vmem:[%s7650_s0 + $0xcc] sm:$0xf]  ;;  %v4389_v17 = vld [vmem:[%s7650_s0 + $0xd8] sm:$0xf0]  ;;  %v4363_v18 = vld [vmem:[%s7650_s0 + $0xa0] sm:$0xf] }
  0x2c   :  { %452 = vmatpush.bf16.msra.mxu2 %v4188_v26  ;;  %v4985_v20 = vld [vmem:[%s7650_s0 + $0xac] sm:$0xf0]  ;;  %v4983_v21 = vld [vmem:[%s7650_s0 + $0xa4] sm:$0xf]  ;;  %v4365_v22 = vld [vmem:[%s7650_s0 + $0xb0] sm:$0xf0] }
  0x2d   :  { %475 = vmatpush.bf16.msrb.mxu0 %v4276_v27  ;;  %466 = vmatpush.bf16.msra.mxu3 %v4192_v28  ;;  %v5835_v23 = vor.u32 %v4985_v20, %v4363_v18  ;;  %v5837_v24 = vor.u32 %v4983_v21, %v4365_v22  ;;  %v4986_v26 = vld [vmem:[%s7650_s0 + $0xb4] sm:$0xf0]  ;;  %v4981_v32 = vld [vmem:[%s7650_s0 + $0x8c] sm:$0xf0]  ;;  %v4349_v35 = vld [vmem:[%s7650_s0 + $0x90] sm:$0xf0] }
  0x2e   :  { %489 = vmatpush.bf16.msrb.mxu1 %v4280_v31  ;;  %v4937_v31 = vld [vmem:[%s7649_s27 + $0x2c] sm:$0xf0]  ;;  %v4355_v36 = vld [vmem:[%s7650_s0 + $0x88] sm:$0xf]  ;;  %v4982_v37 = vld [vmem:[%s7650_s0 + $0x94] sm:$0xf0] }
  0x2f   :  { %v4975_v45 = vld [vmem:[%s7650_s0 + $0x64] sm:$0xf]  ;;  %v4339_v48 = vld [vmem:[%s7650_s0 + $0x68] sm:$0xf]  ;;  %v4978_v49 = vld [vmem:[%s7650_s0 + $0x74] sm:$0xf0] }
  0x30   :  { %v5918_v51 = vor.u32 %v4978_v49, %v4339_v48  ;;  %v4973_v56 = vld [vmem:[%s7650_s0 + $0x4c] sm:$0xf0]  ;;  %v4299_v7 = vld [vmem:[%s7650_s0 + $0x20] sm:$0xf]  ;;  %v4967_v11 = vld [vmem:[%s7650_s0 + $0x24] sm:$0xf] }
  0x31   :  { %476 = vmatpush.bf16.msrb.mxu0 %v4260_v40  ;;  %v4172_v40 = vor.u32 %v4937_v31, %v4171_v30  ;;  %467 = vmatpush.bf16.msra.mxu3 %v4176_v42  ;;  %v4347_v31 = vld [vmem:[%s7650_s0 + $0x80] sm:$0xf]  ;;  %v4969_v8 = vld [vmem:[%s7650_s0 + $0x2c] sm:$0xf0]  ;;  %v4968_v18 = vld [vmem:[%s7650_s0 + $0x2c] sm:$0xf] }
  0x32   :  { %490 = vmatpush.bf16.msrb.mxu1 %v4264_v44  ;;  %v4933_v44 = vld [vmem:[%s7649_s27 + $0xc] sm:$0xf0]  ;;  %v5869_v34 = vor.u32 %v4981_v32, %v4347_v31  ;;  %v4309_v20 = vld [vmem:[%s7650_s0 + $0x38] sm:$0xf0]  ;;  %v4285_v31 = vld [vmem:[%s7650_s0 + $0x10] sm:$0xf0] }
  0x33   :  { %453 = vmatpush.bf16.msra.mxu2 %v4172_v40  ;;  %v4156_v54 = vor.u32 %v4933_v44, %v4155_v41  ;;  %v4980_v40 = vld [vmem:[%s7650_s0 + $0x8c] sm:$0xf]  ;;  %v4357_v41 = vld [vmem:[%s7650_s0 + $0x98] sm:$0xf0]  ;;  %v4977_v44 = vld [vmem:[%s7650_s0 + $0x6c] sm:$0xf0] }
  0x34   :  { %v5891_v42 = vor.u32 %v4980_v40, %v4357_v41  ;;  %v4291_v32 = vld [vmem:[%s7650_s0 + $0x8] sm:$0xf] }
  0x35   :  { %477 = vmatpush.bf16.msrb.mxu0 %v4244_v53  ;;  %v4993_v53 = vld [vmem:[%s7650_s0 + $0xec] sm:$0xf0]  ;;  %468 = vmatpush.bf16.msra.mxu3 %v4160_v59 }
  0x36   :  { %491 = vmatpush.bf16.msrb.mxu1 %v4248_v57  ;;  %v4403_v57 = vld [vmem:[%s7650_s0 + $0xe8] sm:$0xf] }
  0x37   :  { %454 = vmatpush.bf16.msra.mxu2 %v4156_v54  ;;  %v5780_v5 = vor.u32 %v4994_v60, %v4403_v57  ;;  %v4315_v54 = vld [vmem:[%s7650_s0 + $0x40] sm:$0xf]  ;;  %v4971_v57 = vld [vmem:[%s7650_s0 + $0x44] sm:$0xf] }
  0x38   :  { %v5943_v59 = vor.u32 %v4973_v56, %v4315_v54 }
  0x39   :  { %478 = vmatpush.bf16.msrb.mxu0 %v4228_v2  ;;  %v5776_v2 = vor.u32 %v4993_v53, %v4395_v52  ;;  %708 = vmatpush.bf16.msrb.mxu3 %v5778_v3  ;;  %v4976_v52 = vld [vmem:[%s7650_s0 + $0x6c] sm:$0xf]  ;;  %v4341_v53 = vld [vmem:[%s7650_s0 + $0x78] sm:$0xf0] }
  0x3a   :  { %492 = vmatpush.bf16.msrb.mxu1 %v4232_v6  ;;  %v5782_v6 = vor.u32 %v4992_v61, %v4405_v62  ;;  %v5930_v55 = vor.u32 %v4976_v52, %v4341_v53  ;;  %v4323_v61 = vld [vmem:[%s7650_s0 + $0x48] sm:$0xf]  ;;  %v4974_v62 = vld [vmem:[%s7650_s0 + $0x54] sm:$0xf0] }
  0x3b   :  { %695 = vmatpush.bf16.msrb.mxu2 %v5776_v2 }
  0x3d   :  { %479 = vmatpush.bf16.msrb.mxu0 %v4212_v15  ;;  %v5810_v15 = vor.u32 %v4990_v13, %v4387_v12  ;;  %709 = vmatpush.bf16.msrb.mxu3 %v5808_v14  ;;  %v4301_v12 = vld [vmem:[%s7650_s0 + $0x30] sm:$0xf0]  ;;  %v4307_v13 = vld [vmem:[%s7650_s0 + $0x28] sm:$0xf] }
  0x3e   :  { %493 = vmatpush.bf16.msrb.mxu1 %v4216_v19  ;;  %v5822_v19 = vor.u32 %v4988_v16, %v4389_v17  ;;  %v5980_v16 = vor.u32 %v4969_v8, %v4299_v7  ;;  %v4970_v17 = vld [vmem:[%s7650_s0 + $0x34] sm:$0xf0]  ;;  %v5993_v21 = vor.u32 %v4967_v11, %v4301_v12 }
  0x3f   :  { %696 = vmatpush.bf16.msrb.mxu2 %v5797_v10  ;;  %v5995_v22 = vor.u32 %v4970_v17, %v4307_v13 }
  0x41   :  { %480 = vmatpush.bf16.msrb.mxu0 %v4196_v29  ;;  %v4373_v29 = vld [vmem:[%s7650_s0 + $0xb8] sm:$0xf0]  ;;  %710 = vmatpush.bf16.msrb.mxu3 %v5837_v24 }
  0x42   :  { %494 = vmatpush.bf16.msrb.mxu1 %v4200_v33  ;;  %v4979_v33 = vld [vmem:[%s7650_s0 + $0x84] sm:$0xf] }
  0x43   :  { %697 = vmatpush.bf16.msrb.mxu2 %v5835_v23  ;;  %v5880_v38 = vor.u32 %v4979_v33, %v4349_v35  ;;  %v4966_v33 = vld [vmem:[%s7650_s0 + $0x14] sm:$0xf0]  ;;  %v4964_v35 = vld [vmem:[%s7650_s0 + $0xc] sm:$0xf] }
  0x44   :  { %v6031_v41 = vor.u32 %v4966_v33, %v4291_v32 }
  0x45   :  { %481 = vmatpush.bf16.msrb.mxu0 %v4180_v43  ;;  %711 = vmatpush.bf16.msrb.mxu3 %v5880_v38  ;;  %v4331_v43 = vld [vmem:[%s7650_s0 + $0x60] sm:$0xf] }
  0x46   :  { %495 = vmatpush.bf16.msrb.mxu1 %v4184_v47  ;;  %v5905_v46 = vor.u32 %v4977_v44, %v4331_v43  ;;  %v4333_v47 = vld [vmem:[%s7650_s0 + $0x70] sm:$0xf0] }
  0x47   :  { %698 = vmatpush.bf16.msrb.mxu2 %v5869_v34  ;;  %v5916_v50 = vor.u32 %v4975_v45, %v4333_v47 }
  0x49   :  { %482 = vmatpush.bf16.msrb.mxu0 %v4164_v63  ;;  %712 = vmatpush.bf16.msrb.mxu3 %v5916_v50  ;;  %v4972_v63 = vld [vmem:[%s7650_s0 + $0x4c] sm:$0xf] }
  0x4a   :  { %496 = vmatpush.bf16.msrb.mxu1 %v4168_v1  ;;  %v5957_v1 = vor.u32 %v4974_v62, %v4323_v61  ;;  %v6111_v61 = vld [vmem:[%s7610_s5] sm:$0xf] }
  0x4b   :  { %699 = vmatpush.bf16.msrb.mxu2 %v5905_v46  ;;  %7651 = vst [vmem:[#allocation2_spill] sm:$0xff] %v6111_v61  ;;  %v7634_v12 = vperm.slane %v6111_v61, 0  ;;  %v7633_v13 = vperm.slane %v6111_v61, 1 }
  0x4f   :  { %700 = vmatpush.bf16.msrb.mxu2 %v5943_v59 }
  0x53   :  { %701 = vmatpush.bf16.msrb.mxu2 %v5980_v16 }
  0x7e   :  { %v70_v27 = vpop.permute.xlu0 %69 }
  0x7f   :  { %vm74_vm0 = vcmp.eq.s32.totalorder %v66_v25, %v70_v27  ;;  %vm75_vm3 = vcmp.eq.s32.totalorder %v67_v39, %v70_v27  ;;  %v4984_v27 = vld [vmem:[%s7650_s0 + $0xac] sm:$0xf] }
  0x80   :  { %v5854_v30 = vor.u32 %v4984_v27, %v4373_v29  ;;  %v4963_v27 = vld [vmem:[%s7650_s0 + $0x4] sm:$0xf]  ;;  %v6007_v29 = vor.u32 %v4968_v18, %v4309_v20 }
  0x81   :  { %v6029_v40 = vor.u32 %v4963_v27, %v4285_v31 }
  0x86   :  { %v73_v58 = vpop.permute.xlu0 %72 }
  0x87   :  { %vm76_vm1 = vcmp.eq.s32.totalorder %v66_v25, %v73_v58  ;;  %vm77_vm2 = vcmp.eq.s32.totalorder %v67_v39, %v73_v58  ;;  %v4371_v25 = vld [vmem:[%s7650_s0 + $0xa8] sm:$0xf]  ;;  %v5882_v39 = vor.u32 %v4982_v37, %v4355_v36  ;;  %v4317_v58 = vld [vmem:[%s7650_s0 + $0x50] sm:$0xf0]  ;;  %v4293_v36 = vld [vmem:[%s7650_s0 + $0x18] sm:$0xf0] }
  0x88   :  { %vm4149_vm4 = vmpackc.low %vm76_vm1, %vm74_vm0  ;;  %v5849_v28 = vor.u32 %v4986_v26, %v4371_v25  ;;  %v5945_v60 = vor.u32 %v4971_v57, %v4317_v58  ;;  %v4283_v25 = vld [vmem:[%s7650_s0] sm:$0xf]  ;;  %v4965_v26 = vld [vmem:[%s7650_s0 + $0xc] sm:$0xf0]  ;;  %v6034_v43 = vor.u32 %v4964_v35, %v4293_v36 }
  0x89   :  { %4150 = vmatmul.msk.bf16.vlgmr.msra.gmra.mxu0 %vm4149_vm4, %v5401_v4  ;;  %vm4151_vm5 = vmpackc.low %vm77_vm2, %vm75_vm3  ;;  %v6025_v37 = vor.u32 %v4965_v26, %v4283_v25 }
  0x8a   :  { %4152 = vmatmul.msk.bf16.vlgmr.msra.gmra.mxu1 %vm4151_vm5, %v5401_v4  ;;  %721 = vmatpush.bf16.msra.mxu0 %v5780_v5  ;;  %v4325_v4 = vld [vmem:[%s7650_s0 + $0x58] sm:$0xf0] }
  0x8b   :  { %734 = vmatpush.bf16.msra.mxu1 %v5782_v6  ;;  %v5968_v9 = vor.u32 %v4972_v63, %v4325_v4  ;;  %713 = vmatpush.bf16.msrb.mxu3 %v5945_v60  ;;  %v7635_v4 = vperm.slane %v6111_v61, 3 }
  0x8c   :  { %702 = vmatpush.bf16.msrb.mxu2 %v6025_v37 }
  0x8e   :  { %722 = vmatpush.bf16.msra.mxu0 %v5810_v15 }
  0x8f   :  { %735 = vmatpush.bf16.msra.mxu1 %v5822_v19  ;;  %714 = vmatpush.bf16.msrb.mxu3 %v5993_v21 }
  0x92   :  { %723 = vmatpush.bf16.msra.mxu0 %v5849_v28 }
  0x93   :  { %736 = vmatpush.bf16.msra.mxu1 %v5854_v30  ;;  %715 = vmatpush.bf16.msrb.mxu3 %v6029_v40 }
  0x96   :  { %724 = vmatpush.bf16.msra.mxu0 %v5882_v39 }
  0x97   :  { %737 = vmatpush.bf16.msra.mxu1 %v5891_v42 }
  0x9a   :  { %725 = vmatpush.bf16.msra.mxu0 %v5918_v51 }
  0x9b   :  { %738 = vmatpush.bf16.msra.mxu1 %v5930_v55 }
  0x9e   :  { %726 = vmatpush.bf16.msra.mxu0 %v5957_v1 }
  0x9f   :  { %739 = vmatpush.bf16.msra.mxu1 %v5968_v9 }
  0xa2   :  { %727 = vmatpush.bf16.msra.mxu0 %v5995_v22 }
  0xa3   :  { %740 = vmatpush.bf16.msra.mxu1 %v6007_v29 }
  0xa6   :  { %728 = vmatpush.bf16.msra.mxu0 %v6031_v41 }
  0xa7   :  { %741 = vmatpush.bf16.msra.mxu1 %v6034_v43 }
 0x106   :  { %v225_v44 = vpop.f32.mrf.mxu0 }
 0x107   :  { %v239_v45 = vpop.f32.mrf.mxu1 }
 0x108   :  { %v240_v49 = vadd.f32 %v239_v45, %v225_v44 }
 0x10e   :  { %v227_v47 = vpop.f32.mrf.mxu0 }
 0x10f   :  { %v241_v48 = vpop.f32.mrf.mxu1 }
 0x110   :  { %v242_v52 = vadd.f32 %v241_v48, %v227_v47 }
 0x112   :  { %v244_v53 = vpack.c.bf16 %v242_v52, %v240_v49 }
 0x114   :  { %455 = vmatmul.bf16.vlgmr.msra.gmra.mxu2 %v244_v53  ;;  %469 = vmatmul.bf16.vlgmr.msra.gmra.mxu3 %v244_v53 }
 0x115   :  { %483 = vmatmul.bf16.vlgmr.msrb.gmra.mxu0 %v244_v53  ;;  %497 = vmatmul.bf16.vlgmr.msrb.gmra.mxu1 %v244_v53 }
 0x116   :  { %815 = vmatpush.bf16.msra.mxu2 %v5776_v2  ;;  %828 = vmatpush.bf16.msra.mxu3 %v5778_v3 }
 0x117   :  { %841 = vmatpush.bf16.msrb.mxu0 %v5780_v5  ;;  %854 = vmatpush.bf16.msrb.mxu1 %v5782_v6 }
 0x11a   :  { %816 = vmatpush.bf16.msra.mxu2 %v5797_v10  ;;  %829 = vmatpush.bf16.msra.mxu3 %v5808_v14 }
 0x11b   :  { %842 = vmatpush.bf16.msrb.mxu0 %v5810_v15  ;;  %855 = vmatpush.bf16.msrb.mxu1 %v5822_v19 }
 0x11e   :  { %817 = vmatpush.bf16.msra.mxu2 %v5835_v23  ;;  %830 = vmatpush.bf16.msra.mxu3 %v5837_v24 }
 0x11f   :  { %843 = vmatpush.bf16.msrb.mxu0 %v5849_v28  ;;  %856 = vmatpush.bf16.msrb.mxu1 %v5854_v30 }
 0x122   :  { %818 = vmatpush.bf16.msra.mxu2 %v5869_v34  ;;  %831 = vmatpush.bf16.msra.mxu3 %v5880_v38 }
 0x123   :  { %844 = vmatpush.bf16.msrb.mxu0 %v5882_v39  ;;  %857 = vmatpush.bf16.msrb.mxu1 %v5891_v42 }
 0x124   :  { %703 = vmatmul.bf16.vlgmr.msrb.gmra.mxu2 %v7630_v0  ;;  %716 = vmatmul.bf16.vlgmr.msrb.gmra.mxu3 %v7630_v0 }
 0x125   :  { %729 = vmatmul.bf16.vlgmr.msra.gmra.mxu0 %v7630_v0  ;;  %742 = vmatmul.bf16.vlgmr.msra.gmra.mxu1 %v7630_v0 }
 0x126   :  { %819 = vmatpush.bf16.msra.mxu2 %v5905_v46  ;;  %832 = vmatpush.bf16.msra.mxu3 %v5916_v50 }
 0x127   :  { %845 = vmatpush.bf16.msrb.mxu0 %v5918_v51  ;;  %858 = vmatpush.bf16.msrb.mxu1 %v5930_v55 }
 0x12a   :  { %820 = vmatpush.bf16.msra.mxu2 %v5943_v59  ;;  %833 = vmatpush.bf16.msra.mxu3 %v5945_v60 }
 0x12b   :  { %846 = vmatpush.bf16.msrb.mxu0 %v5957_v1  ;;  %859 = vmatpush.bf16.msrb.mxu1 %v5968_v9 }
 0x12e   :  { %821 = vmatpush.bf16.msra.mxu2 %v5980_v16  ;;  %834 = vmatpush.bf16.msra.mxu3 %v5993_v21 }
 0x12f   :  { %847 = vmatpush.bf16.msrb.mxu0 %v5995_v22  ;;  %860 = vmatpush.bf16.msrb.mxu1 %v6007_v29 }
 0x132   :  { %822 = vmatpush.bf16.msra.mxu2 %v6025_v37  ;;  %835 = vmatpush.bf16.msra.mxu3 %v6029_v40 }
 0x133   :  { %848 = vmatpush.bf16.msrb.mxu0 %v6031_v41  ;;  %861 = vmatpush.bf16.msrb.mxu1 %v6034_v43 }
 0x136   :  { %953 = vmatpush.bf16.msrb.mxu2 %v5776_v2  ;;  %966 = vmatpush.bf16.msrb.mxu3 %v5778_v3 }
 0x137   :  { %979 = vmatpush.bf16.msra.mxu0 %v5780_v5  ;;  %992 = vmatpush.bf16.msra.mxu1 %v5782_v6 }
 0x13a   :  { %954 = vmatpush.bf16.msrb.mxu2 %v5797_v10  ;;  %967 = vmatpush.bf16.msrb.mxu3 %v5808_v14 }
 0x13b   :  { %980 = vmatpush.bf16.msra.mxu0 %v5810_v15  ;;  %993 = vmatpush.bf16.msra.mxu1 %v5822_v19 }
 0x13e   :  { %955 = vmatpush.bf16.msrb.mxu2 %v5835_v23  ;;  %968 = vmatpush.bf16.msrb.mxu3 %v5837_v24 }
 0x13f   :  { %981 = vmatpush.bf16.msra.mxu0 %v5849_v28  ;;  %994 = vmatpush.bf16.msra.mxu1 %v5854_v30 }
 0x142   :  { %956 = vmatpush.bf16.msrb.mxu2 %v5869_v34  ;;  %969 = vmatpush.bf16.msrb.mxu3 %v5880_v38 }
 0x143   :  { %982 = vmatpush.bf16.msra.mxu0 %v5882_v39  ;;  %995 = vmatpush.bf16.msra.mxu1 %v5891_v42 }
 0x146   :  { %957 = vmatpush.bf16.msrb.mxu2 %v5905_v46  ;;  %970 = vmatpush.bf16.msrb.mxu3 %v5916_v50 }
 0x147   :  { %983 = vmatpush.bf16.msra.mxu0 %v5918_v51  ;;  %996 = vmatpush.bf16.msra.mxu1 %v5930_v55 }
 0x14a   :  { %958 = vmatpush.bf16.msrb.mxu2 %v5943_v59  ;;  %971 = vmatpush.bf16.msrb.mxu3 %v5945_v60 }
 0x14b   :  { %984 = vmatpush.bf16.msra.mxu0 %v5957_v1  ;;  %997 = vmatpush.bf16.msra.mxu1 %v5968_v9 }
 0x14e   :  { %959 = vmatpush.bf16.msrb.mxu2 %v5980_v16  ;;  %972 = vmatpush.bf16.msrb.mxu3 %v5993_v21 }
 0x14f   :  { %985 = vmatpush.bf16.msra.mxu0 %v5995_v22  ;;  %998 = vmatpush.bf16.msra.mxu1 %v6007_v29 }
 0x152   :  { %960 = vmatpush.bf16.msrb.mxu2 %v6025_v37  ;;  %973 = vmatpush.bf16.msrb.mxu3 %v6029_v40 }
 0x153   :  { %986 = vmatpush.bf16.msra.mxu0 %v6031_v41  ;;  %999 = vmatpush.bf16.msra.mxu1 %v6034_v43 }
 0x192   :  { %v484_v54 = vpop.f32.mrf.mxu0  ;;  %v498_v56 = vpop.f32.mrf.mxu1 }
 0x193   :  { %v6124_v11 = vadd.f32 %v498_v56, %v7635_v4 }
 0x197   :  { %v456_v57 = vpop.f32.mrf.mxu2  ;;  %v470_v58 = vpop.f32.mrf.mxu3 }
 0x198   :  { %v6131_v26 = vadd.f32 %v456_v57, %v7634_v12  ;;  %v6135_v27 = vadd.f32 %v470_v58, %v7633_v13 }
 0x19a   :  { %v6113_v62 = vpop.f32.mrf.mxu0  ;;  %v6115_v63 = vpop.f32.mrf.mxu1 }
 0x19b   :  { %7652 = vst [vmem:[#allocation3_spill] sm:$0xff] %v6113_v62 }
 0x19c   :  { %7653 = vst [vmem:[#allocation4_spill] sm:$0xff] %v6115_v63 }
 0x19f   :  { %v6118_v7 = vpop.f32.mrf.mxu2  ;;  %v6120_v8 = vpop.f32.mrf.mxu3 }
 0x1a0   :  { %7654 = vst [vmem:[#allocation5_spill] sm:$0xff] %v6118_v7 }
 0x1a1   :  { %7655 = vst [vmem:[#allocation6_spill] sm:$0xff] %v6120_v8 }
 0x1a2   :  { %v730_v17 = vpop.f32.mrf.mxu0  ;;  %v743_v18 = vpop.f32.mrf.mxu1 }
 0x1a3   :  { %v750_v20 = vadd.f32 %v743_v18, %v6124_v11 }
 0x1a5   :  { %v4411_v25 = vmul.f32 -1.442695, %v750_v20  ;;  %v7632_v20 = vperm.slane %v6111_v61, 2 }
 0x1a7   :  { %5118 = vpow2.f32 %v4411_v25  ;;  %v704_v31 = vpop.f32.mrf.mxu2  ;;  %v717_v32 = vpop.f32.mrf.mxu3  ;;  %v6142_v25 = vadd.f32 %v484_v54, %v7632_v20 }
 0x1a8   :  { %v747_v33 = vadd.f32 %v704_v31, %v6131_v26  ;;  %v748_v35 = vadd.f32 %v717_v32, %v6135_v27 }
 0x1a9   :  { %7656 = vst [vmem:[#allocation7_spill] sm:$0xff] %v6142_v25 }
 0x1aa   :  { %v4409_v36 = vmul.f32 -1.442695, %v747_v33  ;;  %v4410_v44 = vmul.f32 -1.442695, %v748_v35  ;;  %v745_v45 = vpop.f32.mrf.mxu1  ;;  %v732_v47 = vpop.f32.mrf.mxu0  ;;  %v749_v33 = vadd.f32 %v730_v17, %v6142_v25 }
 0x1ac   :  { %5120 = vpow2.f32 %v4409_v36 }
 0x1ad   :  { %v5119_v48 = vpop.eup %5118  ;;  %5122 = vpow2.f32 %v4410_v44 }
 0x1ae   :  { %v793_v53 = vadd.f32 1.0, %v5119_v48 }
 0x1af   :  { %v706_v49 = vpop.f32.mrf.mxu2  ;;  %v719_v52 = vpop.f32.mrf.mxu3 }
 0x1b0   :  { %5124 = vrcp.f32 %v793_v53  ;;  %vm799_vm15 = vweird.f32 %v793_v53 }
 0x1b2   :  { %v5121_v56 = vpop.eup %5120 }
 0x1b3   :  { %v5123_v57 = vpop.eup %5122  ;;  %v754_v58 = vadd.f32 1.0, %v5121_v56 }
 0x1b4   :  { %v773_v18 = vadd.f32 1.0, %v5123_v57 }
 0x1b5   :  { %5126 = vrcp.f32 %v754_v58  ;;  %v766_v48 = vand.u32 2147483648, %v754_v58  ;;  %v764_v56 = vand.u32 2147483647, %v754_v58  ;;  %vm760_vm8 = vweird.f32 %v754_v58 }
 0x1b6   :  { %5128 = vrcp.f32 %v773_v18  ;;  %v5125_v31 = vpop.eup %5124  ;;  %v785_v57 = vand.u32 2147483648, %v773_v18  ;;  %v783_v54 = vand.u32 2147483647, %v773_v18  ;;  %vm779_vm10 = vweird.f32 %v773_v18 }
 0x1b7   :  { %v795_v45 = vmul.f32 %v5125_v31, %v793_v53  ;;  %5130 = vtanh.f32 %v749_v33  ;;  %v767_v17 = vor.u32 1.1754944e-38, %v766_v48  ;;  %vm765_vm11 = vcmp.eq.f32.partialorder %v764_v56, 8.507059e+37 }
 0x1b8   :  { %v786_v33 = vor.u32 1.1754944e-38, %v785_v57  ;;  %vm784_vm13 = vcmp.eq.f32.partialorder %v783_v54, 8.507059e+37  ;;  %vm800_vm14 = vweird.f32 %v5125_v31 }
 0x1b9   :  { %v796_v20 = vsub.f32 1.0, %v795_v45  ;;  %vm801_vm0 = vmor %vm799_vm15, %vm800_vm14 }
 0x1bb   :  { %v5127_v32 = vpop.eup %5126  ;;  %v797_v62 = vmul.f32 %v5125_v31, %v796_v20 }
 0x1bc   :  { %v5129_v35 = vpop.eup %5128  ;;  %v756_v36 = vmul.f32 %v5127_v32, %v754_v58  ;;  %vm761_vm6 = vweird.f32 %v5127_v32  ;;  %v805_v58 = vand.u32 2147483648, %v793_v53 }
 0x1bd   :  { %v775_v44 = vmul.f32 %v5129_v35, %v773_v18  ;;  %vm780_vm7 = vweird.f32 %v5129_v35  ;;  %vm762_vm9 = vmor %vm760_vm8, %vm761_vm6  ;;  %v798_v45 = vadd.f32 %v5125_v31, %v797_v62 }
 0x1be   :  { %v757_v47 = vsub.f32 1.0, %v756_v36  ;;  %vm781_vm12 = vmor %vm779_vm10, %vm780_vm7  ;;  %v5131_v36 = vpop.eup %5130  ;;  %v806_v18 = vor.u32 1.1754944e-38, %v805_v58 }
 0x1bf   :  { %v776_v49 = vsub.f32 1.0, %v775_v44 }
 0x1c0   :  { %v758_v52 = vmul.f32 %v5127_v32, %v757_v47 }
 0x1c1   :  { %v777_v0 = vmul.f32 %v5129_v35, %v776_v49 }
 0x1c2   :  { %v759_v13 = vadd.f32 %v5127_v32, %v758_v52 }
 0x1c3   :  { %v778_v12 = vadd.f32 %v5129_v35, %v777_v0  ;;  %v803_v0 = vand.u32 2147483647, %v793_v53 }
 0x1c4   :  { %v763_v4 = vsel %vm762_vm9, %v5127_v32, %v759_v13  ;;  %v802_v13 = vsel %vm801_vm0, %v5125_v31, %v798_v45 }
 0x1c5   :  { %v768_v44 = vsel %vm765_vm11, %v767_v17, %v763_v4  ;;  %v782_v47 = vsel %vm781_vm12, %v5129_v35, %v778_v12  ;;  %vm804_vm1 = vcmp.eq.f32.partialorder %v803_v0, 8.507059e+37 }
 0x1c6   :  { %v810_v8 = vmul.f32 %v5131_v36, %v768_v44  ;;  %v787_v49 = vsel %vm784_vm13, %v786_v33, %v782_v47  ;;  %v807_v12 = vsel %vm804_vm1, %v806_v18, %v802_v13 }
 0x1c7   :  { %v809_v7 = vmul.f32 0.0, %v787_v49 }
 0x1c9   :  { %v6145_v63 = vadd.f32 %v810_v8, %v809_v7 }
 0x1cb   :  { %5132 = vtanh.f32 %v6145_v63 }
 0x1d1   :  { %v5133_v4 = vpop.eup %5132 }
 0x1d2   :  { %v6148_v32 = vmul.f32 %v5133_v4, %v807_v12 }
 0x1d4   :  { %v814_v20 = vpack.c.bf16 %v6148_v32, %v6148_v32 }
 0x1d6   :  { %823 = vmatmul.bf16.vlgmr.msra.gmra.mxu2 %v814_v20  ;;  %836 = vmatmul.bf16.vlgmr.msra.gmra.mxu3 %v814_v20 }
 0x1d7   :  { %849 = vmatmul.bf16.vlgmr.msrb.gmra.mxu0 %v814_v20  ;;  %862 = vmatmul.bf16.vlgmr.msrb.gmra.mxu1 %v814_v20 }
 0x1d8   :  { %1091 = vmatpush.bf16.msra.mxu2 %v5776_v2  ;;  %1104 = vmatpush.bf16.msra.mxu3 %v5778_v3 }
 0x1d9   :  { %1117 = vmatpush.bf16.msrb.mxu0 %v5780_v5  ;;  %1130 = vmatpush.bf16.msrb.mxu1 %v5782_v6 }
 0x1dc   :  { %1092 = vmatpush.bf16.msra.mxu2 %v5797_v10  ;;  %1105 = vmatpush.bf16.msra.mxu3 %v5808_v14 }
 0x1dd   :  { %1118 = vmatpush.bf16.msrb.mxu0 %v5810_v15  ;;  %1131 = vmatpush.bf16.msrb.mxu1 %v5822_v19 }
 0x1e0   :  { %1093 = vmatpush.bf16.msra.mxu2 %v5835_v23  ;;  %1106 = vmatpush.bf16.msra.mxu3 %v5837_v24 }
 0x1e1   :  { %1119 = vmatpush.bf16.msrb.mxu0 %v5849_v28  ;;  %1132 = vmatpush.bf16.msrb.mxu1 %v5854_v30 }
 0x1e4   :  { %1094 = vmatpush.bf16.msra.mxu2 %v5869_v34  ;;  %1107 = vmatpush.bf16.msra.mxu3 %v5880_v38 }
 0x1e5   :  { %1120 = vmatpush.bf16.msrb.mxu0 %v5882_v39  ;;  %1133 = vmatpush.bf16.msrb.mxu1 %v5891_v42 }
 0x1e8   :  { %1095 = vmatpush.bf16.msra.mxu2 %v5905_v46  ;;  %1108 = vmatpush.bf16.msra.mxu3 %v5916_v50 }
 0x1e9   :  { %1121 = vmatpush.bf16.msrb.mxu0 %v5918_v51  ;;  %1134 = vmatpush.bf16.msrb.mxu1 %v5930_v55 }
 0x1ec   :  { %1096 = vmatpush.bf16.msra.mxu2 %v5943_v59  ;;  %1109 = vmatpush.bf16.msra.mxu3 %v5945_v60 }
 0x1ed   :  { %1122 = vmatpush.bf16.msrb.mxu0 %v5957_v1  ;;  %1135 = vmatpush.bf16.msrb.mxu1 %v5968_v9 }
 0x1f0   :  { %1097 = vmatpush.bf16.msra.mxu2 %v5980_v16  ;;  %1110 = vmatpush.bf16.msra.mxu3 %v5993_v21 }
 0x1f1   :  { %1123 = vmatpush.bf16.msrb.mxu0 %v5995_v22  ;;  %1136 = vmatpush.bf16.msrb.mxu1 %v6007_v29 }
 0x1f4   :  { %1098 = vmatpush.bf16.msra.mxu2 %v6025_v37  ;;  %1111 = vmatpush.bf16.msra.mxu3 %v6029_v40 }
 0x1f5   :  { %1124 = vmatpush.bf16.msrb.mxu0 %v6031_v41  ;;  %1137 = vmatpush.bf16.msrb.mxu1 %v6034_v43 }
 0x254   :  { %v850_v62 = vpop.f32.mrf.mxu0  ;;  %v863_v7 = vpop.f32.mrf.mxu1 }
 0x255   :  { %v874_v8 = vrot.slane %v863_v7, 6  ;;  %v873_v12 = vrot.slane %v850_v62, 6 }
 0x257   :  { %v882_v53 = vadd.f32 %v874_v8, %v6124_v11  ;;  %v881_v8 = vadd.f32 %v873_v12, %v6142_v25 }
 0x259   :  { %v4414_v31 = vmul.f32 -1.442695, %v882_v53  ;;  %v824_v35 = vpop.f32.mrf.mxu2  ;;  %v837_v48 = vpop.f32.mrf.mxu3 }
 0x25a   :  { %v871_v52 = vrot.slane %v824_v35, 6  ;;  %v872_v56 = vrot.slane %v837_v48, 6 }
 0x25b   :  { %5134 = vpow2.f32 %v4414_v31 }
 0x25c   :  { %v879_v57 = vadd.f32 %v871_v52, %v6131_v26  ;;  %v880_v54 = vadd.f32 %v872_v56, %v6135_v27  ;;  %v852_v17 = vpop.f32.mrf.mxu0  ;;  %v865_v33 = vpop.f32.mrf.mxu1 }
 0x25e   :  { %v4412_v36 = vmul.f32 -1.442695, %v879_v57  ;;  %v4413_v44 = vmul.f32 -1.442695, %v880_v54 }
 0x260   :  { %5136 = vpow2.f32 %v4412_v36 }
 0x261   :  { %v5135_v47 = vpop.eup %5134  ;;  %5138 = vpow2.f32 %v4413_v44  ;;  %v826_v49 = vpop.f32.mrf.mxu2 }
 0x262   :  { %v839_v45 = vpop.f32.mrf.mxu3  ;;  %v925_v58 = vadd.f32 1.0, %v5135_v47 }
 0x264   :  { %5140 = vrcp.f32 %v925_v58  ;;  %vm931_vm11 = vweird.f32 %v925_v58 }
 0x266   :  { %v5137_v0 = vpop.eup %5136 }
 0x267   :  { %v5139_v13 = vpop.eup %5138  ;;  %v886_v18 = vadd.f32 1.0, %v5137_v0 }
 0x268   :  { %v905_v4 = vadd.f32 1.0, %v5139_v13 }
 0x269   :  { %5142 = vrcp.f32 %v886_v18  ;;  %v898_v56 = vand.u32 2147483648, %v886_v18  ;;  %v896_v17 = vand.u32 2147483647, %v886_v18  ;;  %vm892_vm4 = vweird.f32 %v886_v18 }
 0x26a   :  { %5144 = vrcp.f32 %v905_v4  ;;  %v5141_v20 = vpop.eup %5140  ;;  %v917_v33 = vand.u32 2147483648, %v905_v4  ;;  %v915_v44 = vand.u32 2147483647, %v905_v4  ;;  %vm911_vm6 = vweird.f32 %v905_v4 }
 0x26b   :  { %v927_v48 = vmul.f32 %v5141_v20, %v925_v58  ;;  %5146 = vtanh.f32 %v881_v8  ;;  %v899_v49 = vor.u32 1.1754944e-38, %v898_v56  ;;  %vm897_vm7 = vcmp.eq.f32.partialorder %v896_v17, 8.507059e+37 }
 0x26c   :  { %v918_v13 = vor.u32 1.1754944e-38, %v917_v33  ;;  %v942_v8 = vrot.slane %v6145_v63, 6  ;;  %vm916_vm9 = vcmp.eq.f32.partialorder %v915_v44, 8.507059e+37  ;;  %vm932_vm10 = vweird.f32 %v5141_v20 }
 0x26d   :  { %v928_v62 = vsub.f32 1.0, %v927_v48  ;;  %v937_v56 = vand.u32 2147483648, %v925_v58  ;;  %vm933_vm12 = vmor %vm931_vm11, %vm932_vm10  ;;  %vm1762_vm10 = vcmask 1041408   ;;  %vm1764_vm11 = vcmask 1043456  }
 0x26f   :  { %v5143_v7 = vpop.eup %5142  ;;  %v938_v17 = vor.u32 1.1754944e-38, %v937_v56 }
 0x270   :  { %v5145_v53 = vpop.eup %5144  ;;  %v888_v31 = vmul.f32 %v5143_v7, %v886_v18  ;;  %vm893_vm2 = vweird.f32 %v5143_v7 }
 0x271   :  { %v907_v35 = vmul.f32 %v5145_v53, %v905_v4  ;;  %vm912_vm3 = vweird.f32 %v5145_v53  ;;  %vm894_vm5 = vmor %vm892_vm4, %vm893_vm2  ;;  %v5147_v12 = vpop.eup %5146  ;;  %v935_v4 = vand.u32 2147483647, %v925_v58 }
 0x272   :  { %v889_v52 = vsub.f32 1.0, %v888_v31  ;;  %vm913_vm8 = vmor %vm911_vm6, %vm912_vm3 }
 0x273   :  { %v908_v57 = vsub.f32 1.0, %v907_v35  ;;  %vm936_vm13 = vcmp.eq.f32.partialorder %v935_v4, 8.507059e+37 }
 0x274   :  { %v890_v54 = vmul.f32 %v5143_v7, %v889_v52 }
 0x275   :  { %v909_v36 = vmul.f32 %v5145_v53, %v908_v57  ;;  %v929_v57 = vmul.f32 %v5141_v20, %v928_v62 }
 0x276   :  { %v891_v47 = vadd.f32 %v5143_v7, %v890_v54 }
 0x277   :  { %v910_v45 = vadd.f32 %v5145_v53, %v909_v36  ;;  %v930_v18 = vadd.f32 %v5141_v20, %v929_v57 }
 0x278   :  { %v895_v0 = vsel %vm894_vm5, %v5143_v7, %v891_v47 }
 0x279   :  { %v900_v31 = vsel %vm897_vm7, %v899_v49, %v895_v0  ;;  %v914_v35 = vsel %vm913_vm8, %v5145_v53, %v910_v45  ;;  %v934_v7 = vsel %vm933_vm12, %v5141_v20, %v930_v18 }
 0x27a   :  { %v919_v52 = vsel %vm916_vm9, %v918_v13, %v914_v35  ;;  %v945_v61 = vmul.f32 %v5147_v12, %v900_v31  ;;  %v939_v53 = vsel %vm936_vm13, %v938_v17, %v934_v7 }
 0x27b   :  { %v944_v48 = vmul.f32 %v942_v8, %v919_v52 }
 0x27d   :  { %v6189_v54 = vadd.f32 %v945_v61, %v944_v48 }
 0x27f   :  { %5148 = vtanh.f32 %v6189_v54 }
 0x285   :  { %v5149_v63 = vpop.eup %5148 }
 0x286   :  { %v6192_v33 = vmul.f32 %v5149_v63, %v939_v53 }
 0x288   :  { %v949_v36 = vpack.c.bf16 %v6192_v33, %v6192_v33 }
 0x28a   :  { %v951_v61 = vrot.slane %v949_v36, 1 }
 0x28c   :  { %961 = vmatmul.bf16.vlgmr.msrb.gmra.mxu2 %v951_v61  ;;  %974 = vmatmul.bf16.vlgmr.msrb.gmra.mxu3 %v951_v61 }
 0x28d   :  { %987 = vmatmul.bf16.vlgmr.msra.gmra.mxu0 %v951_v61  ;;  %1000 = vmatmul.bf16.vlgmr.msra.gmra.mxu1 %v951_v61 }
 0x28e   :  { %1229 = vmatpush.bf16.msrb.mxu2 %v5776_v2  ;;  %1242 = vmatpush.bf16.msrb.mxu3 %v5778_v3 }
 0x28f   :  { %1255 = vmatpush.bf16.msra.mxu0 %v5780_v5  ;;  %1268 = vmatpush.bf16.msra.mxu1 %v5782_v6 }
 0x292   :  { %1230 = vmatpush.bf16.msrb.mxu2 %v5797_v10  ;;  %1243 = vmatpush.bf16.msrb.mxu3 %v5808_v14 }
 0x293   :  { %1256 = vmatpush.bf16.msra.mxu0 %v5810_v15  ;;  %1269 = vmatpush.bf16.msra.mxu1 %v5822_v19 }
 0x296   :  { %1231 = vmatpush.bf16.msrb.mxu2 %v5835_v23  ;;  %1244 = vmatpush.bf16.msrb.mxu3 %v5837_v24 }
 0x297   :  { %1257 = vmatpush.bf16.msra.mxu0 %v5849_v28  ;;  %1270 = vmatpush.bf16.msra.mxu1 %v5854_v30 }
 0x29a   :  { %1232 = vmatpush.bf16.msrb.mxu2 %v5869_v34  ;;  %1245 = vmatpush.bf16.msrb.mxu3 %v5880_v38 }
 0x29b   :  { %1258 = vmatpush.bf16.msra.mxu0 %v5882_v39  ;;  %1271 = vmatpush.bf16.msra.mxu1 %v5891_v42 }
 0x29e   :  { %1233 = vmatpush.bf16.msrb.mxu2 %v5905_v46  ;;  %1246 = vmatpush.bf16.msrb.mxu3 %v5916_v50 }
 0x29f   :  { %1259 = vmatpush.bf16.msra.mxu0 %v5918_v51  ;;  %1272 = vmatpush.bf16.msra.mxu1 %v5930_v55 }
 0x2a2   :  { %1234 = vmatpush.bf16.msrb.mxu2 %v5943_v59  ;;  %1247 = vmatpush.bf16.msrb.mxu3 %v5945_v60 }
 0x2a3   :  { %1260 = vmatpush.bf16.msra.mxu0 %v5957_v1  ;;  %1273 = vmatpush.bf16.msra.mxu1 %v5968_v9 }
 0x2a6   :  { %1235 = vmatpush.bf16.msrb.mxu2 %v5980_v16  ;;  %1248 = vmatpush.bf16.msrb.mxu3 %v5993_v21 }
 0x2a7   :  { %1261 = vmatpush.bf16.msra.mxu0 %v5995_v22  ;;  %1274 = vmatpush.bf16.msra.mxu1 %v6007_v29 }
 0x2aa   :  { %1236 = vmatpush.bf16.msrb.mxu2 %v6025_v37  ;;  %1249 = vmatpush.bf16.msrb.mxu3 %v6029_v40 }
 0x2ab   :  { %1262 = vmatpush.bf16.msra.mxu0 %v6031_v41  ;;  %1275 = vmatpush.bf16.msra.mxu1 %v6034_v43 }
 0x30a   :  { %v988_v58 = vpop.f32.mrf.mxu0  ;;  %v1001_v20 = vpop.f32.mrf.mxu1 }
 0x30b   :  { %v1012_v44 = vrot.slane %v1001_v20, 4  ;;  %v1011_v36 = vrot.slane %v988_v58, 4 }
 0x30d   :  { %v1020_v62 = vadd.f32 %v1012_v44, %v6124_v11  ;;  %v1019_v44 = vadd.f32 %v1011_v36, %v6142_v25 }
 0x30f   :  { %v4417_v47 = vmul.f32 -1.442695, %v1020_v62  ;;  %v962_v49 = vpop.f32.mrf.mxu2  ;;  %v975_v45 = vpop.f32.mrf.mxu3 }
 0x310   :  { %v1009_v0 = vrot.slane %v962_v49, 4  ;;  %v1010_v13 = vrot.slane %v975_v45, 4 }
 0x311   :  { %5150 = vpow2.f32 %v4417_v47 }
 0x312   :  { %v1017_v12 = vadd.f32 %v1009_v0, %v6131_v26  ;;  %v1018_v8 = vadd.f32 %v1010_v13, %v6135_v27  ;;  %v990_v31 = vpop.f32.mrf.mxu0  ;;  %v1003_v35 = vpop.f32.mrf.mxu1 }
 0x314   :  { %v4415_v52 = vmul.f32 -1.442695, %v1017_v12  ;;  %v4416_v57 = vmul.f32 -1.442695, %v1018_v8 }
 0x316   :  { %5152 = vpow2.f32 %v4415_v52 }
 0x317   :  { %v5151_v48 = vpop.eup %5150  ;;  %5154 = vpow2.f32 %v4416_v57  ;;  %v964_v18 = vpop.f32.mrf.mxu2 }
 0x318   :  { %v977_v56 = vpop.f32.mrf.mxu3  ;;  %v1063_v4 = vadd.f32 1.0, %v5151_v48 }
 0x31a   :  { %5156 = vrcp.f32 %v1063_v4  ;;  %vm1069_vm7 = vweird.f32 %v1063_v4 }
 0x31c   :  { %v5153_v7 = vpop.eup %5152 }
 0x31d   :  { %v5155_v17 = vpop.eup %5154  ;;  %v1024_v63 = vadd.f32 1.0, %v5153_v7 }
 0x31e   :  { %v1043_v53 = vadd.f32 1.0, %v5155_v17 }
 0x31f   :  { %5158 = vrcp.f32 %v1024_v63  ;;  %v1036_v13 = vand.u32 2147483648, %v1024_v63  ;;  %v1034_v31 = vand.u32 2147483647, %v1024_v63  ;;  %vm1030_vm0 = vweird.f32 %v1024_v63 }
 0x320   :  { %5160 = vrcp.f32 %v1043_v53  ;;  %v5157_v61 = vpop.eup %5156  ;;  %v1055_v35 = vand.u32 2147483648, %v1043_v53  ;;  %v1053_v57 = vand.u32 2147483647, %v1043_v53  ;;  %vm1049_vm2 = vweird.f32 %v1043_v53 }
 0x321   :  { %v1065_v45 = vmul.f32 %v5157_v61, %v1063_v4  ;;  %5162 = vtanh.f32 %v1019_v44  ;;  %v1037_v18 = vor.u32 1.1754944e-38, %v1036_v13  ;;  %vm1035_vm3 = vcmp.eq.f32.partialorder %v1034_v31, 8.507059e+37 }
 0x322   :  { %v1056_v17 = vor.u32 1.1754944e-38, %v1055_v35  ;;  %v1080_v44 = vrot.slane %v6189_v54, 6  ;;  %vm1054_vm5 = vcmp.eq.f32.partialorder %v1053_v57, 8.507059e+37  ;;  %vm1070_vm6 = vweird.f32 %v5157_v61 }
 0x323   :  { %v1066_v58 = vsub.f32 1.0, %v1065_v45  ;;  %v1075_v13 = vand.u32 2147483648, %v1063_v4  ;;  %vm1071_vm8 = vmor %vm1069_vm7, %vm1070_vm6 }
 0x325   :  { %v5159_v20 = vpop.eup %5158  ;;  %v1076_v31 = vor.u32 1.1754944e-38, %v1075_v13 }
 0x326   :  { %v5161_v62 = vpop.eup %5160  ;;  %v1026_v47 = vmul.f32 %v5159_v20, %v1024_v63  ;;  %vm1031_vm14 = vweird.f32 %v5159_v20 }
 0x327   :  { %v1045_v49 = vmul.f32 %v5161_v62, %v1043_v53  ;;  %vm1050_vm15 = vweird.f32 %v5161_v62  ;;  %vm1032_vm1 = vmor %vm1030_vm0, %vm1031_vm14  ;;  %v5163_v36 = vpop.eup %5162  ;;  %v1073_v53 = vand.u32 2147483647, %v1063_v4 }
 0x328   :  { %v1027_v0 = vsub.f32 1.0, %v1026_v47  ;;  %vm1051_vm4 = vmor %vm1049_vm2, %vm1050_vm15 }
 0x329   :  { %v1046_v12 = vsub.f32 1.0, %v1045_v49  ;;  %vm1074_vm9 = vcmp.eq.f32.partialorder %v1073_v53, 8.507059e+37 }
 0x32a   :  { %v1028_v8 = vmul.f32 %v5159_v20, %v1027_v0 }
 0x32b   :  { %v1047_v52 = vmul.f32 %v5161_v62, %v1046_v12  ;;  %v1067_v12 = vmul.f32 %v5157_v61, %v1066_v58 }
 0x32c   :  { %v1029_v48 = vadd.f32 %v5159_v20, %v1028_v8 }
 0x32d   :  { %v1048_v56 = vadd.f32 %v5161_v62, %v1047_v52  ;;  %v1068_v63 = vadd.f32 %v5157_v61, %v1067_v12 }
 0x32e   :  { %v1033_v7 = vsel %vm1032_vm1, %v5159_v20, %v1029_v48 }
 0x32f   :  { %v1038_v47 = vsel %vm1035_vm3, %v1037_v18, %v1033_v7  ;;  %v1052_v49 = vsel %vm1051_vm4, %v5161_v62, %v1048_v56  ;;  %v1072_v20 = vsel %vm1071_vm8, %v5157_v61, %v1068_v63  ;;  %vm1766_vm8 = vcmask 1045504  }
 0x330   :  { %v1057_v0 = vsel %vm1054_vm5, %v1056_v17, %v1052_v49  ;;  %v1083_v25 = vmul.f32 %v5163_v36, %v1038_v47  ;;  %v1077_v62 = vsel %vm1074_vm9, %v1076_v31, %v1072_v20 }
 0x331   :  { %v1082_v45 = vmul.f32 %v1080_v44, %v1057_v0 }
 0x333   :  { %v6233_v8 = vadd.f32 %v1083_v25, %v1082_v45  ;;  %v1763_v25 = vsel %vm1762_vm10, %v6148_v32, %v6192_v33 }
 0x335   :  { %5164 = vtanh.f32 %v6233_v8 }
 0x33b   :  { %v5165_v54 = vpop.eup %5164 }
 0x33c   :  { %v1086_v35 = vmul.f32 %v5165_v54, %v1077_v62 }
 0x33e   :  { %v1087_v52 = vpack.c.bf16 %v1086_v35, %v1086_v35  ;;  %v6240_v57 = vsel %vm1764_vm11, %v1763_v25, %v1086_v35  ;;  %v7657_v35 = vld [vmem:[#allocation7_spill] sm:$0xff] }
 0x340   :  { %v1089_v58 = vrot.slane %v1087_v52, 2 }
 0x342   :  { %1099 = vmatmul.bf16.vlgmr.msra.gmra.mxu2 %v1089_v58  ;;  %1112 = vmatmul.bf16.vlgmr.msra.gmra.mxu3 %v1089_v58 }
 0x343   :  { %1125 = vmatmul.bf16.vlgmr.msrb.gmra.mxu0 %v1089_v58  ;;  %1138 = vmatmul.bf16.vlgmr.msrb.gmra.mxu1 %v1089_v58 }
 0x344   :  { %1352 = vmatpush.bf16.msra.mxu2 %v5776_v2  ;;  %1365 = vmatpush.bf16.msra.mxu3 %v5778_v3 }
 0x345   :  { %1378 = vmatpush.bf16.msrb.mxu0 %v5780_v5  ;;  %1391 = vmatpush.bf16.msrb.mxu1 %v5782_v6 }
 0x348   :  { %1353 = vmatpush.bf16.msra.mxu2 %v5797_v10  ;;  %1366 = vmatpush.bf16.msra.mxu3 %v5808_v14 }
 0x349   :  { %1379 = vmatpush.bf16.msrb.mxu0 %v5810_v15  ;;  %1392 = vmatpush.bf16.msrb.mxu1 %v5822_v19 }
 0x34c   :  { %1354 = vmatpush.bf16.msra.mxu2 %v5835_v23  ;;  %1367 = vmatpush.bf16.msra.mxu3 %v5837_v24 }
 0x34d   :  { %1380 = vmatpush.bf16.msrb.mxu0 %v5849_v28  ;;  %1393 = vmatpush.bf16.msrb.mxu1 %v5854_v30 }
 0x350   :  { %1355 = vmatpush.bf16.msra.mxu2 %v5869_v34  ;;  %1368 = vmatpush.bf16.msra.mxu3 %v5880_v38 }
 0x351   :  { %1381 = vmatpush.bf16.msrb.mxu0 %v5882_v39  ;;  %1394 = vmatpush.bf16.msrb.mxu1 %v5891_v42 }
 0x354   :  { %1356 = vmatpush.bf16.msra.mxu2 %v5905_v46  ;;  %1369 = vmatpush.bf16.msra.mxu3 %v5916_v50 }
 0x355   :  { %1382 = vmatpush.bf16.msrb.mxu0 %v5918_v51  ;;  %1395 = vmatpush.bf16.msrb.mxu1 %v5930_v55 }
 0x358   :  { %1357 = vmatpush.bf16.msra.mxu2 %v5943_v59  ;;  %1370 = vmatpush.bf16.msra.mxu3 %v5945_v60 }
 0x359   :  { %1383 = vmatpush.bf16.msrb.mxu0 %v5957_v1  ;;  %1396 = vmatpush.bf16.msrb.mxu1 %v5968_v9 }
 0x35c   :  { %1358 = vmatpush.bf16.msra.mxu2 %v5980_v16  ;;  %1371 = vmatpush.bf16.msra.mxu3 %v5993_v21 }
 0x35d   :  { %1384 = vmatpush.bf16.msrb.mxu0 %v5995_v22  ;;  %1397 = vmatpush.bf16.msrb.mxu1 %v6007_v29 }
 0x360   :  { %1359 = vmatpush.bf16.msra.mxu2 %v6025_v37  ;;  %1372 = vmatpush.bf16.msra.mxu3 %v6029_v40 }
 0x361   :  { %1385 = vmatpush.bf16.msrb.mxu0 %v6031_v41  ;;  %1398 = vmatpush.bf16.msrb.mxu1 %v6034_v43 }
 0x3c0   :  { %v1126_v32 = vpop.f32.mrf.mxu0  ;;  %v1139_v33 = vpop.f32.mrf.mxu1 }
 0x3c1   :  { %v1150_v4 = vrot.slane %v1139_v33, 2 }
 0x3c3   :  { %v1158_v61 = vadd.f32 %v1150_v4, %v6124_v11 }
 0x3c5   :  { %v4420_v48 = vmul.f32 -1.442695, %v1158_v61  ;;  %v1100_v18 = vpop.f32.mrf.mxu2  ;;  %v1113_v56 = vpop.f32.mrf.mxu3 }
 0x3c6   :  { %v1147_v7 = vrot.slane %v1100_v18, 2  ;;  %v1148_v17 = vrot.slane %v1113_v56, 2 }
 0x3c7   :  { %5166 = vpow2.f32 %v4420_v48 }
 0x3c8   :  { %v1155_v36 = vadd.f32 %v1147_v7, %v6131_v26  ;;  %v1156_v44 = vadd.f32 %v1148_v17, %v6135_v27  ;;  %v1128_v47 = vpop.f32.mrf.mxu0  ;;  %v1141_v49 = vpop.f32.mrf.mxu1  ;;  %v1149_v26 = vrot.slane %v1126_v32, 2 }
 0x3ca   :  { %v4418_v0 = vmul.f32 -1.442695, %v1155_v36  ;;  %v4419_v12 = vmul.f32 -1.442695, %v1156_v44  ;;  %v1157_v25 = vadd.f32 %v1149_v26, %v7657_v35 }
 0x3cc   :  { %5168 = vpow2.f32 %v4418_v0 }
 0x3cd   :  { %v5167_v45 = vpop.eup %5166  ;;  %5170 = vpow2.f32 %v4419_v12  ;;  %v1102_v63 = vpop.f32.mrf.mxu2 }
 0x3ce   :  { %v1115_v13 = vpop.f32.mrf.mxu3  ;;  %v1201_v11 = vadd.f32 1.0, %v5167_v45 }
 0x3cf   :  { %v1218_v13 = vrot.slane %v6233_v8, 6 }
 0x3d0   :  { %5172 = vrcp.f32 %v1201_v11  ;;  %vm1207_vm5 = vweird.f32 %v1201_v11 }
 0x3d2   :  { %v5169_v53 = vpop.eup %5168 }
 0x3d3   :  { %v5171_v20 = vpop.eup %5170  ;;  %v1162_v31 = vadd.f32 1.0, %v5169_v53 }
 0x3d4   :  { %v1181_v54 = vadd.f32 1.0, %v5171_v20 }
 0x3d5   :  { %5174 = vrcp.f32 %v1162_v31  ;;  %v1174_v48 = vand.u32 2147483648, %v1162_v31  ;;  %v1172_v7 = vand.u32 2147483647, %v1162_v31  ;;  %vm1168_vm14 = vweird.f32 %v1162_v31 }
 0x3d6   :  { %5176 = vrcp.f32 %v1181_v54  ;;  %v5173_v62 = vpop.eup %5172  ;;  %v1193_v17 = vand.u32 2147483648, %v1181_v54  ;;  %v1191_v44 = vand.u32 2147483647, %v1181_v54  ;;  %vm1187_vm0 = vweird.f32 %v1181_v54 }
 0x3d7   :  { %v1203_v4 = vmul.f32 %v5173_v62, %v1201_v11  ;;  %5178 = vtanh.f32 %v1157_v25  ;;  %v1175_v49 = vor.u32 1.1754944e-38, %v1174_v48  ;;  %vm1173_vm1 = vcmp.eq.f32.partialorder %v1172_v7, 8.507059e+37 }
 0x3d8   :  { %v1194_v45 = vor.u32 1.1754944e-38, %v1193_v17  ;;  %vm1192_vm3 = vcmp.eq.f32.partialorder %v1191_v44, 8.507059e+37  ;;  %vm1208_vm4 = vweird.f32 %v5173_v62 }
 0x3d9   :  { %v1204_v32 = vsub.f32 1.0, %v1203_v4  ;;  %v1213_v4 = vand.u32 2147483648, %v1201_v11  ;;  %vm1209_vm6 = vmor %vm1207_vm5, %vm1208_vm4 }
 0x3db   :  { %v5175_v27 = vpop.eup %5174  ;;  %v1205_v35 = vmul.f32 %v5173_v62, %v1204_v32 }
 0x3dc   :  { %v5177_v52 = vpop.eup %5176  ;;  %v1164_v58 = vmul.f32 %v5175_v27, %v1162_v31  ;;  %vm1169_vm12 = vweird.f32 %v5175_v27 }
 0x3dd   :  { %v1183_v33 = vmul.f32 %v5177_v52, %v1181_v54  ;;  %vm1188_vm13 = vweird.f32 %v5177_v52  ;;  %vm1170_vm15 = vmor %vm1168_vm14, %vm1169_vm12  ;;  %v5179_v63 = vpop.eup %5178  ;;  %v1206_v31 = vadd.f32 %v5173_v62, %v1205_v35  ;;  %v1211_v54 = vand.u32 2147483647, %v1201_v11 }
 0x3de   :  { %v1165_v61 = vsub.f32 1.0, %v1164_v58  ;;  %vm1189_vm2 = vmor %vm1187_vm0, %vm1188_vm13 }
 0x3df   :  { %v1184_v18 = vsub.f32 1.0, %v1183_v33  ;;  %vm1212_vm7 = vcmp.eq.f32.partialorder %v1211_v54, 8.507059e+37 }
 0x3e0   :  { %v1166_v56 = vmul.f32 %v5175_v27, %v1165_v61  ;;  %v1214_v61 = vor.u32 1.1754944e-38, %v1213_v4 }
 0x3e1   :  { %v1185_v36 = vmul.f32 %v5177_v52, %v1184_v18 }
 0x3e2   :  { %v1167_v47 = vadd.f32 %v5175_v27, %v1166_v56 }
 0x3e3   :  { %v1186_v0 = vadd.f32 %v5177_v52, %v1185_v36 }
 0x3e4   :  { %v1171_v12 = vsel %vm1170_vm15, %v5175_v27, %v1167_v47  ;;  %v1210_v27 = vsel %vm1209_vm6, %v5173_v62, %v1206_v31  ;;  %v7660_v62 = vld [vmem:[#allocation4_spill] sm:$0xff] }
 0x3e5   :  { %v1176_v53 = vsel %vm1173_vm1, %v1175_v49, %v1171_v12  ;;  %v1190_v20 = vsel %vm1189_vm2, %v5177_v52, %v1186_v0  ;;  %v1215_v52 = vsel %vm1212_vm7, %v1214_v61, %v1210_v27  ;;  %v7662_v0 = vld [vmem:[#allocation5_spill] sm:$0xff] }
 0x3e6   :  { %v1195_v26 = vsel %vm1192_vm3, %v1194_v45, %v1190_v20  ;;  %v1221_v25 = vmul.f32 %v5179_v63, %v1176_v53  ;;  %v7664_v63 = vld [vmem:[#allocation6_spill] sm:$0xff] }
 0x3e7   :  { %v1220_v58 = vmul.f32 %v1218_v13, %v1195_v26 }
 0x3e9   :  { %v6279_v33 = vadd.f32 %v1221_v25, %v1220_v58 }
 0x3eb   :  { %5180 = vtanh.f32 %v6279_v33 }
 0x3f1   :  { %v5181_v8 = vpop.eup %5180 }
 0x3f2   :  { %v1224_v48 = vmul.f32 %v5181_v8, %v1215_v52 }
 0x3f4   :  { %v1225_v18 = vpack.c.bf16 %v1224_v48, %v1224_v48  ;;  %v6284_v56 = vsel %vm1766_vm8, %v6240_v57, %v1224_v48  ;;  %v7658_v57 = vld [vmem:[#allocation2_spill] sm:$0xff] }
 0x3f5   :  { %v7659_v11 = vperm.slane %v7658_v57, 3  ;;  %v7661_v49 = vperm.slane %v7658_v57, 0  ;;  %v7663_v45 = vperm.slane %v7658_v57, 1 }
 0x3f6   :  { %v1227_v7 = vrot.slane %v1225_v18, 3 }
 0x3f7   :  { %v6321_v17 = vadd.f32 %v7660_v62, %v7659_v11  ;;  %v6327_v12 = vadd.f32 %v7662_v0, %v7661_v49  ;;  %v6332_v13 = vadd.f32 %v7664_v63, %v7663_v45  ;;  %v7665_v11 = vperm.slane %v7658_v57, 2  ;;  %v7666_v62 = vld [vmem:[#allocation3_spill] sm:$0xff] }
 0x3f8   :  { %1237 = vmatmul.bf16.vlgmr.msrb.gmra.mxu2 %v1227_v7  ;;  %1250 = vmatmul.bf16.vlgmr.msrb.gmra.mxu3 %v1227_v7 }
 0x3f9   :  { %1263 = vmatmul.bf16.vlgmr.msra.gmra.mxu0 %v1227_v7  ;;  %1276 = vmatmul.bf16.vlgmr.msra.gmra.mxu1 %v1227_v7 }
 0x3fa   :  { %1490 = vmatpush.bf16.msrb.mxu2 %v5776_v2  ;;  %1503 = vmatpush.bf16.msrb.mxu3 %v5778_v3 }
 0x3fb   :  { %1516 = vmatpush.bf16.msra.mxu0 %v5780_v5  ;;  %1529 = vmatpush.bf16.msra.mxu1 %v5782_v6 }
 0x3fe   :  { %1491 = vmatpush.bf16.msrb.mxu2 %v5797_v10  ;;  %1504 = vmatpush.bf16.msrb.mxu3 %v5808_v14 }
 0x3ff   :  { %1517 = vmatpush.bf16.msra.mxu0 %v5810_v15  ;;  %1530 = vmatpush.bf16.msra.mxu1 %v5822_v19 }
 0x402   :  { %1492 = vmatpush.bf16.msrb.mxu2 %v5835_v23  ;;  %1505 = vmatpush.bf16.msrb.mxu3 %v5837_v24 }
 0x403   :  { %1518 = vmatpush.bf16.msra.mxu0 %v5849_v28  ;;  %1531 = vmatpush.bf16.msra.mxu1 %v5854_v30 }
 0x406   :  { %1493 = vmatpush.bf16.msrb.mxu2 %v5869_v34  ;;  %1506 = vmatpush.bf16.msrb.mxu3 %v5880_v38 }
 0x407   :  { %1519 = vmatpush.bf16.msra.mxu0 %v5882_v39  ;;  %1532 = vmatpush.bf16.msra.mxu1 %v5891_v42 }
 0x40a   :  { %1494 = vmatpush.bf16.msrb.mxu2 %v5905_v46  ;;  %1507 = vmatpush.bf16.msrb.mxu3 %v5916_v50 }
 0x40b   :  { %1520 = vmatpush.bf16.msra.mxu0 %v5918_v51  ;;  %1533 = vmatpush.bf16.msra.mxu1 %v5930_v55 }
 0x40e   :  { %1495 = vmatpush.bf16.msrb.mxu2 %v5943_v59  ;;  %1508 = vmatpush.bf16.msrb.mxu3 %v5945_v60 }
 0x40f   :  { %1521 = vmatpush.bf16.msra.mxu0 %v5957_v1  ;;  %1534 = vmatpush.bf16.msra.mxu1 %v5968_v9 }
 0x412   :  { %1496 = vmatpush.bf16.msrb.mxu2 %v5980_v16  ;;  %1509 = vmatpush.bf16.msrb.mxu3 %v5993_v21 }
 0x413   :  { %1522 = vmatpush.bf16.msra.mxu0 %v5995_v22  ;;  %1535 = vmatpush.bf16.msra.mxu1 %v6007_v29 }
 0x416   :  { %1497 = vmatpush.bf16.msrb.mxu2 %v6025_v37  ;;  %1510 = vmatpush.bf16.msrb.mxu3 %v6029_v40 }
 0x417   :  { %1523 = vmatpush.bf16.msra.mxu0 %v6031_v41  ;;  %1536 = vmatpush.bf16.msra.mxu1 %v6034_v43 }
 0x476   :  { %v1264_v36 = vpop.f32.mrf.mxu0  ;;  %v1277_v44 = vpop.f32.mrf.mxu1 }
 0x477   :  { %v1284_v32 = vadd.f32 %v1277_v44, %v6321_v17  ;;  %v6339_v44 = vadd.f32 %v7666_v62, %v7665_v11  ;;  %v1344_v62 = vrot.slane %v6279_v33, 6 }
 0x479   :  { %v4423_v47 = vmul.f32 -1.442695, %v1284_v32  ;;  %v1283_v49 = vadd.f32 %v1264_v36, %v6339_v44 }
 0x47b   :  { %5182 = vpow2.f32 %v4423_v47  ;;  %v1238_v53 = vpop.f32.mrf.mxu2  ;;  %v1251_v20 = vpop.f32.mrf.mxu3 }
 0x47c   :  { %v1281_v26 = vadd.f32 %v1238_v53, %v6327_v12  ;;  %v1282_v35 = vadd.f32 %v1251_v20, %v6332_v13 }
 0x47e   :  { %v4421_v25 = vmul.f32 -1.442695, %v1281_v26  ;;  %v4422_v58 = vmul.f32 -1.442695, %v1282_v35  ;;  %v1266_v31 = vpop.f32.mrf.mxu0  ;;  %v1279_v4 = vpop.f32.mrf.mxu1 }
 0x480   :  { %5184 = vpow2.f32 %v4421_v25 }
 0x481   :  { %v5183_v54 = vpop.eup %5182  ;;  %5186 = vpow2.f32 %v4422_v58 }
 0x482   :  { %v1327_v8 = vadd.f32 1.0, %v5183_v54 }
 0x483   :  { %v1240_v27 = vpop.f32.mrf.mxu2  ;;  %v1253_v61 = vpop.f32.mrf.mxu3 }
 0x484   :  { %5188 = vrcp.f32 %v1327_v8  ;;  %vm1333_vm4 = vweird.f32 %v1327_v8 }
 0x486   :  { %v5185_v52 = vpop.eup %5184 }
 0x487   :  { %v5187_v48 = vpop.eup %5186  ;;  %v1288_v18 = vadd.f32 1.0, %v5185_v52 }
 0x488   :  { %v1307_v7 = vadd.f32 1.0, %v5187_v48 }
 0x489   :  { %5190 = vrcp.f32 %v1288_v18  ;;  %v1300_v26 = vand.u32 2147483648, %v1288_v18  ;;  %v1298_v58 = vand.u32 2147483647, %v1288_v18  ;;  %vm1294_vm13 = vweird.f32 %v1288_v18 }
 0x48a   :  { %5192 = vrcp.f32 %v1307_v7  ;;  %v5189_v32 = vpop.eup %5188  ;;  %v1319_v31 = vand.u32 2147483648, %v1307_v7  ;;  %v1317_v4 = vand.u32 2147483647, %v1307_v7  ;;  %vm1313_vm15 = vweird.f32 %v1307_v7 }
 0x48b   :  { %v1329_v53 = vmul.f32 %v5189_v32, %v1327_v8  ;;  %5194 = vtanh.f32 %v1283_v49  ;;  %v1301_v36 = vor.u32 1.1754944e-38, %v1300_v26  ;;  %vm1299_vm0 = vcmp.eq.f32.partialorder %v1298_v58, 8.507059e+37 }
 0x48c   :  { %v1320_v48 = vor.u32 1.1754944e-38, %v1319_v31  ;;  %vm1318_vm2 = vcmp.eq.f32.partialorder %v1317_v4, 8.507059e+37  ;;  %vm1334_vm3 = vweird.f32 %v5189_v32  ;;  %v1339_v26 = vand.u32 2147483648, %v1327_v8 }
 0x48d   :  { %v1330_v54 = vsub.f32 1.0, %v1329_v53  ;;  %vm1335_vm5 = vmor %vm1333_vm4, %vm1334_vm3 }
 0x48e   :  { %v1340_v58 = vor.u32 1.1754944e-38, %v1339_v26 }
 0x48f   :  { %v5191_v47 = vpop.eup %5190 }
 0x490   :  { %v5193_v0 = vpop.eup %5192  ;;  %v1290_v45 = vmul.f32 %v5191_v47, %v1288_v18  ;;  %vm1295_vm9 = vweird.f32 %v5191_v47 }
 0x491   :  { %v1309_v63 = vmul.f32 %v5193_v0, %v1307_v7  ;;  %vm1314_vm12 = vweird.f32 %v5193_v0  ;;  %vm1296_vm14 = vmor %vm1294_vm13, %vm1295_vm9  ;;  %v5195_v11 = vpop.eup %5194  ;;  %v1337_v7 = vand.u32 2147483647, %v1327_v8 }
 0x492   :  { %v1291_v20 = vsub.f32 1.0, %v1290_v45  ;;  %vm1315_vm1 = vmor %vm1313_vm15, %vm1314_vm12 }
 0x493   :  { %v1310_v35 = vsub.f32 1.0, %v1309_v63  ;;  %v1331_v63 = vmul.f32 %v5189_v32, %v1330_v54  ;;  %vm1338_vm6 = vcmp.eq.f32.partialorder %v1337_v7, 8.507059e+37 }
 0x494   :  { %v1292_v25 = vmul.f32 %v5191_v47, %v1291_v20 }
 0x495   :  { %v1311_v57 = vmul.f32 %v5193_v0, %v1310_v35  ;;  %v1332_v18 = vadd.f32 %v5189_v32, %v1331_v63 }
 0x496   :  { %v1293_v27 = vadd.f32 %v5191_v47, %v1292_v25 }
 0x497   :  { %v1312_v61 = vadd.f32 %v5193_v0, %v1311_v57 }
 0x498   :  { %v1297_v52 = vsel %vm1296_vm14, %v5191_v47, %v1293_v27  ;;  %v1336_v47 = vsel %vm1335_vm5, %v5189_v32, %v1332_v18 }
 0x499   :  { %v1302_v49 = vsel %vm1299_vm0, %v1301_v36, %v1297_v52  ;;  %v1316_v45 = vsel %vm1315_vm1, %v5193_v0, %v1312_v61  ;;  %v1341_v0 = vsel %vm1338_vm6, %v1340_v58, %v1336_v47 }
 0x49a   :  { %v1347_v20 = vmul.f32 %v5195_v11, %v1302_v49  ;;  %v1321_v35 = vsel %vm1318_vm2, %v1320_v48, %v1316_v45 }
 0x49b   :  { %v1346_v53 = vmul.f32 %v1344_v62, %v1321_v35 }
 0x49d   :  { %v6343_v25 = vadd.f32 %v1347_v20, %v1346_v53 }
 0x49f   :  { %5196 = vtanh.f32 %v6343_v25  ;;  %v1479_v20 = vrot.slane %v6343_v25, 6 }
 0x4a5   :  { %v5197_v33 = vpop.eup %5196 }
 0x4a6   :  { %v6346_v31 = vmul.f32 %v5197_v33, %v1341_v0 }
 0x4a8   :  { %v1351_v57 = vpack.c.bf16 %v6346_v31, %v6346_v31 }
 0x4aa   :  { %1360 = vmatmul.bf16.vlgmr.msra.gmra.mxu2 %v1351_v57  ;;  %1373 = vmatmul.bf16.vlgmr.msra.gmra.mxu3 %v1351_v57 }
 0x4ab   :  { %1386 = vmatmul.bf16.vlgmr.msrb.gmra.mxu0 %v1351_v57  ;;  %1399 = vmatmul.bf16.vlgmr.msrb.gmra.mxu1 %v1351_v57 }
 0x4ac   :  { %1628 = vmatpush.bf16.msra.mxu2 %v5776_v2  ;;  %1641 = vmatpush.bf16.msra.mxu3 %v5778_v3 }
 0x4ad   :  { %1654 = vmatpush.bf16.msrb.mxu0 %v5780_v5  ;;  %1667 = vmatpush.bf16.msrb.mxu1 %v5782_v6 }
 0x4b0   :  { %1629 = vmatpush.bf16.msra.mxu2 %v5797_v10  ;;  %1642 = vmatpush.bf16.msra.mxu3 %v5808_v14 }
 0x4b1   :  { %1655 = vmatpush.bf16.msrb.mxu0 %v5810_v15  ;;  %1668 = vmatpush.bf16.msrb.mxu1 %v5822_v19 }
 0x4b4   :  { %1630 = vmatpush.bf16.msra.mxu2 %v5835_v23  ;;  %1643 = vmatpush.bf16.msra.mxu3 %v5837_v24 }
 0x4b5   :  { %1656 = vmatpush.bf16.msrb.mxu0 %v5849_v28  ;;  %1669 = vmatpush.bf16.msrb.mxu1 %v5854_v30 }
 0x4b8   :  { %1631 = vmatpush.bf16.msra.mxu2 %v5869_v34  ;;  %1644 = vmatpush.bf16.msra.mxu3 %v5880_v38 }
 0x4b9   :  { %1657 = vmatpush.bf16.msrb.mxu0 %v5882_v39  ;;  %1670 = vmatpush.bf16.msrb.mxu1 %v5891_v42 }
 0x4bc   :  { %1632 = vmatpush.bf16.msra.mxu2 %v5905_v46  ;;  %1645 = vmatpush.bf16.msra.mxu3 %v5916_v50 }
 0x4bd   :  { %1658 = vmatpush.bf16.msrb.mxu0 %v5918_v51  ;;  %1671 = vmatpush.bf16.msrb.mxu1 %v5930_v55 }
 0x4c0   :  { %1633 = vmatpush.bf16.msra.mxu2 %v5943_v59  ;;  %1646 = vmatpush.bf16.msra.mxu3 %v5945_v60 }
 0x4c1   :  { %1659 = vmatpush.bf16.msrb.mxu0 %v5957_v1  ;;  %1672 = vmatpush.bf16.msrb.mxu1 %v5968_v9 }
 0x4c4   :  { %1634 = vmatpush.bf16.msra.mxu2 %v5980_v16  ;;  %1647 = vmatpush.bf16.msra.mxu3 %v5993_v21 }
 0x4c5   :  { %1660 = vmatpush.bf16.msrb.mxu0 %v5995_v22  ;;  %1673 = vmatpush.bf16.msrb.mxu1 %v6007_v29 }
 0x4c8   :  { %1635 = vmatpush.bf16.msra.mxu2 %v6025_v37  ;;  %1648 = vmatpush.bf16.msra.mxu3 %v6029_v40 }
 0x4c9   :  { %1661 = vmatpush.bf16.msrb.mxu0 %v6031_v41  ;;  %1674 = vmatpush.bf16.msrb.mxu1 %v6034_v43 }
 0x528   :  { %v1387_v2 = vpop.f32.mrf.mxu0  ;;  %v1400_v3 = vpop.f32.mrf.mxu1 }
 0x529   :  { %v1411_v5 = vrot.slane %v1400_v3, 6  ;;  %v1410_v9 = vrot.slane %v1387_v2, 6 }
 0x52b   :  { %v1419_v6 = vadd.f32 %v1411_v5, %v6321_v17  ;;  %v1418_v22 = vadd.f32 %v1410_v9, %v6339_v44 }
 0x52d   :  { %v4426_v10 = vmul.f32 -1.442695, %v1419_v6  ;;  %v1361_v14 = vpop.f32.mrf.mxu2  ;;  %v1374_v15 = vpop.f32.mrf.mxu3 }
 0x52e   :  { %v1408_v19 = vrot.slane %v1361_v14, 6  ;;  %v1409_v23 = vrot.slane %v1374_v15, 6 }
 0x52f   :  { %5198 = vpow2.f32 %v4426_v10 }
 0x530   :  { %v1416_v24 = vadd.f32 %v1408_v19, %v6327_v12  ;;  %v1417_v28 = vadd.f32 %v1409_v23, %v6332_v13  ;;  %v1389_v30 = vpop.f32.mrf.mxu0  ;;  %v1402_v34 = vpop.f32.mrf.mxu1 }
 0x532   :  { %v4424_v38 = vmul.f32 -1.442695, %v1416_v24  ;;  %v4425_v39 = vmul.f32 -1.442695, %v1417_v28 }
 0x534   :  { %5200 = vpow2.f32 %v4424_v38 }
 0x535   :  { %v5199_v42 = vpop.eup %5198  ;;  %5202 = vpow2.f32 %v4425_v39  ;;  %v1363_v46 = vpop.f32.mrf.mxu2 }
 0x536   :  { %v1376_v50 = vpop.f32.mrf.mxu3  ;;  %v1462_v51 = vadd.f32 1.0, %v5199_v42 }
 0x538   :  { %5204 = vrcp.f32 %v1462_v51  ;;  %v1474_v0 = vand.u32 2147483648, %v1462_v51  ;;  %vm1468_vm3 = vweird.f32 %v1462_v51  ;;  %v1472_v57 = vand.u32 2147483647, %v1462_v51 }
 0x53a   :  { %v5201_v55 = vpop.eup %5200  ;;  %v1475_v3 = vor.u32 1.1754944e-38, %v1474_v0  ;;  %vm1473_vm5 = vcmp.eq.f32.partialorder %v1472_v57, 8.507059e+37 }
 0x53b   :  { %v5203_v59 = vpop.eup %5202  ;;  %v1423_v60 = vadd.f32 1.0, %v5201_v55 }
 0x53c   :  { %v1442_v1 = vadd.f32 1.0, %v5203_v59 }
 0x53d   :  { %5206 = vrcp.f32 %v1423_v60  ;;  %v1435_v8 = vand.u32 2147483648, %v1423_v60  ;;  %v1433_v54 = vand.u32 2147483647, %v1423_v60  ;;  %vm1429_vm12 = vweird.f32 %v1423_v60 }
 0x53e   :  { %5208 = vrcp.f32 %v1442_v1  ;;  %v5205_v16 = vpop.eup %5204  ;;  %v1454_v27 = vand.u32 2147483648, %v1442_v1  ;;  %v1452_v61 = vand.u32 2147483647, %v1442_v1  ;;  %vm1448_vm14 = vweird.f32 %v1442_v1 }
 0x53f   :  { %v1464_v41 = vmul.f32 %v5205_v16, %v1462_v51  ;;  %5210 = vtanh.f32 %v1418_v22  ;;  %v1436_v11 = vor.u32 1.1754944e-38, %v1435_v8  ;;  %vm1434_vm15 = vcmp.eq.f32.partialorder %v1433_v54, 8.507059e+37 }
 0x540   :  { %v1455_v45 = vor.u32 1.1754944e-38, %v1454_v27  ;;  %vm1453_vm1 = vcmp.eq.f32.partialorder %v1452_v61, 8.507059e+37  ;;  %vm1469_vm2 = vweird.f32 %v5205_v16 }
 0x541   :  { %v1465_v52 = vsub.f32 1.0, %v1464_v41  ;;  %vm1470_vm4 = vmor %vm1468_vm3, %vm1469_vm2 }
 0x543   :  { %v5207_v21 = vpop.eup %5206  ;;  %v1466_v26 = vmul.f32 %v5205_v16, %v1465_v52 }
 0x544   :  { %v5209_v29 = vpop.eup %5208  ;;  %v1425_v37 = vmul.f32 %v5207_v21, %v1423_v60  ;;  %vm1430_vm7 = vweird.f32 %v5207_v21 }
 0x545   :  { %v1444_v40 = vmul.f32 %v5209_v29, %v1442_v1  ;;  %vm1449_vm9 = vweird.f32 %v5209_v29  ;;  %vm1431_vm13 = vmor %vm1429_vm12, %vm1430_vm7  ;;  %v5211_v63 = vpop.eup %5210  ;;  %v1467_v33 = vadd.f32 %v5205_v16, %v1466_v26 }
 0x546   :  { %v1426_v43 = vsub.f32 1.0, %v1425_v37  ;;  %vm1450_vm0 = vmor %vm1448_vm14, %vm1449_vm9 }
 0x547   :  { %v1445_v32 = vsub.f32 1.0, %v1444_v40  ;;  %v1471_v2 = vsel %vm1470_vm4, %v5205_v16, %v1467_v33 }
 0x548   :  { %v1427_v4 = vmul.f32 %v5207_v21, %v1426_v43  ;;  %v1476_v5 = vsel %vm1473_vm5, %v1475_v3, %v1471_v2 }
 0x549   :  { %v1446_v36 = vmul.f32 %v5209_v29, %v1445_v32 }
 0x54a   :  { %v1428_v48 = vadd.f32 %v5207_v21, %v1427_v4 }
 0x54b   :  { %v1447_v62 = vadd.f32 %v5209_v29, %v1446_v36 }
 0x54c   :  { %v1432_v49 = vsel %vm1431_vm13, %v5207_v21, %v1428_v48 }
 0x54d   :  { %v1437_v35 = vsel %vm1434_vm15, %v1436_v11, %v1432_v49  ;;  %v1451_v53 = vsel %vm1450_vm0, %v5209_v29, %v1447_v62 }
 0x54e   :  { %v1456_v18 = vsel %vm1453_vm1, %v1455_v45, %v1451_v53  ;;  %v1482_v7 = vmul.f32 %v5211_v63, %v1437_v35 }
 0x54f   :  { %v1481_v47 = vmul.f32 %v1479_v20, %v1456_v18 }
 0x551   :  { %v6387_v58 = vadd.f32 %v1482_v7, %v1481_v47 }
 0x553   :  { %5212 = vtanh.f32 %v6387_v58  ;;  %v1617_v47 = vrot.slane %v6387_v58, 6 }
 0x559   :  { %v5213_v25 = vpop.eup %5212 }
 0x55a   :  { %v6390_v6 = vmul.f32 %v5213_v25, %v1476_v5 }
 0x55c   :  { %v1486_v10 = vpack.c.bf16 %v6390_v6, %v6390_v6 }
 0x55e   :  { %v1488_v14 = vrot.slane %v1486_v10, 1 }
 0x560   :  { %1498 = vmatmul.bf16.vlgmr.msrb.gmra.mxu2 %v1488_v14  ;;  %1511 = vmatmul.bf16.vlgmr.msrb.gmra.mxu3 %v1488_v14 }
 0x561   :  { %1524 = vmatmul.bf16.vlgmr.msra.gmra.mxu0 %v1488_v14  ;;  %1537 = vmatmul.bf16.vlgmr.msra.gmra.mxu1 %v1488_v14 }
 0x5de   :  { %v1525_v15 = vpop.f32.mrf.mxu0  ;;  %v1538_v19 = vpop.f32.mrf.mxu1 }
 0x5df   :  { %v1549_v23 = vrot.slane %v1538_v19, 4  ;;  %v1548_v40 = vrot.slane %v1525_v15, 4 }
 0x5e1   :  { %v1557_v24 = vadd.f32 %v1549_v23, %v6321_v17  ;;  %v1556_v8 = vadd.f32 %v1548_v40, %v6339_v44  ;;  %v5013_v40 = vld [vmem:[%s7611_s8 + $0x44] sm:$0xf0] }
 0x5e3   :  { %v4429_v28 = vmul.f32 -1.442695, %v1557_v24  ;;  %v1499_v30 = vpop.f32.mrf.mxu2  ;;  %v1512_v34 = vpop.f32.mrf.mxu3 }
 0x5e4   :  { %v1546_v38 = vrot.slane %v1499_v30, 4  ;;  %v1547_v39 = vrot.slane %v1512_v34, 4  ;;  %v1768_v30 = vsel %vm1762_vm10, %v6346_v31, %v6390_v6  ;;  %v5003_v31 = vld [vmem:[%s7612_s6 + $0x38] sm:$0xff] }
 0x5e5   :  { %5214 = vpow2.f32 %v4429_v28  ;;  %1842 = vmatpush.bf16.msrb.mxu2 %v5003_v31 }
 0x5e6   :  { %v1554_v42 = vadd.f32 %v1546_v38, %v6327_v12  ;;  %v1555_v46 = vadd.f32 %v1547_v39, %v6332_v13  ;;  %v1527_v50 = vpop.f32.mrf.mxu0  ;;  %v1540_v51 = vpop.f32.mrf.mxu1 }
 0x5e7   :  { %v4519_v50 = vld [vmem:[%s7611_s8 + $0x60] sm:$0xf]  ;;  %v5017_v51 = vld [vmem:[%s7611_s8 + $0x64] sm:$0xf0] }
 0x5e8   :  { %v4427_v55 = vmul.f32 -1.442695, %v1554_v42  ;;  %v4428_v59 = vmul.f32 -1.442695, %v1555_v46  ;;  %v4527_v42 = vld [vmem:[%s7611_s8 + $0x70] sm:$0xf] }
 0x5e9   :  { %v5019_v46 = vld [vmem:[%s7611_s8 + $0x74] sm:$0xf0] }
 0x5ea   :  { %5216 = vpow2.f32 %v4427_v55  ;;  %v4528_v6 = vor.u32 %v5019_v46, %v4527_v42  ;;  %v5002_v55 = vld [vmem:[%s7612_s6 + $0x30] sm:$0xff] }
 0x5eb   :  { %v5215_v60 = vpop.eup %5214  ;;  %5218 = vpow2.f32 %v4428_v59  ;;  %v1501_v1 = vpop.f32.mrf.mxu2  ;;  %v4520_v59 = vor.u32 %v5017_v51, %v4519_v50  ;;  %1843 = vmatpush.bf16.msrb.mxu2 %v5002_v55 }
 0x5ec   :  { %v1514_v9 = vpop.f32.mrf.mxu3  ;;  %v1600_v16 = vadd.f32 1.0, %v5215_v60  ;;  %1964 = vmatpush.bf16.msrb.mxu3 %v4528_v6  ;;  %v4511_v60 = vld [vmem:[%s7611_s8 + $0x50] sm:$0xf]  ;;  %v5015_v1 = vld [vmem:[%s7611_s8 + $0x54] sm:$0xf0] }
 0x5ed   :  { %v5001_v9 = vld [vmem:[%s7612_s6 + $0x28] sm:$0xff] }
 0x5ee   :  { %5220 = vrcp.f32 %v1600_v16  ;;  %v1612_v14 = vand.u32 2147483648, %v1600_v16  ;;  %vm1606_vm2 = vweird.f32 %v1600_v16  ;;  %v1610_v15 = vand.u32 2147483647, %v1600_v16 }
 0x5ef   :  { %1844 = vmatpush.bf16.msrb.mxu2 %v5001_v9 }
 0x5f0   :  { %v5217_v21 = vpop.eup %5216  ;;  %v1613_v23 = vor.u32 1.1754944e-38, %v1612_v14  ;;  %vm1611_vm4 = vcmp.eq.f32.partialorder %v1610_v15, 8.507059e+37  ;;  %1965 = vmatpush.bf16.msrb.mxu3 %v4520_v59  ;;  %v4996_v14 = vld [vmem:[%s7612_s6] sm:$0xff] }
 0x5f1   :  { %v5219_v22 = vpop.eup %5218  ;;  %v1561_v29 = vadd.f32 1.0, %v5217_v21 }
 0x5f2   :  { %v1580_v37 = vadd.f32 1.0, %v5219_v22 }
 0x5f3   :  { %5222 = vrcp.f32 %v1561_v29  ;;  %v1573_v61 = vand.u32 2147483648, %v1561_v29  ;;  %v1571_v11 = vand.u32 2147483647, %v1561_v29  ;;  %vm1567_vm9 = vweird.f32 %v1561_v29 }
 0x5f4   :  { %5224 = vrcp.f32 %v1580_v37  ;;  %v5221_v41 = vpop.eup %5220  ;;  %v1592_v62 = vand.u32 2147483648, %v1580_v37  ;;  %v1590_v45 = vand.u32 2147483647, %v1580_v37  ;;  %vm1586_vm13 = vweird.f32 %v1580_v37 }
 0x5f5   :  { %v1602_v27 = vmul.f32 %v5221_v41, %v1600_v16  ;;  %5226 = vtanh.f32 %v1556_v8  ;;  %v1574_v35 = vor.u32 1.1754944e-38, %v1573_v61  ;;  %vm1572_vm14 = vcmp.eq.f32.partialorder %v1571_v11, 8.507059e+37  ;;  %v4495_v61 = vld [vmem:[%s7611_s8 + $0x30] sm:$0xf]  ;;  %v5009_v11 = vld [vmem:[%s7611_s8 + $0x24] sm:$0xf0] }
 0x5f6   :  { %v1593_v26 = vor.u32 1.1754944e-38, %v1592_v62  ;;  %vm1591_vm0 = vcmp.eq.f32.partialorder %v1590_v45, 8.507059e+37  ;;  %vm1607_vm1 = vweird.f32 %v5221_v41  ;;  %v4512_v16 = vor.u32 %v5015_v1, %v4511_v60  ;;  %v4999_v62 = vld [vmem:[%s7612_s6 + $0x18] sm:$0xff] }
 0x5f7   :  { %v1603_v63 = vsub.f32 1.0, %v1602_v27  ;;  %vm1608_vm3 = vmor %vm1606_vm2, %vm1607_vm1 }
 0x5f8   :  { %1966 = vmatpush.bf16.msrb.mxu3 %v4512_v16 }
 0x5f9   :  { %v5223_v43 = vpop.eup %5222  ;;  %v1604_v2 = vmul.f32 %v5221_v41, %v1603_v63 }
 0x5fa   :  { %v5225_v32 = vpop.eup %5224  ;;  %v1563_v4 = vmul.f32 %v5223_v43, %v1561_v29  ;;  %vm1568_vm6 = vweird.f32 %v5223_v43 }
 0x5fb   :  { %v1582_v54 = vmul.f32 %v5225_v32, %v1580_v37  ;;  %vm1587_vm7 = vweird.f32 %v5225_v32  ;;  %vm1569_vm12 = vmor %vm1567_vm9, %vm1568_vm6  ;;  %v5227_v7 = vpop.eup %5226  ;;  %v1605_v10 = vadd.f32 %v5221_v41, %v1604_v2  ;;  %v4503_v37 = vld [vmem:[%s7611_s8 + $0x40] sm:$0xf] }
 0x5fc   :  { %v1564_v36 = vsub.f32 1.0, %v1563_v4  ;;  %vm1588_vm15 = vmor %vm1586_vm13, %vm1587_vm7  ;;  %v4504_v8 = vor.u32 %v5013_v40, %v4503_v37  ;;  %v4471_v2 = vld [vmem:[%s7611_s8] sm:$0xf] }
 0x5fd   :  { %v1583_v52 = vsub.f32 1.0, %v1582_v54  ;;  %v1609_v19 = vsel %vm1608_vm3, %v5221_v41, %v1605_v10  ;;  %v5000_v41 = vld [vmem:[%s7612_s6 + $0x20] sm:$0xff] }
 0x5fe   :  { %v1565_v48 = vmul.f32 %v5223_v43, %v1564_v36  ;;  %v1614_v24 = vsel %vm1611_vm4, %v1613_v23, %v1609_v19  ;;  %1845 = vmatpush.bf16.msrb.mxu2 %v5000_v41  ;;  %1967 = vmatpush.bf16.msrb.mxu3 %v4504_v8  ;;  %vm2011_vm4 = vcmask 1047556  }
 0x5ff   :  { %v1584_v49 = vmul.f32 %v5225_v32, %v1583_v52  ;;  %v5011_v52 = vld [vmem:[%s7611_s8 + $0x34] sm:$0xf0] }
 0x600   :  { %v1566_v20 = vadd.f32 %v5223_v43, %v1565_v48  ;;  %v4496_v48 = vor.u32 %v5011_v52, %v4495_v61 }
 0x601   :  { %v1585_v53 = vadd.f32 %v5225_v32, %v1584_v49 }
 0x602   :  { %v1570_v18 = vsel %vm1569_vm12, %v5223_v43, %v1566_v20  ;;  %1968 = vmatpush.bf16.msrb.mxu3 %v4496_v48  ;;  %1846 = vmatpush.bf16.msrb.mxu2 %v4999_v62 }
 0x603   :  { %v1575_v33 = vsel %vm1572_vm14, %v1574_v35, %v1570_v18  ;;  %v1589_v0 = vsel %vm1588_vm15, %v5225_v32, %v1585_v53  ;;  %v4479_v53 = vld [vmem:[%s7611_s8 + $0x10] sm:$0xf] }
 0x604   :  { %v1594_v57 = vsel %vm1591_vm0, %v1593_v26, %v1589_v0  ;;  %v1620_v3 = vmul.f32 %v5227_v7, %v1575_v33  ;;  %v4998_v18 = vld [vmem:[%s7612_s6 + $0x10] sm:$0xff] }
 0x605   :  { %v1619_v25 = vmul.f32 %v1617_v47, %v1594_v57  ;;  %v4997_v57 = vld [vmem:[%s7612_s6 + $0x8] sm:$0xff] }
 0x606   :  { %1847 = vmatpush.bf16.msrb.mxu2 %v4998_v18 }
 0x607   :  { %v6399_v5 = vadd.f32 %v1620_v3, %v1619_v25  ;;  %v5005_v3 = vld [vmem:[%s7611_s8 + $0x4] sm:$0xf0] }
 0x608   :  { %v4472_v10 = vor.u32 %v5005_v3, %v4471_v2 }
 0x609   :  { %5228 = vtanh.f32 %v6399_v5 }
 0x60a   :  { %1848 = vmatpush.bf16.msrb.mxu2 %v4997_v57 }
 0x60e   :  { %1849 = vmatpush.bf16.msrb.mxu2 %v4996_v14 }
 0x60f   :  { %v5229_v58 = vpop.eup %5228 }
 0x610   :  { %v1623_v28 = vmul.f32 %v5229_v58, %v1614_v24  ;;  %v6491_v24 = vld [vmem:[%s7613_s1] sm:$0xff] }
 0x612   :  { %v1624_v34 = vpack.c.bf16 %v1623_v28, %v1623_v28  ;;  %v6406_v38 = vsel %vm1764_vm11, %v1768_v30, %v1623_v28 }
 0x614   :  { %v1626_v39 = vrot.slane %v1624_v34, 2 }
 0x616   :  { %1636 = vmatmul.bf16.vlgmr.msra.gmra.mxu2 %v1626_v39  ;;  %1649 = vmatmul.bf16.vlgmr.msra.gmra.mxu3 %v1626_v39 }
 0x617   :  { %1662 = vmatmul.bf16.vlgmr.msrb.gmra.mxu0 %v1626_v39  ;;  %1675 = vmatmul.bf16.vlgmr.msrb.gmra.mxu1 %v1626_v39 }
 0x694   :  { %v6435_v21 = vpop.f32.mrf.mxu0  ;;  %v1676_v22 = vpop.f32.mrf.mxu1 }
 0x695   :  { %v1687_v29 = vrot.slane %v1676_v22, 2  ;;  %v1686_v28 = vrot.slane %v6435_v21, 2 }
 0x697   :  { %v1695_v43 = vadd.f32 %v1687_v29, %v6321_v17  ;;  %v4487_v17 = vld [vmem:[%s7611_s8 + $0x20] sm:$0xf]  ;;  %v1694_v39 = vadd.f32 %v1686_v28, %v6339_v44 }
 0x698   :  { %v4488_v35 = vor.u32 %v5009_v11, %v4487_v17 }
 0x699   :  { %v4432_v32 = vmul.f32 -1.442695, %v1695_v43  ;;  %v1637_v4 = vpop.f32.mrf.mxu2  ;;  %v1650_v54 = vpop.f32.mrf.mxu3  ;;  %v1755_v43 = vrot.slane %v6399_v5, 6 }
 0x69a   :  { %v1684_v27 = vrot.slane %v1637_v4, 2  ;;  %v1685_v36 = vrot.slane %v1650_v54, 2  ;;  %1969 = vmatpush.bf16.msrb.mxu3 %v4488_v35  ;;  %v6510_v35 = vld [vmem:[%s7615_s9] sm:$0x3] }
 0x69b   :  { %5230 = vpow2.f32 %v4432_v32 }
 0x69c   :  { %v1692_v49 = vadd.f32 %v1684_v27, %v6327_v12  ;;  %v1693_v45 = vadd.f32 %v1685_v36, %v6332_v13  ;;  %v1665_v63 = vpop.f32.mrf.mxu0  ;;  %v1678_v20 = vpop.f32.mrf.mxu1  ;;  %v5007_v12 = vld [vmem:[%s7611_s8 + $0x14] sm:$0xf0] }
 0x69d   :  { %v4480_v0 = vor.u32 %v5007_v12, %v4479_v53  ;;  %v1874_v53 = vperm.slane %v6510_v35, 0 }
 0x69e   :  { %v4430_v26 = vmul.f32 -1.442695, %v1692_v49  ;;  %v4431_v7 = vmul.f32 -1.442695, %v1693_v45 }
 0x69f   :  { %1970 = vmatpush.bf16.msrb.mxu3 %v4480_v0 }
 0x6a0   :  { %5232 = vpow2.f32 %v4430_v26 }
 0x6a1   :  { %v5231_v13 = vpop.eup %5230  ;;  %5234 = vpow2.f32 %v4431_v7  ;;  %v1639_v47 = vpop.f32.mrf.mxu2 }
 0x6a2   :  { %v1652_v33 = vpop.f32.mrf.mxu3  ;;  %v6482_v25 = vadd.f32 1.0, %v5231_v13 }
 0x6a3   :  { %1971 = vmatpush.bf16.msrb.mxu3 %v4472_v10  ;;  %v5402_v33 = vmov 1934713408  }
 0x6a4   :  { %5236 = vrcp.f32 %v6482_v25  ;;  %v1750_v48 = vand.u32 2147483648, %v6482_v25  ;;  %vm1744_vm1 = vweird.f32 %v6482_v25  ;;  %v1748_v17 = vand.u32 2147483647, %v6482_v25 }
 0x6a5   :  { %v2014_v0 = vunpack.c.l.s4 %v5402_v33  ;;  %v4473_v33 = vld [vmem:[%s7611_s8 + $0x8] sm:$0xf0] }
 0x6a6   :  { %v5233_v15 = vpop.eup %5232  ;;  %1972 = vmatmul.bf16.vlgmr.msrb.gmra.mxu3 %v6491_v24  ;;  %v1751_v5 = vor.u32 1.1754944e-38, %v1750_v48  ;;  %vm1749_vm3 = vcmp.eq.f32.partialorder %v1748_v17, 8.507059e+37  ;;  %v5010_v17 = vld [vmem:[%s7611_s8 + $0x34] sm:$0xf] }
 0x6a7   :  { %v5235_v19 = vpop.eup %5234  ;;  %v1699_v23 = vadd.f32 1.0, %v5233_v15  ;;  %v6516_v3 = vunpack.c.0.s8 %v2014_v0 }
 0x6a8   :  { %v1718_v58 = vadd.f32 1.0, %v5235_v19 }
 0x6a9   :  { %5238 = vrcp.f32 %v1699_v23  ;;  %v1711_v51 = vand.u32 2147483648, %v1699_v23  ;;  %v1709_v60 = vand.u32 2147483647, %v1699_v23  ;;  %vm1705_vm7 = vweird.f32 %v1699_v23 }
 0x6aa   :  { %5240 = vrcp.f32 %v1718_v58  ;;  %v5237_v30 = vpop.eup %5236  ;;  %v1730_v1 = vand.u32 2147483648, %v1718_v58  ;;  %v1728_v16 = vand.u32 2147483647, %v1718_v58  ;;  %vm1724_vm12 = vweird.f32 %v1718_v58 }
 0x6ab   :  { %v1740_v6 = vmul.f32 %v5237_v30, %v6482_v25  ;;  %5242 = vtanh.f32 %v1694_v39  ;;  %v1712_v44 = vor.u32 1.1754944e-38, %v1711_v51  ;;  %vm1710_vm13 = vcmp.eq.f32.partialorder %v1709_v60, 8.507059e+37 }
 0x6ac   :  { %v1731_v40 = vor.u32 1.1754944e-38, %v1730_v1  ;;  %vm1729_vm15 = vcmp.eq.f32.partialorder %v1728_v16, 8.507059e+37  ;;  %vm1745_vm0 = vweird.f32 %v5237_v30 }
 0x6ad   :  { %v1741_v21 = vsub.f32 1.0, %v1740_v6  ;;  %vm1746_vm2 = vmor %vm1744_vm1, %vm1745_vm0 }
 0x6af   :  { %v5239_v34 = vpop.eup %5238  ;;  %v1742_v4 = vmul.f32 %v5237_v30, %v1741_v21 }
 0x6b0   :  { %v5241_v42 = vpop.eup %5240  ;;  %v1701_v46 = vmul.f32 %v5239_v34, %v1699_v23  ;;  %vm1706_vm5 = vweird.f32 %v5239_v34 }
 0x6b1   :  { %v1720_v31 = vmul.f32 %v5241_v42, %v1718_v58  ;;  %vm1725_vm6 = vweird.f32 %v5241_v42  ;;  %vm1707_vm9 = vmor %vm1705_vm7, %vm1706_vm5  ;;  %v5243_v41 = vpop.eup %5242  ;;  %v1743_v52 = vadd.f32 %v5237_v30, %v1742_v4  ;;  %vm2100_vm5 = vcmask 64512  }
 0x6b2   :  { %v1702_v50 = vsub.f32 1.0, %v1701_v46  ;;  %vm1726_vm14 = vmor %vm1724_vm12, %vm1725_vm6 }
 0x6b3   :  { %v1721_v55 = vsub.f32 1.0, %v1720_v31  ;;  %v1747_v11 = vsel %vm1746_vm2, %v5237_v30, %v1743_v52  ;;  %v4505_v52 = vld [vmem:[%s7611_s8 + $0x48] sm:$0xf0] }
 0x6b4   :  { %v1703_v59 = vmul.f32 %v5239_v34, %v1702_v50  ;;  %v1752_v49 = vsel %vm1749_vm3, %v1751_v5, %v1747_v11  ;;  %v4497_v11 = vld [vmem:[%s7611_s8 + $0x38] sm:$0xf0] }
 0x6b5   :  { %v1722_v9 = vmul.f32 %v5241_v42, %v1721_v55 }
 0x6b6   :  { %v1704_v22 = vadd.f32 %v5239_v34, %v1703_v59 }
 0x6b7   :  { %v1723_v29 = vadd.f32 %v5241_v42, %v1722_v9 }
 0x6b8   :  { %v1708_v37 = vsel %vm1707_vm9, %v5239_v34, %v1704_v22 }
 0x6b9   :  { %v1713_v8 = vsel %vm1710_vm13, %v1712_v44, %v1708_v37  ;;  %v1727_v32 = vsel %vm1726_vm14, %v5241_v42, %v1723_v29 }
 0x6ba   :  { %v1758_v54 = vmul.f32 %v5243_v41, %v1713_v8  ;;  %v1732_v27 = vsel %vm1729_vm15, %v1731_v40, %v1727_v32  ;;  %v5018_v40 = vld [vmem:[%s7611_s8 + $0x74] sm:$0xf]  ;;  %v4529_v41 = vld [vmem:[%s7611_s8 + $0x78] sm:$0xf0]  ;;  %v4521_v32 = vld [vmem:[%s7611_s8 + $0x68] sm:$0xf0] }
 0x6bb   :  { %v1757_v36 = vmul.f32 %v1755_v43, %v1732_v27  ;;  %v5016_v43 = vld [vmem:[%s7611_s8 + $0x64] sm:$0xf]  ;;  %v4532_v8 = vor.u32 %v5018_v40, %v4529_v41  ;;  %v4513_v27 = vld [vmem:[%s7611_s8 + $0x58] sm:$0xf0]  ;;  %v5025_v40 = vld [vmem:[%s7616_s10 + $0x28] sm:$0xff] }
 0x6bc   :  { %v4524_v4 = vor.u32 %v5016_v43, %v4521_v32  ;;  %v5024_v41 = vld [vmem:[%s7616_s10 + $0x20] sm:$0xff]  ;;  %v5023_v43 = vld [vmem:[%s7616_s10 + $0x18] sm:$0xff]  ;;  %v5021_v32 = vld [vmem:[%s7616_s10 + $0x8] sm:$0xff] }
 0x6bd   :  { %v1759_v61 = vadd.f32 %v1758_v54, %v1757_v36  ;;  %1978 = vmatpush.bf16.msra.mxu0 %v4532_v8  ;;  %v5014_v54 = vld [vmem:[%s7611_s8 + $0x54] sm:$0xf] }
 0x6be   :  { %v4516_v36 = vor.u32 %v5014_v54, %v4513_v27  ;;  %v5022_v8 = vld [vmem:[%s7616_s10 + $0x10] sm:$0xff]  ;;  %v5403_v54 = vmov 1983009808  }
 0x6bf   :  { %5244 = vtanh.f32 %v1759_v61  ;;  %v5012_v61 = vld [vmem:[%s7611_s8 + $0x44] sm:$0xf]  ;;  %v2166_v27 = vunpack.c.l.s4 %v5403_v54  ;;  %v4671_v54 = vld [vmem:[%s7618_s14 + $0xd0] sm:$0xf0] }
 0x6c0   :  { %v4508_v48 = vor.u32 %v5012_v61, %v4505_v52 }
 0x6c1   :  { %1979 = vmatpush.bf16.msra.mxu0 %v4524_v4  ;;  %v5020_v4 = vld [vmem:[%s7616_s10] sm:$0xff] }
 0x6c5   :  { %v5245_v62 = vpop.eup %5244  ;;  %1980 = vmatpush.bf16.msra.mxu0 %v4516_v36  ;;  %v2167_v36 = vunpack.c.0.s8 %v2166_v27 }
 0x6c6   :  { %v1761_v45 = vmul.f32 %v5245_v62, %v1752_v49  ;;  %v4500_v62 = vor.u32 %v5010_v17, %v4497_v11 }
 0x6c8   :  { %v6503_v63 = vsel %vm1766_vm8, %v6406_v38, %v1761_v45  ;;  %v5114_v38 = vld [vmem:[%s7614_s7] ss:$0 sm:$0xff]  ;;  %v5008_v45 = vld [vmem:[%s7611_s8 + $0x24] sm:$0xf] }
 0x6c9   :  { %v1773_v20 = vpack.c.bf16 %v6503_v63, %v6284_v56  ;;  %1981 = vmatpush.bf16.msra.mxu0 %v4508_v48 }
 0x6cb   :  { %1850 = vmatmul.bf16.vlgmr.msrb.gmra.mxu2 %v1773_v20  ;;  %v4489_v20 = vld [vmem:[%s7611_s8 + $0x28] sm:$0xf0] }
 0x6cd   :  { %1982 = vmatpush.bf16.msra.mxu0 %v4500_v62 }
 0x729   :  { %v1973_v18 = vpop.f32.mrf.mxu3 }
 0x72a   :  { %v1974_v26 = vadd.f32 %v1973_v18, %v1874_v53  ;;  %v4492_v18 = vor.u32 %v5008_v45, %v4489_v20 }
 0x72c   :  { %v1992_v7 = vpack.c.bf16 %v1974_v26, %v1974_v26  ;;  %v5006_v26 = vld [vmem:[%s7611_s8 + $0x14] sm:$0xf]  ;;  %1983 = vmatpush.bf16.msra.mxu0 %v4492_v18 }
 0x72e   :  { %2079 = vmatpush.bf16.xpose.msra.mxu1 %v1992_v7  ;;  %v4481_v7 = vld [vmem:[%s7611_s8 + $0x18] sm:$0xf0] }
 0x731   :  { %v1975_v12 = vpop.f32.mrf.mxu3 }
 0x732   :  { %v1976_v13 = vadd.f32 %v1975_v12, %v1874_v53 }
 0x734   :  { %v1993_v47 = vpack.c.bf16 %v1976_v13, %v1976_v13  ;;  %v4484_v13 = vor.u32 %v5006_v26, %v4481_v7 }
 0x736   :  { %2092 = vmatpush.bf16.xpose.msra.mxu2 %v1993_v47  ;;  %1984 = vmatpush.bf16.msra.mxu0 %v4484_v13 }
 0x74e   :  { %v1851_v57 = vpop.f32.mrf.mxu2 }
 0x74f   :  { %v1852_v2 = vadd.f32 %v5114_v38, %v1851_v57 }
 0x751   :  { %v1999_v25 = vrot.slane %v1852_v2, 4  ;;  %v4533_v10 = vrot.slane %v1852_v2, 6  ;;  %v4534_v14 = vrot.slane %v1852_v2, 10 }
 0x753   :  { %v2012_v15 = vsel %vm2011_vm4, %v4533_v10, %v1852_v2  ;;  %v2020_v19 = vsel %vm2011_vm4, %v4534_v14, %v1999_v25 }
 0x754   :  { %v2016_v23 = vperm.slane %v2012_v15, %v6516_v3  ;;  %v2024_v58 = vperm.slane %v2020_v19, %v6516_v3 }
 0x756   :  { %v2017_v28 = vrot.slane %v2016_v23, 4  ;;  %v2025_v30 = vrot.slane %v2024_v58, 4  ;;  %2051 = vst [vmem:[#allocation1] ss:$4 sm:$0xff] %v2016_v23  ;;  %v1853_v34 = vpop.f32.mrf.mxu2 }
 0x757   :  { %2053 = vst [vmem:[#allocation1 + $0x1] ss:$4 sm:$0xff] %v2024_v58  ;;  %v1854_v39 = vadd.f32 %v5114_v38, %v1853_v34  ;;  %v5004_v38 = vld [vmem:[%s7611_s8 + $0x4] sm:$0xf] }
 0x758   :  { %v2018_v42 = vsel %vm2011_vm4, 0.0, %v2017_v28  ;;  %v2026_v46 = vsel %vm2011_vm4, 0.0, %v2025_v30  ;;  %v4476_v2 = vor.u32 %v5004_v38, %v4473_v33 }
 0x759   :  { %2060 = vst [vmem:[#allocation1 + $0x20] ss:$4 sm:$0xff] %v2018_v42  ;;  %v2002_v31 = vrot.slane %v1854_v39, 4  ;;  %v4535_v6 = vrot.slane %v1854_v39, 6  ;;  %v4536_v50 = vrot.slane %v1854_v39, 10  ;;  %v1875_v42 = vperm.slane %v6510_v35, 1 }
 0x75a   :  { %2062 = vst [vmem:[#allocation1 + $0x21] ss:$4 sm:$0xff] %v2026_v46  ;;  %1985 = vmatpush.bf16.msra.mxu0 %v4476_v2 }
 0x75b   :  { %v2028_v51 = vsel %vm2011_vm4, %v4535_v6, %v1854_v39  ;;  %v2036_v55 = vsel %vm2011_vm4, %v4536_v50, %v2002_v31 }
 0x75c   :  { %v2032_v59 = vperm.slane %v2028_v51, %v6516_v3  ;;  %v2040_v60 = vperm.slane %v2036_v55, %v6516_v3 }
 0x75d   :  { %1986 = vmatmul.bf16.vlgmr.msra.gmra.mxu0 %v6491_v24 }
 0x75e   :  { %v2033_v1 = vrot.slane %v2032_v59, 4  ;;  %v2041_v9 = vrot.slane %v2040_v60, 4  ;;  %2055 = vst [vmem:[#allocation1 + $0x2] ss:$4 sm:$0xff] %v2032_v59 }
 0x75f   :  { %2057 = vst [vmem:[#allocation1 + $0x3] ss:$4 sm:$0xff] %v2040_v60  ;;  %v5027_v60 = vld [vmem:[%s7616_s10 + $0x38] sm:$0xff] }
 0x760   :  { %v2034_v16 = vsel %vm2011_vm4, 0.0, %v2033_v1  ;;  %v2042_v21 = vsel %vm2011_vm4, 0.0, %v2041_v9  ;;  %2311 = vmatpush.bf16.msrb.mxu2 %v5027_v60 }
 0x761   :  { %2064 = vst [vmem:[#allocation1 + $0x22] ss:$4 sm:$0xff] %v2034_v16 }
 0x762   :  { %2066 = vst [vmem:[#allocation1 + $0x23] ss:$4 sm:$0xff] %v2042_v21 }
 0x766   :  { %v2058_v22 = vld.sshfl [vmem:[#allocation1] sm:$0xff pattern:$0x73625140] }
 0x767   :  { %v2070_v44 = vpack.c.bf16 %v2058_v22, %v2058_v22 }
 0x769   :  { %2080 = vmatmul.bf16.vlgmr.msra.gmra.mxu1 %v2070_v44  ;;  %v2067_v29 = vld.sshfl [vmem:[#allocation1 + $0x20] sm:$0xff pattern:$0x73625140] }
 0x76a   :  { %v2071_v37 = vpack.c.bf16 %v2067_v29, %v2067_v29 }
 0x76c   :  { %2093 = vmatmul.bf16.vlgmr.msra.gmra.mxu2 %v2071_v37  ;;  %v5026_v37 = vld [vmem:[%s7616_s10 + $0x30] sm:$0xff] }
 0x76d   :  { %2312 = vmatpush.bf16.msrb.mxu2 %v5026_v37 }
 0x771   :  { %2313 = vmatpush.bf16.msrb.mxu2 %v5025_v40  ;;  %v5057_v40 = vld [vmem:[%s7618_s14 + $0xec] sm:$0xf] }
 0x775   :  { %2314 = vmatpush.bf16.msrb.mxu2 %v5024_v41  ;;  %v4695_v41 = vld [vmem:[%s7618_s14 + $0xf8] sm:$0xf0] }
 0x779   :  { %2315 = vmatpush.bf16.msrb.mxu2 %v5023_v43  ;;  %v4669_v43 = vld [vmem:[%s7618_s14 + $0xc0] sm:$0xf] }
 0x77d   :  { %2316 = vmatpush.bf16.msrb.mxu2 %v5022_v8  ;;  %v4698_v8 = vor.u32 %v5057_v40, %v4695_v41  ;;  %v5036_v40 = vld [vmem:[%s7618_s14 + $0x44] sm:$0xf] }
 0x781   :  { %2317 = vmatpush.bf16.msrb.mxu2 %v5021_v32  ;;  %v5054_v32 = vld [vmem:[%s7618_s14 + $0xcc] sm:$0xf0] }
 0x782   :  { %v4670_v27 = vor.u32 %v5054_v32, %v4669_v43  ;;  %v4607_v43 = vld [vmem:[%s7618_s14 + $0x50] sm:$0xf0]  ;;  %v5039_v32 = vld [vmem:[%s7618_s14 + $0x54] sm:$0xf0] }
 0x785   :  { %2318 = vmatpush.bf16.msrb.mxu2 %v5020_v4  ;;  %v5052_v4 = vld [vmem:[%s7618_s14 + $0xc4] sm:$0xf] }
 0x789   :  { %2631 = vmatpush.bf16.msra.mxu2 %v4698_v8  ;;  %v4613_v8 = vld [vmem:[%s7618_s14 + $0x48] sm:$0xf] }
 0x7da   :  { %v1987_v46 = vpop.f32.mrf.mxu0 }
 0x7db   :  { %v1988_v24 = vadd.f32 %v1987_v46, %v1875_v42 }
 0x7dd   :  { %v1994_v31 = vpack.c.bf16 %v1988_v24, %v1988_v24 }
 0x7df   :  { %v2129_v6 = vsel %vm1764_vm11, %v1994_v31, 0 }
 0x7e0   :  { %2138 = vmatpush.bf16.msra.mxu3 %v2129_v6 }
 0x7e2   :  { %v1989_v50 = vpop.f32.mrf.mxu0 }
 0x7e3   :  { %v1990_v51 = vadd.f32 %v1989_v50, %v1875_v42 }
 0x7e5   :  { %v1995_v55 = vpack.c.bf16 %v1990_v51, %v1990_v51 }
 0x7e6   :  { %v2081_v5 = vpop.f32.mrf.mxu1 }
 0x7e7   :  { %v2098_v49 = vmul.f32 0.088388346, %v2081_v5  ;;  %v2148_v59 = vsel %vm1764_vm11, %v1995_v55, 0 }
 0x7e8   :  { %2157 = vmatpush.bf16.msrb.mxu1 %v2148_v59  ;;  %v5404_v59 = vmov 128.0  }
 0x7e9   :  { %v2101_v53 = vsel %vm2100_vm5, %v2098_v49, -inf }
 0x7ea   :  { %2102 = vmax.xlane.f32.xlu1 %v2101_v53 }
 0x7ee   :  { %v2083_v12 = vpop.f32.mrf.mxu1 }
 0x7ef   :  { %v2094_v47 = vpop.f32.mrf.mxu2 }
 0x7f0   :  { %v2099_v0 = vmul.f32 0.088388346, %v2094_v47 }
 0x7f2   :  { %v2104_v57 = vsel %vm2100_vm5, %v2099_v0, -inf }
 0x7f3   :  { %2105 = vmax.xlane.f32.xlu1 %v2104_v57 }
 0x7f7   :  { %v2096_v25 = vpop.f32.mrf.mxu2 }
 0x85d   :  { %v2103_v10 = vpop.xlane.xlu1 %2102 }
 0x85e   :  { %v2107_v14 = vsub.f32 %v2098_v49, %v2103_v10 }
 0x860   :  { %v2109_v15 = vmul.f32 1.442695, %v2107_v14 }
 0x862   :  { %5246 = vpow2.f32 %v2109_v15 }
 0x866   :  { %v2106_v19 = vpop.xlane.xlu1 %2105 }
 0x867   :  { %v2108_v23 = vsub.f32 %v2099_v0, %v2106_v19 }
 0x868   :  { %v5247_v58 = vpop.eup %5246 }
 0x869   :  { %v2111_v28 = vmul.f32 1.442695, %v2108_v23  ;;  %v2113_v30 = vsel %vm2100_vm5, %v5247_v58, 0.0 }
 0x86a   :  { %2114 = vadd.xlane.f32.xlu2 %v2113_v30 }
 0x86b   :  { %5248 = vpow2.f32 %v2111_v28 }
 0x871   :  { %v5249_v34 = vpop.eup %5248 }
 0x872   :  { %v2116_v39 = vsel %vm2100_vm5, %v5249_v34, 0.0 }
 0x873   :  { %2117 = vadd.xlane.f32.xlu2 %v2116_v39 }
 0x8dd   :  { %v2115_v1 = vpop.xlane.xlu2 %2114 }
 0x8de   :  { %5250 = vrcp.f32 %v2115_v1 }
 0x8e4   :  { %v5251_v35 = vpop.eup %5250 }
 0x8e5   :  { %v2121_v9 = vmul.f32 %v5251_v35, %v5247_v58 }
 0x8e6   :  { %v2118_v16 = vpop.xlane.xlu2 %2117 }
 0x8e7   :  { %v2123_v21 = vpack.c.bf16 %v2121_v9, %v2121_v9  ;;  %5252 = vrcp.f32 %v2118_v16  ;;  %v4685_v9 = vld [vmem:[%s7618_s14 + $0xe0] sm:$0xf]  ;;  %v5058_v16 = vld [vmem:[%s7618_s14 + $0xec] sm:$0xf0] }
 0x8e8   :  { %5254 = vrcp.f32 %v5404_v59  ;;  %v5042_v59 = vld [vmem:[%s7618_s14 + $0x6c] sm:$0xf0] }
 0x8e9   :  { %4537 = vmatmul.msk.bf16.vlgmr.msra.gmra.mxu3 %vm2100_vm5, %v2123_v21  ;;  %v4686_v21 = vor.u32 %v5058_v16, %v4685_v9  ;;  %v4629_v9 = vld [vmem:[%s7618_s14 + $0x68] sm:$0xf]  ;;  %v5043_v16 = vld [vmem:[%s7618_s14 + $0x74] sm:$0xf0] }
 0x8eb   :  { %2589 = vmatpush.bf16.msrb.mxu3 %v4686_v21  ;;  %v4630_v21 = vor.u32 %v5043_v16, %v4629_v9  ;;  %v5087_v16 = vld [vmem:[%s7621_s15 + $0xd4] sm:$0xf0] }
 0x8ed   :  { %v5253_v22 = vpop.eup %5252 }
 0x8ee   :  { %v2122_v44 = vmul.f32 %v5253_v22, %v5249_v34  ;;  %v5255_v60 = vpop.eup %5254  ;;  %v4693_v22 = vld [vmem:[%s7618_s14 + $0xe8] sm:$0xf] }
 0x8ef   :  { %v2332_v1 = vmul.f32 128.0, %v5255_v60  ;;  %2590 = vmatpush.bf16.msrb.mxu3 %v4670_v27  ;;  %vm2336_vm6 = vweird.f32 %v5255_v60  ;;  %v5037_v27 = vld [vmem:[%s7618_s14 + $0x4c] sm:$0xf] }
 0x8f0   :  { %v2124_v29 = vpack.c.bf16 %v2122_v44, %v2122_v44  ;;  %v5059_v44 = vld [vmem:[%s7618_s14 + $0xf4] sm:$0xf0] }
 0x8f1   :  { %v2333_v35 = vsub.f32 1.0, %v2332_v1  ;;  %v4694_v37 = vor.u32 %v5059_v44, %v4693_v22  ;;  %v4631_v22 = vld [vmem:[%s7618_s14 + $0x78] sm:$0xf0] }
 0x8f2   :  { %4538 = vmatmul.msk.bf16.vlgmr.msrb.gmra.mxu1 %vm2100_vm5, %v2124_v29 }
 0x8f3   :  { %2617 = vmatpush.bf16.msra.mxu1 %v4694_v37  ;;  %v5038_v37 = vld [vmem:[%s7618_s14 + $0x4c] sm:$0xf0] }
 0x96c   :  { %v2140_v61 = vpop.f32.mrf.mxu3 }
 0x96d   :  { %v2163_v52 = vrot.slane %v2140_v61, 4  ;;  %v2168_v48 = vperm.slane %v2140_v61, %v2167_v36  ;;  %v4677_v61 = vld [vmem:[%s7618_s14 + $0xc8] sm:$0xf] }
 0x96f   :  { %v2164_v17 = vsel %vm2011_vm4, 0.0, %v2163_v52  ;;  %v2185_v11 = vrot.slane %v2168_v48, 4  ;;  %v2159_v5 = vpop.f32.mrf.mxu1  ;;  %v5055_v52 = vld [vmem:[%s7618_s14 + $0xd4] sm:$0xf0] }
 0x970   :  { %v2172_v62 = vperm.slane %v2164_v17, %v2167_v36  ;;  %v2173_v49 = vrot.slane %v2159_v5, 4  ;;  %v2178_v45 = vperm.slane %v2159_v5, %v2167_v36  ;;  %v4678_v17 = vor.u32 %v5055_v52, %v4677_v61  ;;  %v4589_v52 = vld [vmem:[%s7618_s14 + $0x20] sm:$0xf] }
 0x972   :  { %v2197_v20 = vrot.slane %v2172_v62, 4  ;;  %v2174_v53 = vsel %vm2011_vm4, 0.0, %v2173_v49  ;;  %v2183_v18 = vrot.slane %v2178_v45, 4  ;;  %v2186_v26 = vsel %vm2011_vm4, %v2178_v45, %v2185_v11  ;;  %v4679_v11 = vld [vmem:[%s7618_s14 + $0xd8] sm:$0xf0]  ;;  %2618 = vmatpush.bf16.msra.mxu1 %v4678_v17 }
 0x973   :  { %v2182_v7 = vperm.slane %v2174_v53, %v2167_v36  ;;  %v2194_v12 = vperm.slane %v2186_v26, %v6516_v3  ;;  %v4674_v36 = vor.u32 %v5052_v4, %v4671_v54  ;;  %v4610_v4 = vor.u32 %v5036_v40, %v4607_v43  ;;  %v5032_v17 = vld [vmem:[%s7618_s14 + $0x24] sm:$0xf]  ;;  %v4789_v43 = vld [vmem:[%s7621_s15 + $0xa8] sm:$0xf] }
 0x974   :  { %v2184_v13 = vsel %vm2011_vm4, %v2183_v18, %v2168_v48  ;;  %v2142_v47 = vpop.f32.mrf.mxu3  ;;  %v5053_v48 = vld [vmem:[%s7618_s14 + $0xcc] sm:$0xf]  ;;  %v4614_v54 = vor.u32 %v5039_v32, %v4613_v8  ;;  %v5083_v8 = vld [vmem:[%s7621_s15 + $0xb4] sm:$0xf0] }
 0x975   :  { %v2190_v38 = vperm.slane %v2184_v13, %v6516_v3  ;;  %v2195_v33 = vrot.slane %v2182_v7, 4  ;;  %v2198_v0 = vsel %vm2011_vm4, %v2182_v7, %v2197_v20  ;;  %v2209_v57 = vrot.slane %v2194_v12, 4  ;;  %2227 = vst [vmem:[#allocation1 + $0x2] ss:$4 sm:$0xff] %v2194_v12 }
 0x976   :  { %v2206_v2 = vperm.slane %v2198_v0, %v6516_v3  ;;  %v4682_v5 = vor.u32 %v5053_v48, %v4679_v11  ;;  %v5048_v0 = vld [vmem:[%s7618_s14 + $0xa4] sm:$0xf]  ;;  %v5034_v48 = vld [vmem:[%s7618_s14 + $0x2c] sm:$0xf0] }
 0x977   :  { %v2196_v25 = vsel %vm2011_vm4, %v2195_v33, %v2172_v62  ;;  %v2207_v10 = vrot.slane %v2190_v38, 4  ;;  %v2210_v14 = vsel %vm2011_vm4, 0.0, %v2209_v57  ;;  %2223 = vst [vmem:[#allocation1] ss:$4 sm:$0xff] %v2190_v38  ;;  %v2161_v15 = vpop.f32.mrf.mxu1  ;;  %v2334_v62 = vmul.f32 %v5255_v60, %v2333_v35  ;;  %v4653_v38 = vld [vmem:[%s7618_s14 + $0xa0] sm:$0xf] }
 0x978   :  { %v2202_v19 = vperm.slane %v2196_v25, %v6516_v3  ;;  %v2213_v23 = vrot.slane %v2206_v2, 4  ;;  %2229 = vst [vmem:[#allocation1 + $0x3] ss:$4 sm:$0xff] %v2210_v14  ;;  %v5115_v3 = vld [vmem:[%s7617_s11] ss:$0 sm:$0xff]  ;;  %2632 = vmatpush.bf16.msra.mxu2 %v4682_v5  ;;  %v4590_v11 = vor.u32 %v5034_v48, %v4589_v52 }
 0x979   :  { %v2208_v58 = vsel %vm2011_vm4, 0.0, %v2207_v10  ;;  %2235 = vst [vmem:[#allocation1 + $0x22] ss:$4 sm:$0xff] %v2206_v2  ;;  %v2335_v49 = vadd.f32 %v5255_v60, %v2334_v62  ;;  %v5050_v33 = vld [vmem:[%s7618_s14 + $0xac] sm:$0xf0] }
 0x97a   :  { %v2211_v28 = vrot.slane %v2202_v19, 4  ;;  %v2214_v30 = vsel %vm2011_vm4, 0.0, %v2213_v23  ;;  %2225 = vst [vmem:[#allocation1 + $0x1] ss:$4 sm:$0xff] %v2208_v58  ;;  %v4654_v57 = vor.u32 %v5050_v33, %v4653_v38  ;;  %v4655_v2 = vld [vmem:[%s7618_s14 + $0xb0] sm:$0xf0] }
 0x97b   :  { %2231 = vst [vmem:[#allocation1 + $0x20] ss:$4 sm:$0xff] %v2202_v19  ;;  %v6679_v45 = vsel %vm2336_vm6, %v5255_v60, %v2335_v49  ;;  %v4661_v25 = vld [vmem:[%s7618_s14 + $0xa8] sm:$0xf]  ;;  %v5051_v10 = vld [vmem:[%s7618_s14 + $0xb4] sm:$0xf0]  ;;  %v4658_v14 = vor.u32 %v5048_v0, %v4655_v2 }
 0x97c   :  { %v2212_v34 = vsel %vm2011_vm4, 0.0, %v2211_v28  ;;  %2237 = vst [vmem:[#allocation1 + $0x23] ss:$4 sm:$0xff] %v2214_v30  ;;  %v4662_v15 = vor.u32 %v5051_v10, %v4661_v25  ;;  %v5049_v19 = vld [vmem:[%s7618_s14 + $0xac] sm:$0xf]  ;;  %2591 = vmatpush.bf16.msrb.mxu3 %v4654_v57 }
 0x97d   :  { %2233 = vst [vmem:[#allocation1 + $0x21] ss:$4 sm:$0xff] %v2212_v34  ;;  %v4663_v23 = vld [vmem:[%s7618_s14 + $0xb8] sm:$0xf0]  ;;  %v4637_v28 = vld [vmem:[%s7618_s14 + $0x80] sm:$0xf] }
 0x97e   :  { %v4666_v58 = vor.u32 %v5049_v19, %v4663_v23  ;;  %2619 = vmatpush.bf16.msra.mxu1 %v4662_v15  ;;  %v5046_v30 = vld [vmem:[%s7618_s14 + $0x8c] sm:$0xf0]  ;;  %v5044_v34 = vld [vmem:[%s7618_s14 + $0x84] sm:$0xf]  ;;  %v4623_v35 = vld [vmem:[%s7618_s14 + $0x70] sm:$0xf0] }
 0x97f   :  { %v5040_v60 = vld [vmem:[%s7618_s14 + $0x64] sm:$0xf]  ;;  %v4591_v5 = vld [vmem:[%s7618_s14 + $0x30] sm:$0xf0]  ;;  %v4597_v62 = vld [vmem:[%s7618_s14 + $0x28] sm:$0xf] }
 0x980   :  { %2633 = vmatpush.bf16.msra.mxu2 %v4666_v58  ;;  %v5035_v49 = vld [vmem:[%s7618_s14 + $0x34] sm:$0xf0]  ;;  %v5030_v38 = vld [vmem:[%s7618_s14 + $0xc] sm:$0xf0]  ;;  %v5028_v33 = vld [vmem:[%s7618_s14 + $0x4] sm:$0xf] }
 0x981   :  { %v2238_v39 = vld.sshfl [vmem:[#allocation1] sm:$0xff pattern:$0x73625140]  ;;  %v4575_v57 = vld [vmem:[%s7618_s14 + $0x10] sm:$0xf0] }
 0x982   :  { %v4581_v2 = vld [vmem:[%s7618_s14 + $0x8] sm:$0xf]  ;;  %v5031_v25 = vld [vmem:[%s7618_s14 + $0x14] sm:$0xf0]  ;;  %v4578_v10 = vor.u32 %v5028_v33, %v4575_v57  ;;  %v5029_v15 = vld [vmem:[%s7618_s14 + $0xc] sm:$0xf] }
 0x983   :  { %v4583_v19 = vld [vmem:[%s7618_s14 + $0x18] sm:$0xf0]  ;;  %v4813_v23 = vld [vmem:[%s7621_s15 + $0xe0] sm:$0xf]  ;;  %v5072_v57 = vld [vmem:[%s7621_s15 + $0x64] sm:$0xf] }
 0x984   :  { %v2239_v42 = vld.sshfl [vmem:[#allocation1 + $0x20] sm:$0xff pattern:$0x73625140]  ;;  %v4586_v58 = vor.u32 %v5029_v15, %v4583_v19 }
 0x985   :  { %v2242_v46 = vpack.c.bf16 %v2239_v42, %v2238_v39  ;;  %v4638_v39 = vor.u32 %v5046_v30, %v4637_v28  ;;  %v4639_v42 = vld [vmem:[%s7618_s14 + $0x90] sm:$0xf0]  ;;  %v5090_v28 = vld [vmem:[%s7621_s15 + $0xec] sm:$0xf0]  ;;  %v5088_v30 = vld [vmem:[%s7621_s15 + $0xe4] sm:$0xf] }
 0x986   :  { %v4749_v33 = vld [vmem:[%s7621_s15 + $0x60] sm:$0xf] }
 0x987   :  { %2319 = vmatmul.bf16.vlgmr.msrb.gmra.mxu2 %v2242_v46  ;;  %v4645_v46 = vld [vmem:[%s7618_s14 + $0x88] sm:$0xf]  ;;  %2592 = vmatpush.bf16.msrb.mxu3 %v4638_v39  ;;  %v6847_v39 = vor.u32 %v5090_v28, %v4813_v23  ;;  %v4759_v28 = vld [vmem:[%s7621_s15 + $0x78] sm:$0xf0] }
 0xa0a   :  { %v2320_v24 = vpop.f32.mrf.mxu2 }
 0xa0b   :  { %v2321_v31 = vadd.f32 %v5115_v3, %v2320_v24  ;;  %v4642_v24 = vor.u32 %v5044_v34, %v4639_v42  ;;  %v4815_v34 = vld [vmem:[%s7621_s15 + $0xf0] sm:$0xf0] }
 0xa0c   :  { %v6849_v42 = vor.u32 %v5088_v30, %v4815_v34  ;;  %v4733_v30 = vld [vmem:[%s7621_s15 + $0x40] sm:$0xf] }
 0xa0d   :  { %v2325_v6 = vadd.f32 %v2321_v31, %v6284_v56  ;;  %v5056_v56 = vld [vmem:[%s7618_s14 + $0xe4] sm:$0xf] }
 0xa0f   :  { %2327 = vadd.xlane.f32.xlu0 %v2325_v6 }
 0xa12   :  { %v2322_v50 = vpop.f32.mrf.mxu2 }
 0xa13   :  { %v2323_v51 = vadd.f32 %v5115_v3, %v2322_v50  ;;  %v5047_v3 = vld [vmem:[%s7618_s14 + $0x94] sm:$0xf0]  ;;  %v4647_v50 = vld [vmem:[%s7618_s14 + $0x98] sm:$0xf0] }
 0xa14   :  { %v4646_v31 = vor.u32 %v5047_v3, %v4645_v46  ;;  %v4821_v46 = vld [vmem:[%s7621_s15 + $0xe8] sm:$0xf]  ;;  %v5091_v3 = vld [vmem:[%s7621_s15 + $0xf4] sm:$0xf0] }
 0xa15   :  { %v2326_v55 = vadd.f32 %v2323_v51, %v6503_v63  ;;  %v4687_v63 = vld [vmem:[%s7618_s14 + $0xf0] sm:$0xf0] }
 0xa16   :  { %v4690_v29 = vor.u32 %v5056_v56, %v4687_v63  ;;  %2620 = vmatpush.bf16.msra.mxu1 %v4646_v31  ;;  %v4626_v56 = vor.u32 %v5040_v60, %v4623_v35  ;;  %v5041_v63 = vld [vmem:[%s7618_s14 + $0x6c] sm:$0xf]  ;;  %v6860_v31 = vor.u32 %v5091_v3, %v4821_v46  ;;  %v5084_v60 = vld [vmem:[%s7621_s15 + $0xc4] sm:$0xf]  ;;  %v4805_v35 = vld [vmem:[%s7621_s15 + $0xc8] sm:$0xf] }
 0xa17   :  { %2329 = vadd.xlane.f32.xlu1 %v2326_v55  ;;  %v4634_v44 = vor.u32 %v5041_v63, %v4631_v22  ;;  %v6899_v63 = vor.u32 %v5087_v16, %v4805_v35  ;;  %v5070_v3 = vld [vmem:[%s7621_s15 + $0x4c] sm:$0xf0] }
 0xa18   :  { %2603 = vmatpush.bf16.msrb.mxu0 %v4690_v29  ;;  %v4605_v29 = vld [vmem:[%s7618_s14 + $0x40] sm:$0xf]  ;;  %v7043_v35 = vor.u32 %v5070_v3, %v4733_v30 }
 0xa19   :  { %v4606_v41 = vor.u32 %v5038_v37, %v4605_v29  ;;  %v5082_v29 = vld [vmem:[%s7621_s15 + $0xac] sm:$0xf0]  ;;  %v5080_v37 = vld [vmem:[%s7621_s15 + $0xa4] sm:$0xf] }
 0xa1a   :  { %2621 = vmatpush.bf16.msra.mxu1 %v4630_v21  ;;  %v4807_v21 = vld [vmem:[%s7621_s15 + $0xd8] sm:$0xf0] }
 0xa1c   :  { %2604 = vmatpush.bf16.msrb.mxu0 %v4674_v36  ;;  %v4615_v36 = vld [vmem:[%s7618_s14 + $0x58] sm:$0xf0] }
 0xa1d   :  { %v4618_v61 = vor.u32 %v5037_v27, %v4615_v36  ;;  %v5081_v27 = vld [vmem:[%s7621_s15 + $0xac] sm:$0xf]  ;;  %v4791_v36 = vld [vmem:[%s7621_s15 + $0xb8] sm:$0xf0] }
 0xa1e   :  { %2622 = vmatpush.bf16.msra.mxu1 %v4614_v54  ;;  %v6928_v54 = vor.u32 %v5083_v8, %v4789_v43  ;;  %v6941_v48 = vor.u32 %v5081_v27, %v4791_v36  ;;  %v4719_v43 = vld [vmem:[%s7621_s15 + $0x30] sm:$0xf0]  ;;  %v5067_v27 = vld [vmem:[%s7621_s15 + $0x34] sm:$0xf0] }
 0xa20   :  { %2605 = vmatpush.bf16.msrb.mxu0 %v4658_v14  ;;  %v4582_v14 = vor.u32 %v5031_v25, %v4581_v2  ;;  %v4751_v25 = vld [vmem:[%s7621_s15 + $0x70] sm:$0xf0] }
 0xa21   :  { %v7002_v19 = vor.u32 %v5072_v57, %v4751_v25  ;;  %v4709_v57 = vld [vmem:[%s7621_s15 + $0x8] sm:$0xf]  ;;  %v5063_v25 = vld [vmem:[%s7621_s15 + $0x14] sm:$0xf0] }
 0xa24   :  { %2606 = vmatpush.bf16.msrb.mxu0 %v4642_v24  ;;  %v5089_v24 = vld [vmem:[%s7621_s15 + $0xec] sm:$0xf] }
 0xa28   :  { %2607 = vmatpush.bf16.msrb.mxu0 %v4626_v56  ;;  %v5085_v56 = vld [vmem:[%s7621_s15 + $0xcc] sm:$0xf] }
 0xa29   :  { %v6901_v22 = vor.u32 %v5085_v56, %v4807_v21  ;;  %v4743_v56 = vld [vmem:[%s7621_s15 + $0x58] sm:$0xf0]  ;;  %v4717_v21 = vld [vmem:[%s7621_s15 + $0x20] sm:$0xf] }
 0xa2c   :  { %2608 = vmatpush.bf16.msrb.mxu0 %v4610_v4 }
 0xa82   :  { %v2328_v20 = vpop.xlane.xlu0 %2327 }
 0xa83   :  { %v2338_v53 = vmul.f32 %v6679_v45, %v2328_v20  ;;  %v4594_v20 = vor.u32 %v5032_v17, %v4591_v5  ;;  %v5078_v17 = vld [vmem:[%s7621_s15 + $0x8c] sm:$0xf0]  ;;  %v4767_v5 = vld [vmem:[%s7621_s15 + $0x90] sm:$0xf0] }
 0xa85   :  { %v6682_v18 = vsub.f32 %v2325_v6, %v2338_v53  ;;  %v5045_v6 = vld [vmem:[%s7618_s14 + $0x8c] sm:$0xf]  ;;  %v4598_v53 = vor.u32 %v5035_v49, %v4597_v62  ;;  %2609 = vmatpush.bf16.msrb.mxu0 %v4594_v20  ;;  %v4773_v62 = vld [vmem:[%s7621_s15 + $0x88] sm:$0xf]  ;;  %v5079_v49 = vld [vmem:[%s7621_s15 + $0x94] sm:$0xf0] }
 0xa86   :  { %v4650_v51 = vor.u32 %v5045_v6, %v4647_v50  ;;  %v4823_v6 = vld [vmem:[%s7621_s15 + $0xf8] sm:$0xf0]  ;;  %v4797_v50 = vld [vmem:[%s7621_s15 + $0xc0] sm:$0xf]  ;;  %v5077_v20 = vld [vmem:[%s7621_s15 + $0x8c] sm:$0xf] }
 0xa87   :  { %v2342_v26 = vmul.f32 %v6682_v18, %v6682_v18  ;;  %2623 = vmatpush.bf16.msra.mxu1 %v4598_v53 }
 0xa88   :  { %2634 = vmatpush.bf16.msra.mxu2 %v4650_v51  ;;  %v5086_v51 = vld [vmem:[%s7621_s15 + $0xcc] sm:$0xf0] }
 0xa89   :  { %2344 = vadd.xlane.f32.xlu2 %v2342_v26  ;;  %v5033_v26 = vld [vmem:[%s7618_s14 + $0x2c] sm:$0xf]  ;;  %2610 = vmatpush.bf16.msrb.mxu0 %v4578_v10  ;;  %v4757_v10 = vld [vmem:[%s7621_s15 + $0x68] sm:$0xf] }
 0xa8a   :  { %v2330_v7 = vpop.xlane.xlu1 %2329 }
 0xa8b   :  { %v2339_v12 = vmul.f32 %v6679_v45, %v2330_v7  ;;  %v4599_v7 = vld [vmem:[%s7618_s14 + $0x38] sm:$0xf0]  ;;  %2624 = vmatpush.bf16.msra.mxu1 %v4582_v14  ;;  %v5075_v14 = vld [vmem:[%s7621_s15 + $0x74] sm:$0xf0] }
 0xa8c   :  { %2635 = vmatpush.bf16.msra.mxu2 %v4634_v44  ;;  %v4781_v44 = vld [vmem:[%s7621_s15 + $0xa0] sm:$0xf]  ;;  %v7004_v23 = vor.u32 %v5075_v14, %v4757_v10  ;;  %v5061_v14 = vld [vmem:[%s7621_s15 + $0xc] sm:$0xf] }
 0xa8d   :  { %v6687_v13 = vsub.f32 %v2326_v55, %v2339_v12  ;;  %v4621_v55 = vld [vmem:[%s7618_s14 + $0x60] sm:$0xf]  ;;  %v4602_v12 = vor.u32 %v5033_v26, %v4599_v7  ;;  %2850 = vmatpush.bf16.msra.mxu0 %v6849_v42  ;;  %v6914_v40 = vor.u32 %v5082_v29, %v4781_v44 }
 0xa8e   :  { %v4622_v1 = vor.u32 %v5042_v59, %v4621_v55  ;;  %v6873_v55 = vor.u32 %v5089_v24, %v4823_v6  ;;  %v6875_v59 = vor.u32 %v5086_v51, %v4797_v50  ;;  %v5068_v24 = vld [vmem:[%s7621_s15 + $0x44] sm:$0xf]  ;;  %v4735_v6 = vld [vmem:[%s7621_s15 + $0x50] sm:$0xf0]  ;;  %v5071_v50 = vld [vmem:[%s7621_s15 + $0x54] sm:$0xf0] }
 0xa8f   :  { %v2343_v47 = vmul.f32 %v6687_v13, %v6687_v13  ;;  %2863 = vmatpush.bf16.msrb.mxu1 %v6860_v31  ;;  %v5069_v51 = vld [vmem:[%s7621_s15 + $0x4c] sm:$0xf]  ;;  %v7045_v16 = vor.u32 %v5068_v24, %v4735_v6  ;;  %v7130_v24 = vor.u32 %v5063_v25, %v4709_v57 }
 0xa90   :  { %2593 = vmatpush.bf16.msrb.mxu3 %v4622_v1  ;;  %2636 = vmatpush.bf16.msra.mxu2 %v4618_v61  ;;  %v4799_v1 = vld [vmem:[%s7621_s15 + $0xd0] sm:$0xf0]  ;;  %v4765_v61 = vld [vmem:[%s7621_s15 + $0x80] sm:$0xf]  ;;  %v7069_v8 = vor.u32 %v5069_v51, %v4743_v56 }
 0xa91   :  { %2346 = vadd.xlane.f32.xlu1 %v2343_v47  ;;  %v4573_v47 = vld [vmem:[%s7618_s14] sm:$0xf]  ;;  %v6887_v9 = vor.u32 %v5084_v60, %v4799_v1  ;;  %v6965_v26 = vor.u32 %v5078_v17, %v4765_v61  ;;  %v5065_v61 = vld [vmem:[%s7621_s15 + $0x2c] sm:$0xf] }
 0xa92   :  { %v4574_v0 = vor.u32 %v5030_v38, %v4573_v47  ;;  %v6973_v47 = vor.u32 %v5079_v49, %v4773_v62  ;;  %v5062_v62 = vld [vmem:[%s7621_s15 + $0xc] sm:$0xf0] }
 0xa93   :  { %2851 = vmatpush.bf16.msra.mxu0 %v6887_v9  ;;  %2864 = vmatpush.bf16.msrb.mxu1 %v6899_v63 }
 0xa94   :  { %2594 = vmatpush.bf16.msrb.mxu3 %v4606_v41  ;;  %2637 = vmatpush.bf16.msra.mxu2 %v4602_v12  ;;  %v4783_v41 = vld [vmem:[%s7621_s15 + $0xb0] sm:$0xf0]  ;;  %v4775_v12 = vld [vmem:[%s7621_s15 + $0x98] sm:$0xf0] }
 0xa95   :  { %v6926_v4 = vor.u32 %v5080_v37, %v4783_v41  ;;  %v6977_v38 = vor.u32 %v5077_v20, %v4775_v12  ;;  %v5066_v37 = vld [vmem:[%s7621_s15 + $0x2c] sm:$0xf0]  ;;  %v5064_v41 = vld [vmem:[%s7621_s15 + $0x24] sm:$0xf] }
 0xa96   :  { %v7086_v17 = vor.u32 %v5066_v37, %v4717_v21  ;;  %v5060_v12 = vld [vmem:[%s7621_s15 + $0x4] sm:$0xf] }
 0xa97   :  { %2852 = vmatpush.bf16.msra.mxu0 %v6926_v4  ;;  %2865 = vmatpush.bf16.msrb.mxu1 %v6928_v54 }
 0xa98   :  { %2595 = vmatpush.bf16.msrb.mxu3 %v4590_v11  ;;  %2638 = vmatpush.bf16.msra.mxu2 %v4586_v58  ;;  %v5076_v11 = vld [vmem:[%s7621_s15 + $0x84] sm:$0xf]  ;;  %v5073_v58 = vld [vmem:[%s7621_s15 + $0x6c] sm:$0xf] }
 0xa99   :  { %v6967_v7 = vor.u32 %v5076_v11, %v4767_v5  ;;  %v7017_v46 = vor.u32 %v5073_v58, %v4759_v28  ;;  %v7088_v11 = vor.u32 %v5064_v41, %v4719_v43  ;;  %v4701_v5 = vld [vmem:[%s7621_s15] sm:$0xf] }
 0xa9a   :  { %v7122_v28 = vor.u32 %v5062_v62, %v4701_v5  ;;  %v5117_v43 = vld [vmem:[%s7620_s13] ss:$0 sm:$0xff] }
 0xa9b   :  { %2853 = vmatpush.bf16.msra.mxu0 %v6967_v7  ;;  %2866 = vmatpush.bf16.msrb.mxu1 %v6973_v47 }
 0xa9c   :  { %2596 = vmatpush.bf16.msrb.mxu3 %v4574_v0  ;;  %2876 = vmatpush.bf16.msrb.mxu2 %v6873_v55  ;;  %v5074_v0 = vld [vmem:[%s7621_s15 + $0x6c] sm:$0xf0] }
 0xa9d   :  { %v6990_v2 = vor.u32 %v5074_v0, %v4749_v33  ;;  %v4703_v33 = vld [vmem:[%s7621_s15 + $0x10] sm:$0xf0] }
 0xa9e   :  { %v7124_v30 = vor.u32 %v5060_v12, %v4703_v33 }
 0xa9f   :  { %2854 = vmatpush.bf16.msra.mxu0 %v7002_v19  ;;  %2867 = vmatpush.bf16.msrb.mxu1 %v7004_v23 }
 0xaa0   :  { %2837 = vmatpush.bf16.msra.mxu3 %v6847_v39  ;;  %2877 = vmatpush.bf16.msrb.mxu2 %v6901_v22 }
 0xaa3   :  { %2855 = vmatpush.bf16.msra.mxu0 %v7045_v16 }
 0xaa4   :  { %2838 = vmatpush.bf16.msra.mxu3 %v6875_v59  ;;  %2878 = vmatpush.bf16.msrb.mxu2 %v6941_v48 }
 0xaa7   :  { %2856 = vmatpush.bf16.msra.mxu0 %v7088_v11 }
 0xaa8   :  { %2839 = vmatpush.bf16.msra.mxu3 %v6914_v40  ;;  %2879 = vmatpush.bf16.msrb.mxu2 %v6977_v38 }
 0xaab   :  { %2857 = vmatpush.bf16.msra.mxu0 %v7124_v30 }
 0xaac   :  { %2840 = vmatpush.bf16.msra.mxu3 %v6965_v26  ;;  %2880 = vmatpush.bf16.msrb.mxu2 %v7017_v46 }
 0xab0   :  { %2841 = vmatpush.bf16.msra.mxu3 %v6990_v2  ;;  %2881 = vmatpush.bf16.msrb.mxu2 %v7069_v8 }
 0xab4   :  { %2842 = vmatpush.bf16.msra.mxu3 %v7043_v35 }
 0xab8   :  { %2843 = vmatpush.bf16.msra.mxu3 %v7086_v17 }
 0xabc   :  { %2844 = vmatpush.bf16.msra.mxu3 %v7122_v28 }
 0xafc   :  { %v2345_v32 = vpop.xlane.xlu2 %2344 }
 0xafd   :  { %v2348_v52 = vmul.f32 %v2345_v32, %v6679_v45  ;;  %v4725_v32 = vld [vmem:[%s7621_s15 + $0x28] sm:$0xf] }
 0xafe   :  { %v7097_v20 = vor.u32 %v5067_v27, %v4725_v32 }
 0xaff   :  { %v6961_v53 = vadd.f32 1e-05, %v2348_v52  ;;  %v4727_v52 = vld [vmem:[%s7621_s15 + $0x38] sm:$0xf0] }
 0xb00   :  { %v7106_v0 = vor.u32 %v5065_v61, %v4727_v52  ;;  %v2419_v52 = vld [vmem:[%s7622_s16] sm:$0xf] }
 0xb01   :  { %5256 = vrsqrt.f32 %v6961_v53  ;;  %vm2358_vm9 = vweird.f32 %v6961_v53  ;;  %v2422_v62 = vperm.slane %v2419_v52, 1  ;;  %v2423_v12 = vperm.slane %v2419_v52, 2 }
 0xb02   :  { %2882 = vmatpush.bf16.msrb.mxu2 %v7106_v0 }
 0xb04   :  { %v2347_v15 = vpop.xlane.xlu1 %2346 }
 0xb05   :  { %v2349_v34 = vmul.f32 %v2347_v15, %v6679_v45  ;;  %v4741_v45 = vld [vmem:[%s7621_s15 + $0x48] sm:$0xf]  ;;  %v4711_v15 = vld [vmem:[%s7621_s15 + $0x18] sm:$0xf0] }
 0xb06   :  { %v7056_v29 = vor.u32 %v5071_v50, %v4741_v45  ;;  %v7133_v6 = vor.u32 %v5061_v14, %v4711_v15  ;;  %v2421_v14 = vperm.slane %v2419_v52, 0  ;;  %v2424_v15 = vperm.slane %v2419_v52, 3 }
 0xb07   :  { %v7037_v60 = vpop.eup %5256  ;;  %v7039_v1 = vadd.f32 1e-05, %v2349_v34 }
 0xb08   :  { %v2353_v44 = vmul.f32 %v7037_v60, %v6961_v53  ;;  %2868 = vmatpush.bf16.msrb.mxu1 %v7056_v29  ;;  %vm2359_vm7 = vweird.f32 %v7037_v60  ;;  %2883 = vmatpush.bf16.msrb.mxu2 %v7133_v6  ;;  %v5116_v53 = vld [vmem:[%s7619_s12] ss:$0 sm:$0xff] }
 0xb09   :  { %5258 = vrsqrt.f32 %v7039_v1  ;;  %vm2360_vm12 = vmor %vm2358_vm9, %vm2359_vm7  ;;  %vm2368_vm14 = vweird.f32 %v7039_v1 }
 0xb0a   :  { %v2354_v36 = vmul.f32 %v7037_v60, %v2353_v44 }
 0xb0c   :  { %v2355_v49 = vmul.f32 0.5, %v2354_v36  ;;  %2869 = vmatpush.bf16.msrb.mxu1 %v7097_v20 }
 0xb0e   :  { %v2356_v10 = vsub.f32 1.5, %v2355_v49 }
 0xb0f   :  { %v5259_v58 = vpop.eup %5258 }
 0xb10   :  { %v2357_v34 = vmul.f32 %v7037_v60, %v2356_v10  ;;  %v2363_v3 = vmul.f32 %v5259_v58, %v7039_v1  ;;  %2870 = vmatpush.bf16.msrb.mxu1 %v7130_v24  ;;  %vm2369_vm13 = vweird.f32 %v5259_v58 }
 0xb11   :  { %vm2370_vm15 = vmor %vm2368_vm14, %vm2369_vm13 }
 0xb12   :  { %v2364_v45 = vmul.f32 %v5259_v58, %v2363_v3  ;;  %v2361_v50 = vsel %vm2360_vm12, %v7037_v60, %v2357_v34 }
 0xb13   :  { %v2372_v21 = vmul.f32 %v2361_v50, %v6682_v18 }
 0xb14   :  { %v2365_v51 = vmul.f32 0.5, %v2364_v45 }
 0xb15   :  { %v2378_v41 = vmul.f32 %v5116_v53, %v2372_v21 }
 0xb16   :  { %v2366_v56 = vsub.f32 1.5, %v2365_v51 }
 0xb17   :  { %v2384_v27 = vadd.f32 %v5117_v43, %v2378_v41 }
 0xb18   :  { %v2367_v44 = vmul.f32 %v5259_v58, %v2366_v56 }
 0xb1a   :  { %v2371_v37 = vsel %vm2370_vm15, %v5259_v58, %v2367_v44 }
 0xb1b   :  { %v2373_v60 = vmul.f32 %v2371_v37, %v6687_v13  ;;  %v7667_v13 = vmov 0  }
 0xb1d   :  { %v2379_v32 = vmul.f32 %v5116_v53, %v2373_v60 }
 0xb1f   :  { %v2385_v36 = vadd.f32 %v5117_v43, %v2379_v32 }
 0xb21   :  { %v2386_v18 = vpack.c.bf16 %v2385_v36, %v2384_v27 }
 0xb23   :  { %2597 = vmatmul.bf16.vlgmr.msrb.gmra.mxu3 %v2386_v18  ;;  %2611 = vmatmul.bf16.vlgmr.msrb.gmra.mxu0 %v2386_v18 }
 0xb24   :  { %2625 = vmatmul.bf16.vlgmr.msra.gmra.mxu1 %v2386_v18  ;;  %2639 = vmatmul.bf16.vlgmr.msra.gmra.mxu2 %v2386_v18 }
 0xb25   :  { %2957 = vmatpush.bf16.msrb.mxu3 %v6847_v39  ;;  %2970 = vmatpush.bf16.msrb.mxu0 %v6849_v42 }
 0xb26   :  { %2983 = vmatpush.bf16.msra.mxu1 %v6860_v31  ;;  %2996 = vmatpush.bf16.msra.mxu2 %v6873_v55 }
 0xb29   :  { %2958 = vmatpush.bf16.msrb.mxu3 %v6875_v59  ;;  %2971 = vmatpush.bf16.msrb.mxu0 %v6887_v9 }
 0xb2a   :  { %2984 = vmatpush.bf16.msra.mxu1 %v6899_v63  ;;  %2997 = vmatpush.bf16.msra.mxu2 %v6901_v22 }
 0xb2d   :  { %2959 = vmatpush.bf16.msrb.mxu3 %v6914_v40  ;;  %2972 = vmatpush.bf16.msrb.mxu0 %v6926_v4 }
 0xb2e   :  { %2985 = vmatpush.bf16.msra.mxu1 %v6928_v54  ;;  %2998 = vmatpush.bf16.msra.mxu2 %v6941_v48 }
 0xb31   :  { %2960 = vmatpush.bf16.msrb.mxu3 %v6965_v26  ;;  %2973 = vmatpush.bf16.msrb.mxu0 %v6967_v7 }
 0xb32   :  { %2986 = vmatpush.bf16.msra.mxu1 %v6973_v47  ;;  %2999 = vmatpush.bf16.msra.mxu2 %v6977_v38 }
 0xb33   :  { %2845 = vmatmul.bf16.vlgmr.msra.gmra.mxu3 %v7667_v13  ;;  %2858 = vmatmul.bf16.vlgmr.msra.gmra.mxu0 %v7667_v13 }
 0xb34   :  { %2871 = vmatmul.bf16.vlgmr.msrb.gmra.mxu1 %v7667_v13  ;;  %2884 = vmatmul.bf16.vlgmr.msrb.gmra.mxu2 %v7667_v13 }
 0xb35   :  { %2961 = vmatpush.bf16.msrb.mxu3 %v6990_v2  ;;  %2974 = vmatpush.bf16.msrb.mxu0 %v7002_v19 }
 0xb36   :  { %2987 = vmatpush.bf16.msra.mxu1 %v7004_v23  ;;  %3000 = vmatpush.bf16.msra.mxu2 %v7017_v46 }
 0xb39   :  { %2962 = vmatpush.bf16.msrb.mxu3 %v7043_v35  ;;  %2975 = vmatpush.bf16.msrb.mxu0 %v7045_v16 }
 0xb3a   :  { %2988 = vmatpush.bf16.msra.mxu1 %v7056_v29  ;;  %3001 = vmatpush.bf16.msra.mxu2 %v7069_v8 }
 0xb3d   :  { %2963 = vmatpush.bf16.msrb.mxu3 %v7086_v17  ;;  %2976 = vmatpush.bf16.msrb.mxu0 %v7088_v11 }
 0xb3e   :  { %2989 = vmatpush.bf16.msra.mxu1 %v7097_v20  ;;  %3002 = vmatpush.bf16.msra.mxu2 %v7106_v0 }
 0xb41   :  { %2964 = vmatpush.bf16.msrb.mxu3 %v7122_v28  ;;  %2977 = vmatpush.bf16.msrb.mxu0 %v7124_v30 }
 0xb42   :  { %2990 = vmatpush.bf16.msra.mxu1 %v7130_v24  ;;  %3003 = vmatpush.bf16.msra.mxu2 %v7133_v6 }
 0xb45   :  { %3095 = vmatpush.bf16.msra.mxu3 %v6847_v39  ;;  %3108 = vmatpush.bf16.msra.mxu0 %v6849_v42 }
 0xb46   :  { %3121 = vmatpush.bf16.msrb.mxu1 %v6860_v31  ;;  %3134 = vmatpush.bf16.msrb.mxu2 %v6873_v55 }
 0xb49   :  { %3096 = vmatpush.bf16.msra.mxu3 %v6875_v59  ;;  %3109 = vmatpush.bf16.msra.mxu0 %v6887_v9 }
 0xb4a   :  { %3122 = vmatpush.bf16.msrb.mxu1 %v6899_v63  ;;  %3135 = vmatpush.bf16.msrb.mxu2 %v6901_v22 }
 0xb4d   :  { %3097 = vmatpush.bf16.msra.mxu3 %v6914_v40  ;;  %3110 = vmatpush.bf16.msra.mxu0 %v6926_v4 }
 0xb4e   :  { %3123 = vmatpush.bf16.msrb.mxu1 %v6928_v54  ;;  %3136 = vmatpush.bf16.msrb.mxu2 %v6941_v48 }
 0xb51   :  { %3098 = vmatpush.bf16.msra.mxu3 %v6965_v26  ;;  %3111 = vmatpush.bf16.msra.mxu0 %v6967_v7 }
 0xb52   :  { %3124 = vmatpush.bf16.msrb.mxu1 %v6973_v47  ;;  %3137 = vmatpush.bf16.msrb.mxu2 %v6977_v38 }
 0xb55   :  { %3099 = vmatpush.bf16.msra.mxu3 %v6990_v2  ;;  %3112 = vmatpush.bf16.msra.mxu0 %v7002_v19 }
 0xb56   :  { %3125 = vmatpush.bf16.msrb.mxu1 %v7004_v23  ;;  %3138 = vmatpush.bf16.msrb.mxu2 %v7017_v46 }
 0xb59   :  { %3100 = vmatpush.bf16.msra.mxu3 %v7043_v35  ;;  %3113 = vmatpush.bf16.msra.mxu0 %v7045_v16 }
 0xb5a   :  { %3126 = vmatpush.bf16.msrb.mxu1 %v7056_v29  ;;  %3139 = vmatpush.bf16.msrb.mxu2 %v7069_v8 }
 0xb5d   :  { %3101 = vmatpush.bf16.msra.mxu3 %v7086_v17  ;;  %3114 = vmatpush.bf16.msra.mxu0 %v7088_v11 }
 0xb5e   :  { %3127 = vmatpush.bf16.msrb.mxu1 %v7097_v20  ;;  %3140 = vmatpush.bf16.msrb.mxu2 %v7106_v0 }
 0xb61   :  { %3102 = vmatpush.bf16.msra.mxu3 %v7122_v28  ;;  %3115 = vmatpush.bf16.msra.mxu0 %v7124_v30 }
 0xb62   :  { %3128 = vmatpush.bf16.msrb.mxu1 %v7130_v24  ;;  %3141 = vmatpush.bf16.msrb.mxu2 %v7133_v6 }
 0xba0   :  { %v2612_v1 = vpop.f32.mrf.mxu0 }
 0xba1   :  { %v2626_v61 = vpop.f32.mrf.mxu1  ;;  %v7225_v34 = vadd.f32 %v2612_v1, %v2422_v62 }
 0xba6   :  { %v2598_v5 = vpop.f32.mrf.mxu3 }
 0xba7   :  { %v2640_v49 = vpop.f32.mrf.mxu2  ;;  %v7232_v44 = vadd.f32 %v2598_v5, %v2421_v14 }
 0xba8   :  { %v2614_v33 = vpop.f32.mrf.mxu0  ;;  %v7234_v37 = vadd.f32 %v2640_v49, %v2424_v15 }
 0xba9   :  { %v7221_v57 = vadd.f32 %v2614_v33, %v2422_v62  ;;  %v2628_v25 = vpop.f32.mrf.mxu1 }
 0xbaa   :  { %v7223_v10 = vadd.f32 %v2628_v25, %v2423_v12 }
 0xbab   :  { %7668 = vst [vmem:[#allocation7_spill] sm:$0xff] %v7221_v57 }
 0xbac   :  { %7669 = vst [vmem:[#allocation2_spill] sm:$0xff] %v7223_v10 }
 0xbae   :  { %v2600_v58 = vpop.f32.mrf.mxu3 }
 0xbaf   :  { %v7227_v3 = vadd.f32 %v2600_v58, %v2421_v14  ;;  %v2642_v45 = vpop.f32.mrf.mxu2 }
 0xbb0   :  { %v7229_v50 = vadd.f32 %v2642_v45, %v2424_v15  ;;  %v2859_v51 = vpop.f32.mrf.mxu0 }
 0xbb1   :  { %7670 = vst [vmem:[#allocation4_spill] sm:$0xff] %v7227_v3  ;;  %v2890_v56 = vadd.f32 %v2859_v51, %v7225_v34  ;;  %v2872_v21 = vpop.f32.mrf.mxu1  ;;  %v7238_v51 = vadd.f32 %v2626_v61, %v2423_v12 }
 0xbb2   :  { %7671 = vst [vmem:[#allocation5_spill] sm:$0xff] %v7229_v50 }
 0xbb3   :  { %v4828_v53 = vmul.f32 -1.442695, %v2890_v56 }
 0xbb5   :  { %5260 = vpow2.f32 %v4828_v53 }
 0xbb6   :  { %v2846_v60 = vpop.f32.mrf.mxu3 }
 0xbb7   :  { %v2889_v41 = vadd.f32 %v2846_v60, %v7232_v44  ;;  %v2885_v43 = vpop.f32.mrf.mxu2  ;;  %v2891_v60 = vadd.f32 %v2872_v21, %v7238_v51 }
 0xbb8   :  { %v2892_v32 = vadd.f32 %v2885_v43, %v7234_v37  ;;  %v2861_v27 = vpop.f32.mrf.mxu0 }
 0xbb9   :  { %v4827_v36 = vmul.f32 -1.442695, %v2889_v41  ;;  %v2874_v18 = vpop.f32.mrf.mxu1 }
 0xbba   :  { %v4829_v13 = vmul.f32 -1.442695, %v2892_v32 }
 0xbbb   :  { %v5261_v1 = vpop.eup %5260  ;;  %5262 = vpow2.f32 %v4827_v36 }
 0xbbc   :  { %v2915_v52 = vadd.f32 1.0, %v5261_v1  ;;  %5264 = vpow2.f32 %v4829_v13 }
 0xbbe   :  { %5266 = vrcp.f32 %v2915_v52  ;;  %v2848_v5 = vpop.f32.mrf.mxu3  ;;  %v2927_v27 = vand.u32 2147483648, %v2915_v52  ;;  %vm2921_vm1 = vweird.f32 %v2915_v52  ;;  %v2925_v18 = vand.u32 2147483647, %v2915_v52 }
 0xbbf   :  { %v2887_v62 = vpop.f32.mrf.mxu2 }
 0xbc0   :  { %v2928_v12 = vor.u32 1.1754944e-38, %v2927_v27  ;;  %vm2926_vm4 = vcmp.eq.f32.partialorder %v2925_v18, 8.507059e+37 }
 0xbc1   :  { %v5263_v33 = vpop.eup %5262 }
 0xbc2   :  { %v5265_v49 = vpop.eup %5264  ;;  %v2896_v25 = vadd.f32 1.0, %v5263_v33 }
 0xbc3   :  { %v2935_v14 = vadd.f32 1.0, %v5265_v49 }
 0xbc4   :  { %v5267_v15 = vpop.eup %5266  ;;  %5268 = vrcp.f32 %v2896_v25  ;;  %v2908_v1 = vand.u32 2147483648, %v2896_v25  ;;  %v2906_v61 = vand.u32 2147483647, %v2896_v25  ;;  %vm2902_vm5 = vweird.f32 %v2896_v25 }
 0xbc5   :  { %v2917_v58 = vmul.f32 %v5267_v15, %v2915_v52  ;;  %5270 = vrcp.f32 %v2935_v14  ;;  %vm2922_vm0 = vweird.f32 %v5267_v15  ;;  %vm2941_vm12 = vweird.f32 %v2935_v14 }
 0xbc6   :  { %vm2923_vm2 = vmor %vm2921_vm1, %vm2922_vm0  ;;  %5272 = vtanh.f32 %v2891_v60  ;;  %vm2907_vm7 = vcmp.eq.f32.partialorder %v2906_v61, 8.507059e+37  ;;  %v2945_v27 = vand.u32 2147483647, %v2935_v14 }
 0xbc7   :  { %v2918_v45 = vsub.f32 1.0, %v2917_v58  ;;  %v2909_v58 = vor.u32 1.1754944e-38, %v2908_v1 }
 0xbc8   :  { %vm2946_vm14 = vcmp.eq.f32.partialorder %v2945_v27, 8.507059e+37 }
 0xbc9   :  { %v2919_v56 = vmul.f32 %v5267_v15, %v2918_v45 }
 0xbca   :  { %v5269_v53 = vpop.eup %5268 }
 0xbcb   :  { %v5271_v41 = vpop.eup %5270  ;;  %v2920_v43 = vadd.f32 %v5267_v15, %v2919_v56  ;;  %v2898_v32 = vmul.f32 %v5269_v53, %v2896_v25  ;;  %vm2903_vm3 = vweird.f32 %v5269_v53 }
 0xbcc   :  { %v2937_v36 = vmul.f32 %v5271_v41, %v2935_v14  ;;  %vm2904_vm6 = vmor %vm2902_vm5, %vm2903_vm3  ;;  %v5273_v56 = vpop.eup %5272  ;;  %vm2942_vm9 = vweird.f32 %v5271_v41 }
 0xbcd   :  { %v2899_v13 = vsub.f32 1.0, %v2898_v32  ;;  %v2924_v5 = vsel %vm2923_vm2, %v5267_v15, %v2920_v43  ;;  %v2947_v43 = vand.u32 2147483648, %v2935_v14  ;;  %vm2943_vm13 = vmor %vm2941_vm12, %vm2942_vm9 }
 0xbce   :  { %v2938_v33 = vsub.f32 1.0, %v2937_v36  ;;  %v2929_v49 = vsel %vm2926_vm4, %v2928_v12, %v2924_v5 }
 0xbcf   :  { %v2900_v62 = vmul.f32 %v5269_v53, %v2899_v13  ;;  %v2951_v10 = vmul.f32 0.0, %v2929_v49  ;;  %v2948_v36 = vor.u32 1.1754944e-38, %v2947_v43 }
 0xbd0   :  { %v2939_v32 = vmul.f32 %v5271_v41, %v2938_v33 }
 0xbd1   :  { %v2901_v21 = vadd.f32 %v5269_v53, %v2900_v62 }
 0xbd2   :  { %v2940_v15 = vadd.f32 %v5271_v41, %v2939_v32 }
 0xbd3   :  { %v2905_v45 = vsel %vm2904_vm6, %v5269_v53, %v2901_v21 }
 0xbd4   :  { %v2910_v52 = vsel %vm2907_vm7, %v2909_v58, %v2905_v45  ;;  %v2944_v25 = vsel %vm2943_vm13, %v5271_v41, %v2940_v15 }
 0xbd5   :  { %v2952_v60 = vmul.f32 %v5273_v56, %v2910_v52  ;;  %v2949_v18 = vsel %vm2946_vm14, %v2948_v36, %v2944_v25 }
 0xbd7   :  { %v7241_v50 = vadd.f32 %v2952_v60, %v2951_v10 }
 0xbd9   :  { %5274 = vtanh.f32 %v7241_v50 }
 0xbdf   :  { %v5275_v53 = vpop.eup %5274 }
 0xbe0   :  { %v7244_v13 = vmul.f32 %v5275_v53, %v2949_v18 }
 0xbe2   :  { %v2956_v1 = vpack.c.bf16 %v7244_v13, %v7244_v13 }
 0xbe4   :  { %2965 = vmatmul.bf16.vlgmr.msrb.gmra.mxu3 %v2956_v1  ;;  %2978 = vmatmul.bf16.vlgmr.msrb.gmra.mxu0 %v2956_v1 }
 0xbe5   :  { %2991 = vmatmul.bf16.vlgmr.msra.gmra.mxu1 %v2956_v1  ;;  %3004 = vmatmul.bf16.vlgmr.msra.gmra.mxu2 %v2956_v1 }
 0xbe6   :  { %3233 = vmatpush.bf16.msrb.mxu3 %v6847_v39  ;;  %3246 = vmatpush.bf16.msrb.mxu0 %v6849_v42 }
 0xbe7   :  { %3259 = vmatpush.bf16.msra.mxu1 %v6860_v31  ;;  %3272 = vmatpush.bf16.msra.mxu2 %v6873_v55 }
 0xbea   :  { %3234 = vmatpush.bf16.msrb.mxu3 %v6875_v59  ;;  %3247 = vmatpush.bf16.msrb.mxu0 %v6887_v9 }
 0xbeb   :  { %3260 = vmatpush.bf16.msra.mxu1 %v6899_v63  ;;  %3273 = vmatpush.bf16.msra.mxu2 %v6901_v22 }
 0xbee   :  { %3235 = vmatpush.bf16.msrb.mxu3 %v6914_v40  ;;  %3248 = vmatpush.bf16.msrb.mxu0 %v6926_v4 }
 0xbef   :  { %3261 = vmatpush.bf16.msra.mxu1 %v6928_v54  ;;  %3274 = vmatpush.bf16.msra.mxu2 %v6941_v48 }
 0xbf2   :  { %3236 = vmatpush.bf16.msrb.mxu3 %v6965_v26  ;;  %3249 = vmatpush.bf16.msrb.mxu0 %v6967_v7 }
 0xbf3   :  { %3262 = vmatpush.bf16.msra.mxu1 %v6973_v47  ;;  %3275 = vmatpush.bf16.msra.mxu2 %v6977_v38 }
 0xbf6   :  { %3237 = vmatpush.bf16.msrb.mxu3 %v6990_v2  ;;  %3250 = vmatpush.bf16.msrb.mxu0 %v7002_v19 }
 0xbf7   :  { %3263 = vmatpush.bf16.msra.mxu1 %v7004_v23  ;;  %3276 = vmatpush.bf16.msra.mxu2 %v7017_v46 }
 0xbfa   :  { %3238 = vmatpush.bf16.msrb.mxu3 %v7043_v35  ;;  %3251 = vmatpush.bf16.msrb.mxu0 %v7045_v16 }
 0xbfb   :  { %3264 = vmatpush.bf16.msra.mxu1 %v7056_v29  ;;  %3277 = vmatpush.bf16.msra.mxu2 %v7069_v8 }
 0xbfe   :  { %3239 = vmatpush.bf16.msrb.mxu3 %v7086_v17  ;;  %3252 = vmatpush.bf16.msrb.mxu0 %v7088_v11 }
 0xbff   :  { %3265 = vmatpush.bf16.msra.mxu1 %v7097_v20  ;;  %3278 = vmatpush.bf16.msra.mxu2 %v7106_v0 }
 0xc02   :  { %3240 = vmatpush.bf16.msrb.mxu3 %v7122_v28  ;;  %3253 = vmatpush.bf16.msrb.mxu0 %v7124_v30 }
 0xc03   :  { %3266 = vmatpush.bf16.msra.mxu1 %v7130_v24  ;;  %3279 = vmatpush.bf16.msra.mxu2 %v7133_v6 }
 0xc61   :  { %v2979_v10 = vpop.f32.mrf.mxu0 }
 0xc62   :  { %v3014_v14 = vrot.slane %v2979_v10, 6  ;;  %v2992_v41 = vpop.f32.mrf.mxu1 }
 0xc64   :  { %v3022_v5 = vadd.f32 %v3014_v14, %v7225_v34  ;;  %v3015_v14 = vrot.slane %v2992_v41, 6 }
 0xc66   :  { %v4831_v62 = vmul.f32 -1.442695, %v3022_v5 }
 0xc67   :  { %v2966_v61 = vpop.f32.mrf.mxu3 }
 0xc68   :  { %5276 = vpow2.f32 %v4831_v62  ;;  %v3013_v12 = vrot.slane %v2966_v61, 6  ;;  %v3005_v33 = vpop.f32.mrf.mxu2 }
 0xc69   :  { %v3016_v21 = vrot.slane %v3005_v33, 6  ;;  %v2981_v49 = vpop.f32.mrf.mxu0 }
 0xc6a   :  { %v3021_v58 = vadd.f32 %v3013_v12, %v7232_v44  ;;  %v2994_v45 = vpop.f32.mrf.mxu1  ;;  %v3023_v12 = vadd.f32 %v3015_v14, %v7238_v51 }
 0xc6b   :  { %v3024_v56 = vadd.f32 %v3016_v21, %v7234_v37 }
 0xc6c   :  { %v4830_v52 = vmul.f32 -1.442695, %v3021_v58 }
 0xc6d   :  { %v4832_v32 = vmul.f32 -1.442695, %v3024_v56 }
 0xc6e   :  { %v5277_v60 = vpop.eup %5276  ;;  %5278 = vpow2.f32 %v4830_v52 }
 0xc6f   :  { %v3047_v15 = vadd.f32 1.0, %v5277_v60  ;;  %5280 = vpow2.f32 %v4832_v32  ;;  %v2968_v43 = vpop.f32.mrf.mxu3 }
 0xc70   :  { %v3007_v27 = vpop.f32.mrf.mxu2 }
 0xc71   :  { %5282 = vrcp.f32 %v3047_v15  ;;  %v3059_v58 = vand.u32 2147483648, %v3047_v15  ;;  %vm3053_vm0 = vweird.f32 %v3047_v15  ;;  %v3057_v56 = vand.u32 2147483647, %v3047_v15 }
 0xc73   :  { %v3060_v27 = vor.u32 1.1754944e-38, %v3059_v58  ;;  %vm3058_vm3 = vcmp.eq.f32.partialorder %v3057_v56, 8.507059e+37 }
 0xc74   :  { %v5279_v25 = vpop.eup %5278 }
 0xc75   :  { %v5281_v36 = vpop.eup %5280  ;;  %v3028_v53 = vadd.f32 1.0, %v5279_v25 }
 0xc76   :  { %v3067_v18 = vadd.f32 1.0, %v5281_v36 }
 0xc77   :  { %v5283_v1 = vpop.eup %5282  ;;  %5284 = vrcp.f32 %v3028_v53  ;;  %v3040_v32 = vand.u32 2147483648, %v3028_v53  ;;  %v3038_v41 = vand.u32 2147483647, %v3028_v53  ;;  %vm3034_vm4 = vweird.f32 %v3028_v53 }
 0xc78   :  { %v3049_v10 = vmul.f32 %v5283_v1, %v3047_v15  ;;  %5286 = vrcp.f32 %v3067_v18  ;;  %vm3054_vm15 = vweird.f32 %v5283_v1  ;;  %vm3073_vm9 = vweird.f32 %v3067_v18 }
 0xc79   :  { %vm3055_vm1 = vmor %vm3053_vm0, %vm3054_vm15  ;;  %5288 = vtanh.f32 %v3023_v12  ;;  %v3041_v14 = vor.u32 1.1754944e-38, %v3040_v32  ;;  %vm3039_vm6 = vcmp.eq.f32.partialorder %v3038_v41, 8.507059e+37 }
 0xc7a   :  { %v3050_v5 = vsub.f32 1.0, %v3049_v10 }
 0xc7c   :  { %v3051_v62 = vmul.f32 %v5283_v1, %v3050_v5  ;;  %v3084_v5 = vrot.slane %v7241_v50, 6 }
 0xc7d   :  { %v5285_v61 = vpop.eup %5284 }
 0xc7e   :  { %v5287_v33 = vpop.eup %5286  ;;  %v3052_v21 = vadd.f32 %v5283_v1, %v3051_v62  ;;  %v3030_v49 = vmul.f32 %v5285_v61, %v3028_v53  ;;  %vm3035_vm2 = vweird.f32 %v5285_v61  ;;  %v3077_v53 = vand.u32 2147483647, %v3067_v18 }
 0xc7f   :  { %v3069_v45 = vmul.f32 %v5287_v33, %v3067_v18  ;;  %vm3036_vm5 = vmor %vm3034_vm4, %vm3035_vm2  ;;  %v5289_v15 = vpop.eup %5288  ;;  %vm3074_vm7 = vweird.f32 %v5287_v33 }
 0xc80   :  { %v3031_v52 = vsub.f32 1.0, %v3030_v49  ;;  %v3056_v60 = vsel %vm3055_vm1, %v5283_v1, %v3052_v21  ;;  %vm3075_vm12 = vmor %vm3073_vm9, %vm3074_vm7  ;;  %vm3078_vm13 = vcmp.eq.f32.partialorder %v3077_v53, 8.507059e+37 }
 0xc81   :  { %v3070_v25 = vsub.f32 1.0, %v3069_v45  ;;  %v3061_v10 = vsel %vm3058_vm3, %v3060_v27, %v3056_v60  ;;  %v3079_v45 = vand.u32 2147483648, %v3067_v18 }
 0xc82   :  { %v3032_v43 = vmul.f32 %v5285_v61, %v3031_v52  ;;  %v3086_v3 = vmul.f32 %v3084_v5, %v3061_v10 }
 0xc83   :  { %v3071_v12 = vmul.f32 %v5287_v33, %v3070_v25  ;;  %v3080_v52 = vor.u32 1.1754944e-38, %v3079_v45 }
 0xc84   :  { %v3033_v36 = vadd.f32 %v5285_v61, %v3032_v43 }
 0xc85   :  { %v3072_v58 = vadd.f32 %v5287_v33, %v3071_v12 }
 0xc86   :  { %v3037_v62 = vsel %vm3036_vm5, %v5285_v61, %v3033_v36 }
 0xc87   :  { %v3042_v49 = vsel %vm3039_vm6, %v3041_v14, %v3037_v62  ;;  %v3076_v56 = vsel %vm3075_vm12, %v5287_v33, %v3072_v58 }
 0xc88   :  { %v3087_v1 = vmul.f32 %v5289_v15, %v3042_v49  ;;  %v3081_v61 = vsel %vm3078_vm13, %v3080_v52, %v3076_v56 }
 0xc8a   :  { %v7285_v21 = vadd.f32 %v3087_v1, %v3086_v3 }
 0xc8c   :  { %5290 = vtanh.f32 %v7285_v21 }
 0xc92   :  { %v5291_v50 = vpop.eup %5290 }
 0xc93   :  { %v7288_v32 = vmul.f32 %v5291_v50, %v3081_v61 }
 0xc95   :  { %v3091_v60 = vpack.c.bf16 %v7288_v32, %v7288_v32 }
 0xc97   :  { %v3093_v3 = vrot.slane %v3091_v60, 1 }
 0xc99   :  { %3103 = vmatmul.bf16.vlgmr.msra.gmra.mxu3 %v3093_v3  ;;  %3116 = vmatmul.bf16.vlgmr.msra.gmra.mxu0 %v3093_v3 }
 0xc9a   :  { %3129 = vmatmul.bf16.vlgmr.msrb.gmra.mxu1 %v3093_v3  ;;  %3142 = vmatmul.bf16.vlgmr.msrb.gmra.mxu2 %v3093_v3 }
 0xc9b   :  { %3371 = vmatpush.bf16.msra.mxu3 %v6847_v39  ;;  %3384 = vmatpush.bf16.msra.mxu0 %v6849_v42 }
 0xc9c   :  { %3397 = vmatpush.bf16.msrb.mxu1 %v6860_v31  ;;  %3410 = vmatpush.bf16.msrb.mxu2 %v6873_v55 }
 0xc9f   :  { %3372 = vmatpush.bf16.msra.mxu3 %v6875_v59  ;;  %3385 = vmatpush.bf16.msra.mxu0 %v6887_v9 }
 0xca0   :  { %3398 = vmatpush.bf16.msrb.mxu1 %v6899_v63  ;;  %3411 = vmatpush.bf16.msrb.mxu2 %v6901_v22 }
 0xca3   :  { %3373 = vmatpush.bf16.msra.mxu3 %v6914_v40  ;;  %3386 = vmatpush.bf16.msra.mxu0 %v6926_v4 }
 0xca4   :  { %3399 = vmatpush.bf16.msrb.mxu1 %v6928_v54  ;;  %3412 = vmatpush.bf16.msrb.mxu2 %v6941_v48 }
 0xca7   :  { %3374 = vmatpush.bf16.msra.mxu3 %v6965_v26  ;;  %3387 = vmatpush.bf16.msra.mxu0 %v6967_v7 }
 0xca8   :  { %3400 = vmatpush.bf16.msrb.mxu1 %v6973_v47  ;;  %3413 = vmatpush.bf16.msrb.mxu2 %v6977_v38 }
 0xcab   :  { %3375 = vmatpush.bf16.msra.mxu3 %v6990_v2  ;;  %3388 = vmatpush.bf16.msra.mxu0 %v7002_v19 }
 0xcac   :  { %3401 = vmatpush.bf16.msrb.mxu1 %v7004_v23  ;;  %3414 = vmatpush.bf16.msrb.mxu2 %v7017_v46 }
 0xcaf   :  { %3376 = vmatpush.bf16.msra.mxu3 %v7043_v35  ;;  %3389 = vmatpush.bf16.msra.mxu0 %v7045_v16 }
 0xcb0   :  { %3402 = vmatpush.bf16.msrb.mxu1 %v7056_v29  ;;  %3415 = vmatpush.bf16.msrb.mxu2 %v7069_v8 }
 0xcb3   :  { %3377 = vmatpush.bf16.msra.mxu3 %v7086_v17  ;;  %3390 = vmatpush.bf16.msra.mxu0 %v7088_v11 }
 0xcb4   :  { %3403 = vmatpush.bf16.msrb.mxu1 %v7097_v20  ;;  %3416 = vmatpush.bf16.msrb.mxu2 %v7106_v0 }
 0xcb7   :  { %3378 = vmatpush.bf16.msra.mxu3 %v7122_v28  ;;  %3391 = vmatpush.bf16.msra.mxu0 %v7124_v30 }
 0xcb8   :  { %3404 = vmatpush.bf16.msrb.mxu1 %v7130_v24  ;;  %3417 = vmatpush.bf16.msrb.mxu2 %v7133_v6 }
 0xd16   :  { %v3117_v18 = vpop.f32.mrf.mxu0 }
 0xd17   :  { %v3152_v33 = vrot.slane %v3117_v18, 4  ;;  %v3130_v43 = vpop.f32.mrf.mxu1 }
 0xd19   :  { %v3160_v41 = vadd.f32 %v3152_v33, %v7225_v34  ;;  %v3153_v33 = vrot.slane %v3130_v43, 4 }
 0xd1b   :  { %v4834_v27 = vmul.f32 -1.442695, %v3160_v41 }
 0xd1c   :  { %v3104_v25 = vpop.f32.mrf.mxu3 }
 0xd1d   :  { %5292 = vpow2.f32 %v4834_v27  ;;  %v3151_v36 = vrot.slane %v3104_v25, 4  ;;  %v3143_v10 = vpop.f32.mrf.mxu2 }
 0xd1e   :  { %v3154_v14 = vrot.slane %v3143_v10, 4  ;;  %v3119_v5 = vpop.f32.mrf.mxu0 }
 0xd1f   :  { %v3159_v62 = vadd.f32 %v3151_v36, %v7232_v44  ;;  %v3132_v15 = vpop.f32.mrf.mxu1  ;;  %v3161_v36 = vadd.f32 %v3153_v33, %v7238_v51 }
 0xd20   :  { %v3162_v49 = vadd.f32 %v3154_v14, %v7234_v37 }
 0xd21   :  { %v4833_v12 = vmul.f32 -1.442695, %v3159_v62 }
 0xd22   :  { %v4835_v1 = vmul.f32 -1.442695, %v3162_v49 }
 0xd23   :  { %v5293_v58 = vpop.eup %5292  ;;  %5294 = vpow2.f32 %v4833_v12 }
 0xd24   :  { %v3185_v45 = vadd.f32 1.0, %v5293_v58  ;;  %5296 = vpow2.f32 %v4835_v1  ;;  %v3106_v53 = vpop.f32.mrf.mxu3 }
 0xd25   :  { %v3145_v56 = vpop.f32.mrf.mxu2 }
 0xd26   :  { %5298 = vrcp.f32 %v3185_v45  ;;  %v3197_v62 = vand.u32 2147483648, %v3185_v45  ;;  %vm3191_vm15 = vweird.f32 %v3185_v45  ;;  %v3195_v49 = vand.u32 2147483647, %v3185_v45 }
 0xd28   :  { %v3198_v56 = vor.u32 1.1754944e-38, %v3197_v62  ;;  %vm3196_vm2 = vcmp.eq.f32.partialorder %v3195_v49, 8.507059e+37 }
 0xd29   :  { %v5295_v52 = vpop.eup %5294 }
 0xd2a   :  { %v5297_v50 = vpop.eup %5296  ;;  %v3166_v61 = vadd.f32 1.0, %v5295_v52 }
 0xd2b   :  { %v3205_v60 = vadd.f32 1.0, %v5297_v50 }
 0xd2c   :  { %v5299_v3 = vpop.eup %5298  ;;  %5300 = vrcp.f32 %v3166_v61  ;;  %v3178_v1 = vand.u32 2147483648, %v3166_v61  ;;  %v3176_v43 = vand.u32 2147483647, %v3166_v61  ;;  %vm3172_vm3 = vweird.f32 %v3166_v61 }
 0xd2d   :  { %v3187_v18 = vmul.f32 %v5299_v3, %v3185_v45  ;;  %5302 = vrcp.f32 %v3205_v60  ;;  %vm3192_vm14 = vweird.f32 %v5299_v3  ;;  %vm3211_vm7 = vweird.f32 %v3205_v60 }
 0xd2e   :  { %vm3193_vm0 = vmor %vm3191_vm15, %vm3192_vm14  ;;  %5304 = vtanh.f32 %v3161_v36  ;;  %v3179_v33 = vor.u32 1.1754944e-38, %v3178_v1  ;;  %vm3177_vm5 = vcmp.eq.f32.partialorder %v3176_v43, 8.507059e+37 }
 0xd2f   :  { %v3188_v41 = vsub.f32 1.0, %v3187_v18 }
 0xd31   :  { %v3189_v27 = vmul.f32 %v5299_v3, %v3188_v41  ;;  %v3222_v41 = vrot.slane %v7285_v21, 6 }
 0xd32   :  { %v5301_v25 = vpop.eup %5300 }
 0xd33   :  { %v5303_v10 = vpop.eup %5302  ;;  %v3190_v14 = vadd.f32 %v5299_v3, %v3189_v27  ;;  %v3168_v5 = vmul.f32 %v5301_v25, %v3166_v61  ;;  %vm3173_vm1 = vweird.f32 %v5301_v25  ;;  %v3215_v61 = vand.u32 2147483647, %v3205_v60 }
 0xd34   :  { %v3207_v15 = vmul.f32 %v5303_v10, %v3205_v60  ;;  %vm3174_vm4 = vmor %vm3172_vm3, %vm3173_vm1  ;;  %v5305_v45 = vpop.eup %5304  ;;  %vm3212_vm6 = vweird.f32 %v5303_v10 }
 0xd35   :  { %v3169_v12 = vsub.f32 1.0, %v3168_v5  ;;  %v3194_v58 = vsel %vm3193_vm0, %v5299_v3, %v3190_v14  ;;  %vm3213_vm9 = vmor %vm3211_vm7, %vm3212_vm6  ;;  %vm3216_vm12 = vcmp.eq.f32.partialorder %v3215_v61, 8.507059e+37 }
 0xd36   :  { %v3208_v52 = vsub.f32 1.0, %v3207_v15  ;;  %v3199_v18 = vsel %vm3196_vm2, %v3198_v56, %v3194_v58  ;;  %v3217_v15 = vand.u32 2147483648, %v3205_v60  ;;  %v3904_v58 = vsel %vm1762_vm10, %v7244_v13, %v7288_v32 }
 0xd37   :  { %v3170_v53 = vmul.f32 %v5301_v25, %v3169_v12  ;;  %v3224_v57 = vmul.f32 %v3222_v41, %v3199_v18 }
 0xd38   :  { %v3209_v36 = vmul.f32 %v5303_v10, %v3208_v52  ;;  %v3218_v12 = vor.u32 1.1754944e-38, %v3217_v15 }
 0xd39   :  { %v3171_v50 = vadd.f32 %v5301_v25, %v3170_v53 }
 0xd3a   :  { %v3210_v62 = vadd.f32 %v5303_v10, %v3209_v36 }
 0xd3b   :  { %v3175_v27 = vsel %vm3174_vm4, %v5301_v25, %v3171_v50 }
 0xd3c   :  { %v3180_v5 = vsel %vm3177_vm5, %v3179_v33, %v3175_v27  ;;  %v3214_v49 = vsel %vm3213_vm9, %v5303_v10, %v3210_v62 }
 0xd3d   :  { %v3225_v3 = vmul.f32 %v5305_v45, %v3180_v5  ;;  %v3219_v25 = vsel %vm3216_vm12, %v3218_v12, %v3214_v49 }
 0xd3f   :  { %v7329_v14 = vadd.f32 %v3225_v3, %v3224_v57 }
 0xd41   :  { %5306 = vtanh.f32 %v7329_v14 }
 0xd47   :  { %v5307_v21 = vpop.eup %5306 }
 0xd48   :  { %v3228_v1 = vmul.f32 %v5307_v21, %v3219_v25 }
 0xd4a   :  { %v3229_v57 = vpack.c.bf16 %v3228_v1, %v3228_v1  ;;  %v7336_v53 = vsel %vm1764_vm11, %v3904_v58, %v3228_v1 }
 0xd4c   :  { %v3231_v43 = vrot.slane %v3229_v57, 2 }
 0xd4e   :  { %3241 = vmatmul.bf16.vlgmr.msrb.gmra.mxu3 %v3231_v43  ;;  %3254 = vmatmul.bf16.vlgmr.msrb.gmra.mxu0 %v3231_v43 }
 0xd4f   :  { %3267 = vmatmul.bf16.vlgmr.msra.gmra.mxu1 %v3231_v43  ;;  %3280 = vmatmul.bf16.vlgmr.msra.gmra.mxu2 %v3231_v43 }
 0xd50   :  { %3494 = vmatpush.bf16.msrb.mxu3 %v6847_v39  ;;  %3507 = vmatpush.bf16.msrb.mxu0 %v6849_v42 }
 0xd51   :  { %3520 = vmatpush.bf16.msra.mxu1 %v6860_v31  ;;  %3533 = vmatpush.bf16.msra.mxu2 %v6873_v55 }
 0xd54   :  { %3495 = vmatpush.bf16.msrb.mxu3 %v6875_v59  ;;  %3508 = vmatpush.bf16.msrb.mxu0 %v6887_v9 }
 0xd55   :  { %3521 = vmatpush.bf16.msra.mxu1 %v6899_v63  ;;  %3534 = vmatpush.bf16.msra.mxu2 %v6901_v22 }
 0xd58   :  { %3496 = vmatpush.bf16.msrb.mxu3 %v6914_v40  ;;  %3509 = vmatpush.bf16.msrb.mxu0 %v6926_v4 }
 0xd59   :  { %3522 = vmatpush.bf16.msra.mxu1 %v6928_v54  ;;  %3535 = vmatpush.bf16.msra.mxu2 %v6941_v48 }
 0xd5c   :  { %3497 = vmatpush.bf16.msrb.mxu3 %v6965_v26  ;;  %3510 = vmatpush.bf16.msrb.mxu0 %v6967_v7 }
 0xd5d   :  { %3523 = vmatpush.bf16.msra.mxu1 %v6973_v47  ;;  %3536 = vmatpush.bf16.msra.mxu2 %v6977_v38 }
 0xd60   :  { %3498 = vmatpush.bf16.msrb.mxu3 %v6990_v2  ;;  %3511 = vmatpush.bf16.msrb.mxu0 %v7002_v19 }
 0xd61   :  { %3524 = vmatpush.bf16.msra.mxu1 %v7004_v23  ;;  %3537 = vmatpush.bf16.msra.mxu2 %v7017_v46 }
 0xd64   :  { %3499 = vmatpush.bf16.msrb.mxu3 %v7043_v35  ;;  %3512 = vmatpush.bf16.msrb.mxu0 %v7045_v16 }
 0xd65   :  { %3525 = vmatpush.bf16.msra.mxu1 %v7056_v29  ;;  %3538 = vmatpush.bf16.msra.mxu2 %v7069_v8 }
 0xd68   :  { %3500 = vmatpush.bf16.msrb.mxu3 %v7086_v17  ;;  %3513 = vmatpush.bf16.msrb.mxu0 %v7088_v11 }
 0xd69   :  { %3526 = vmatpush.bf16.msra.mxu1 %v7097_v20  ;;  %3539 = vmatpush.bf16.msra.mxu2 %v7106_v0 }
 0xd6c   :  { %3501 = vmatpush.bf16.msrb.mxu3 %v7122_v28  ;;  %3514 = vmatpush.bf16.msrb.mxu0 %v7124_v30 }
 0xd6d   :  { %3527 = vmatpush.bf16.msra.mxu1 %v7130_v24  ;;  %3540 = vmatpush.bf16.msra.mxu2 %v7133_v6 }
 0xdcb   :  { %v3255_v13 = vpop.f32.mrf.mxu0 }
 0xdcc   :  { %v3290_v32 = vrot.slane %v3255_v13, 2  ;;  %v3268_v60 = vpop.f32.mrf.mxu1 }
 0xdce   :  { %v3298_v10 = vadd.f32 %v3290_v32, %v7225_v34 }
 0xdd0   :  { %v4837_v56 = vmul.f32 -1.442695, %v3298_v10 }
 0xdd1   :  { %v3242_v52 = vpop.f32.mrf.mxu3 }
 0xdd2   :  { %5308 = vpow2.f32 %v4837_v56  ;;  %v3289_v50 = vrot.slane %v3242_v52, 2  ;;  %v3281_v18 = vpop.f32.mrf.mxu2 }
 0xdd3   :  { %v3292_v33 = vrot.slane %v3281_v18, 2  ;;  %v3257_v41 = vpop.f32.mrf.mxu0 }
 0xdd4   :  { %v3297_v27 = vadd.f32 %v3289_v50, %v7232_v44  ;;  %v3270_v45 = vpop.f32.mrf.mxu1  ;;  %v3291_v44 = vrot.slane %v3268_v60, 2 }
 0xdd5   :  { %v3300_v5 = vadd.f32 %v3292_v33, %v7234_v37 }
 0xdd6   :  { %v4836_v36 = vmul.f32 -1.442695, %v3297_v27  ;;  %v3299_v13 = vadd.f32 %v3291_v44, %v7238_v51 }
 0xdd7   :  { %v4838_v3 = vmul.f32 -1.442695, %v3300_v5 }
 0xdd8   :  { %v5309_v62 = vpop.eup %5308  ;;  %5310 = vpow2.f32 %v4836_v36 }
 0xdd9   :  { %v3323_v15 = vadd.f32 1.0, %v5309_v62  ;;  %5312 = vpow2.f32 %v4838_v3  ;;  %v3244_v61 = vpop.f32.mrf.mxu3 }
 0xdda   :  { %v3283_v34 = vpop.f32.mrf.mxu2  ;;  %v3360_v61 = vrot.slane %v7329_v14, 6 }
 0xddb   :  { %5314 = vrcp.f32 %v3323_v15  ;;  %v3335_v52 = vand.u32 2147483648, %v3323_v15  ;;  %vm3329_vm14 = vweird.f32 %v3323_v15  ;;  %v3333_v18 = vand.u32 2147483647, %v3323_v15 }
 0xddd   :  { %v3336_v5 = vor.u32 1.1754944e-38, %v3335_v52  ;;  %vm3334_vm1 = vcmp.eq.f32.partialorder %v3333_v18, 8.507059e+37 }
 0xdde   :  { %v5311_v49 = vpop.eup %5310 }
 0xddf   :  { %v5313_v12 = vpop.eup %5312  ;;  %v3304_v21 = vadd.f32 1.0, %v5311_v49 }
 0xde0   :  { %v3343_v25 = vadd.f32 1.0, %v5313_v12 }
 0xde1   :  { %v5315_v1 = vpop.eup %5314  ;;  %5316 = vrcp.f32 %v3304_v21  ;;  %v3316_v41 = vand.u32 2147483648, %v3304_v21  ;;  %v3314_v60 = vand.u32 2147483647, %v3304_v21  ;;  %vm3310_vm2 = vweird.f32 %v3304_v21 }
 0xde2   :  { %v3325_v58 = vmul.f32 %v5315_v1, %v3323_v15  ;;  %5318 = vrcp.f32 %v3343_v25  ;;  %vm3330_vm13 = vweird.f32 %v5315_v1  ;;  %vm3349_vm6 = vweird.f32 %v3343_v25 }
 0xde3   :  { %vm3331_vm15 = vmor %vm3329_vm14, %vm3330_vm13  ;;  %5320 = vtanh.f32 %v3299_v13  ;;  %v3317_v62 = vor.u32 1.1754944e-38, %v3316_v41  ;;  %vm3315_vm4 = vcmp.eq.f32.partialorder %v3314_v60, 8.507059e+37 }
 0xde4   :  { %v3326_v57 = vsub.f32 1.0, %v3325_v58 }
 0xde6   :  { %v3327_v37 = vmul.f32 %v5315_v1, %v3326_v57 }
 0xde7   :  { %v5317_v43 = vpop.eup %5316 }
 0xde8   :  { %v5319_v32 = vpop.eup %5318  ;;  %v3328_v10 = vadd.f32 %v5315_v1, %v3327_v37  ;;  %v3306_v56 = vmul.f32 %v5317_v43, %v3304_v21  ;;  %vm3311_vm0 = vweird.f32 %v5317_v43  ;;  %v3355_v37 = vand.u32 2147483648, %v3343_v25 }
 0xde9   :  { %v3345_v50 = vmul.f32 %v5319_v32, %v3343_v25  ;;  %vm3312_vm3 = vmor %vm3310_vm2, %vm3311_vm0  ;;  %v5321_v15 = vpop.eup %5320  ;;  %vm3350_vm5 = vweird.f32 %v5319_v32  ;;  %v3353_v21 = vand.u32 2147483647, %v3343_v25  ;;  %v7672_v25 = vld [vmem:[#allocation7_spill] sm:$0xff] }
 0xdea   :  { %v3307_v33 = vsub.f32 1.0, %v3306_v56  ;;  %v3332_v27 = vsel %vm3331_vm15, %v5315_v1, %v3328_v10  ;;  %vm3351_vm7 = vmor %vm3349_vm6, %vm3350_vm5  ;;  %v3356_v10 = vor.u32 1.1754944e-38, %v3355_v37 }
 0xdeb   :  { %v3346_v36 = vsub.f32 1.0, %v3345_v50  ;;  %v3337_v3 = vsel %vm3334_vm1, %v3336_v5, %v3332_v27  ;;  %vm3354_vm9 = vcmp.eq.f32.partialorder %v3353_v21, 8.507059e+37 }
 0xdec   :  { %v3308_v45 = vmul.f32 %v5317_v43, %v3307_v33  ;;  %v3362_v58 = vmul.f32 %v3360_v61, %v3337_v3 }
 0xded   :  { %v3347_v12 = vmul.f32 %v5319_v32, %v3346_v36  ;;  %v7674_v36 = vld [vmem:[#allocation5_spill] sm:$0xff] }
 0xdee   :  { %v3309_v51 = vadd.f32 %v5317_v43, %v3308_v45  ;;  %v7673_v45 = vld [vmem:[#allocation4_spill] sm:$0xff] }
 0xdef   :  { %v3348_v57 = vadd.f32 %v5319_v32, %v3347_v12 }
 0xdf0   :  { %v3313_v34 = vsel %vm3312_vm3, %v5317_v43, %v3309_v51 }
 0xdf1   :  { %v3318_v49 = vsel %vm3315_vm4, %v3317_v62, %v3313_v34  ;;  %v3352_v13 = vsel %vm3351_vm7, %v5319_v32, %v3348_v57 }
 0xdf2   :  { %v3363_v1 = vmul.f32 %v5321_v15, %v3318_v49  ;;  %v3357_v43 = vsel %vm3354_vm9, %v3356_v10, %v3352_v13 }
 0xdf4   :  { %v7375_v44 = vadd.f32 %v3363_v1, %v3362_v58 }
 0xdf6   :  { %5322 = vtanh.f32 %v7375_v44 }
 0xdfc   :  { %v5323_v14 = vpop.eup %5322 }
 0xdfd   :  { %v3366_v56 = vmul.f32 %v5323_v14, %v3357_v43 }
 0xdff   :  { %v3367_v52 = vpack.c.bf16 %v3366_v56, %v3366_v56  ;;  %v7380_v50 = vsel %vm1766_vm8, %v7336_v53, %v3366_v56 }
 0xe01   :  { %v3369_v18 = vrot.slane %v3367_v52, 3  ;;  %v7675_v52 = vld [vmem:[#allocation2_spill] sm:$0xff] }
 0xe03   :  { %3379 = vmatmul.bf16.vlgmr.msra.gmra.mxu3 %v3369_v18  ;;  %3392 = vmatmul.bf16.vlgmr.msra.gmra.mxu0 %v3369_v18 }
 0xe04   :  { %3405 = vmatmul.bf16.vlgmr.msrb.gmra.mxu1 %v3369_v18  ;;  %3418 = vmatmul.bf16.vlgmr.msrb.gmra.mxu2 %v3369_v18 }
 0xe05   :  { %3632 = vmatpush.bf16.msra.mxu3 %v6847_v39  ;;  %3645 = vmatpush.bf16.msra.mxu0 %v6849_v42 }
 0xe06   :  { %3658 = vmatpush.bf16.msrb.mxu1 %v6860_v31  ;;  %3671 = vmatpush.bf16.msrb.mxu2 %v6873_v55 }
 0xe09   :  { %3633 = vmatpush.bf16.msra.mxu3 %v6875_v59  ;;  %3646 = vmatpush.bf16.msra.mxu0 %v6887_v9 }
 0xe0a   :  { %3659 = vmatpush.bf16.msrb.mxu1 %v6899_v63  ;;  %3672 = vmatpush.bf16.msrb.mxu2 %v6901_v22 }
 0xe0d   :  { %3634 = vmatpush.bf16.msra.mxu3 %v6914_v40  ;;  %3647 = vmatpush.bf16.msra.mxu0 %v6926_v4 }
 0xe0e   :  { %3660 = vmatpush.bf16.msrb.mxu1 %v6928_v54  ;;  %3673 = vmatpush.bf16.msrb.mxu2 %v6941_v48 }
 0xe11   :  { %3635 = vmatpush.bf16.msra.mxu3 %v6965_v26  ;;  %3648 = vmatpush.bf16.msra.mxu0 %v6967_v7 }
 0xe12   :  { %3661 = vmatpush.bf16.msrb.mxu1 %v6973_v47  ;;  %3674 = vmatpush.bf16.msrb.mxu2 %v6977_v38 }
 0xe15   :  { %3636 = vmatpush.bf16.msra.mxu3 %v6990_v2  ;;  %3649 = vmatpush.bf16.msra.mxu0 %v7002_v19 }
 0xe16   :  { %3662 = vmatpush.bf16.msrb.mxu1 %v7004_v23  ;;  %3675 = vmatpush.bf16.msrb.mxu2 %v7017_v46 }
 0xe19   :  { %3637 = vmatpush.bf16.msra.mxu3 %v7043_v35  ;;  %3650 = vmatpush.bf16.msra.mxu0 %v7045_v16 }
 0xe1a   :  { %3663 = vmatpush.bf16.msrb.mxu1 %v7056_v29  ;;  %3676 = vmatpush.bf16.msrb.mxu2 %v7069_v8 }
 0xe1d   :  { %3638 = vmatpush.bf16.msra.mxu3 %v7086_v17  ;;  %3651 = vmatpush.bf16.msra.mxu0 %v7088_v11 }
 0xe1e   :  { %3664 = vmatpush.bf16.msrb.mxu1 %v7097_v20  ;;  %3677 = vmatpush.bf16.msrb.mxu2 %v7106_v0 }
 0xe21   :  { %3639 = vmatpush.bf16.msra.mxu3 %v7122_v28  ;;  %3652 = vmatpush.bf16.msra.mxu0 %v7124_v30 }
 0xe22   :  { %3665 = vmatpush.bf16.msrb.mxu1 %v7130_v24  ;;  %3678 = vmatpush.bf16.msrb.mxu2 %v7133_v6 }
 0xe80   :  { %v3393_v53 = vpop.f32.mrf.mxu0 }
 0xe81   :  { %v3424_v32 = vadd.f32 %v3393_v53, %v7672_v25  ;;  %v3406_v33 = vpop.f32.mrf.mxu1 }
 0xe82   :  { %v3425_v18 = vadd.f32 %v3406_v33, %v7675_v52 }
 0xe83   :  { %v4840_v41 = vmul.f32 -1.442695, %v3424_v32 }
 0xe85   :  { %5324 = vpow2.f32 %v4840_v41 }
 0xe86   :  { %v3380_v27 = vpop.f32.mrf.mxu3 }
 0xe87   :  { %v3423_v60 = vadd.f32 %v3380_v27, %v7673_v45  ;;  %v3419_v5 = vpop.f32.mrf.mxu2 }
 0xe88   :  { %v3426_v51 = vadd.f32 %v3419_v5, %v7674_v36  ;;  %v3395_v3 = vpop.f32.mrf.mxu0 }
 0xe89   :  { %v4839_v62 = vmul.f32 -1.442695, %v3423_v60  ;;  %v3408_v61 = vpop.f32.mrf.mxu1 }
 0xe8a   :  { %v4841_v34 = vmul.f32 -1.442695, %v3426_v51 }
 0xe8b   :  { %v5325_v15 = vpop.eup %5324  ;;  %5326 = vpow2.f32 %v4839_v62 }
 0xe8c   :  { %v3449_v49 = vadd.f32 1.0, %v5325_v15  ;;  %5328 = vpow2.f32 %v4841_v34 }
 0xe8e   :  { %5330 = vrcp.f32 %v3449_v49  ;;  %v3382_v12 = vpop.f32.mrf.mxu3  ;;  %v3461_v27 = vand.u32 2147483648, %v3449_v49  ;;  %vm3455_vm13 = vweird.f32 %v3449_v49  ;;  %v3459_v5 = vand.u32 2147483647, %v3449_v49 }
 0xe8f   :  { %v3421_v58 = vpop.f32.mrf.mxu2 }
 0xe90   :  { %v3462_v15 = vor.u32 1.1754944e-38, %v3461_v27  ;;  %vm3460_vm0 = vcmp.eq.f32.partialorder %v3459_v5, 8.507059e+37 }
 0xe91   :  { %v5327_v1 = vpop.eup %5326 }
 0xe92   :  { %v5329_v57 = vpop.eup %5328  ;;  %v3430_v37 = vadd.f32 1.0, %v5327_v1 }
 0xe93   :  { %v3469_v21 = vadd.f32 1.0, %v5329_v57  ;;  %v3486_v57 = vrot.slane %v7375_v44, 6 }
 0xe94   :  { %v5331_v13 = vpop.eup %5330  ;;  %5332 = vrcp.f32 %v3430_v37  ;;  %v3442_v3 = vand.u32 2147483648, %v3430_v37  ;;  %v3440_v34 = vand.u32 2147483647, %v3430_v37  ;;  %vm3436_vm1 = vweird.f32 %v3430_v37 }
 0xe95   :  { %v3451_v10 = vmul.f32 %v5331_v13, %v3449_v49  ;;  %5334 = vrcp.f32 %v3469_v21  ;;  %vm3456_vm12 = vweird.f32 %v5331_v13  ;;  %v3481_v27 = vand.u32 2147483648, %v3469_v21 }
 0xe96   :  { %vm3457_vm14 = vmor %vm3455_vm13, %vm3456_vm12  ;;  %5336 = vtanh.f32 %v3425_v18  ;;  %v3443_v1 = vor.u32 1.1754944e-38, %v3442_v3  ;;  %vm3441_vm3 = vcmp.eq.f32.partialorder %v3440_v34, 8.507059e+37  ;;  %vm3475_vm5 = vweird.f32 %v3469_v21 }
 0xe97   :  { %v3452_v14 = vsub.f32 1.0, %v3451_v10  ;;  %v3482_v5 = vor.u32 1.1754944e-38, %v3481_v27 }
 0xe99   :  { %v3453_v43 = vmul.f32 %v5331_v13, %v3452_v14 }
 0xe9a   :  { %v5333_v56 = vpop.eup %5332 }
 0xe9b   :  { %v5335_v53 = vpop.eup %5334  ;;  %v3454_v32 = vadd.f32 %v5331_v13, %v3453_v43  ;;  %v3432_v41 = vmul.f32 %v5333_v56, %v3430_v37  ;;  %vm3437_vm15 = vweird.f32 %v5333_v56  ;;  %v3479_v37 = vand.u32 2147483647, %v3469_v21 }
 0xe9c   :  { %v3471_v60 = vmul.f32 %v5335_v53, %v3469_v21  ;;  %vm3438_vm2 = vmor %vm3436_vm1, %vm3437_vm15  ;;  %v5337_v49 = vpop.eup %5336  ;;  %vm3476_vm4 = vweird.f32 %v5335_v53 }
 0xe9d   :  { %v3433_v51 = vsub.f32 1.0, %v3432_v41  ;;  %v3458_v62 = vsel %vm3457_vm14, %v5331_v13, %v3454_v32  ;;  %vm3477_vm6 = vmor %vm3475_vm5, %vm3476_vm4  ;;  %vm3480_vm7 = vcmp.eq.f32.partialorder %v3479_v37, 8.507059e+37 }
 0xe9e   :  { %v3472_v12 = vsub.f32 1.0, %v3471_v60  ;;  %v3463_v58 = vsel %vm3460_vm0, %v3462_v15, %v3458_v62 }
 0xe9f   :  { %v3434_v61 = vmul.f32 %v5333_v56, %v3433_v51  ;;  %v3488_v18 = vmul.f32 %v3486_v57, %v3463_v58 }
 0xea0   :  { %v3473_v43 = vmul.f32 %v5335_v53, %v3472_v12 }
 0xea1   :  { %v3435_v33 = vadd.f32 %v5333_v56, %v3434_v61 }
 0xea2   :  { %v3474_v41 = vadd.f32 %v5335_v53, %v3473_v43 }
 0xea3   :  { %v3439_v10 = vsel %vm3438_vm2, %v5333_v56, %v3435_v33 }
 0xea4   :  { %v3444_v14 = vsel %vm3441_vm3, %v3443_v1, %v3439_v10  ;;  %v3478_v60 = vsel %vm3477_vm6, %v5335_v53, %v3474_v41 }
 0xea5   :  { %v3489_v13 = vmul.f32 %v5337_v49, %v3444_v14  ;;  %v3483_v56 = vsel %vm3480_vm7, %v3482_v5, %v3478_v60 }
 0xea7   :  { %v7419_v32 = vadd.f32 %v3489_v13, %v3488_v18 }
 0xea9   :  { %5338 = vtanh.f32 %v7419_v32  ;;  %v3621_v43 = vrot.slane %v7419_v32, 6 }
 0xeaf   :  { %v5339_v44 = vpop.eup %5338 }
 0xeb0   :  { %v7422_v51 = vmul.f32 %v5339_v44, %v3483_v56 }
 0xeb2   :  { %v3493_v3 = vpack.c.bf16 %v7422_v51, %v7422_v51 }
 0xeb4   :  { %3502 = vmatmul.bf16.vlgmr.msrb.gmra.mxu3 %v3493_v3  ;;  %3515 = vmatmul.bf16.vlgmr.msrb.gmra.mxu0 %v3493_v3 }
 0xeb5   :  { %3528 = vmatmul.bf16.vlgmr.msra.gmra.mxu1 %v3493_v3  ;;  %3541 = vmatmul.bf16.vlgmr.msra.gmra.mxu2 %v3493_v3 }
 0xeb6   :  { %3770 = vmatpush.bf16.msrb.mxu3 %v6847_v39  ;;  %3783 = vmatpush.bf16.msrb.mxu0 %v6849_v42 }
 0xeb7   :  { %3796 = vmatpush.bf16.msra.mxu1 %v6860_v31  ;;  %3809 = vmatpush.bf16.msra.mxu2 %v6873_v55 }
 0xeba   :  { %3771 = vmatpush.bf16.msrb.mxu3 %v6875_v59  ;;  %3784 = vmatpush.bf16.msrb.mxu0 %v6887_v9 }
 0xebb   :  { %3797 = vmatpush.bf16.msra.mxu1 %v6899_v63  ;;  %3810 = vmatpush.bf16.msra.mxu2 %v6901_v22 }
 0xebe   :  { %3772 = vmatpush.bf16.msrb.mxu3 %v6914_v40  ;;  %3785 = vmatpush.bf16.msrb.mxu0 %v6926_v4 }
 0xebf   :  { %3798 = vmatpush.bf16.msra.mxu1 %v6928_v54  ;;  %3811 = vmatpush.bf16.msra.mxu2 %v6941_v48 }
 0xec2   :  { %3773 = vmatpush.bf16.msrb.mxu3 %v6965_v26  ;;  %3786 = vmatpush.bf16.msrb.mxu0 %v6967_v7 }
 0xec3   :  { %3799 = vmatpush.bf16.msra.mxu1 %v6973_v47  ;;  %3812 = vmatpush.bf16.msra.mxu2 %v6977_v38 }
 0xec6   :  { %3774 = vmatpush.bf16.msrb.mxu3 %v6990_v2  ;;  %3787 = vmatpush.bf16.msrb.mxu0 %v7002_v19 }
 0xec7   :  { %3800 = vmatpush.bf16.msra.mxu1 %v7004_v23  ;;  %3813 = vmatpush.bf16.msra.mxu2 %v7017_v46 }
 0xeca   :  { %3775 = vmatpush.bf16.msrb.mxu3 %v7043_v35  ;;  %3788 = vmatpush.bf16.msrb.mxu0 %v7045_v16 }
 0xecb   :  { %3801 = vmatpush.bf16.msra.mxu1 %v7056_v29  ;;  %3814 = vmatpush.bf16.msra.mxu2 %v7069_v8 }
 0xece   :  { %3776 = vmatpush.bf16.msrb.mxu3 %v7086_v17  ;;  %3789 = vmatpush.bf16.msrb.mxu0 %v7088_v11 }
 0xecf   :  { %3802 = vmatpush.bf16.msra.mxu1 %v7097_v20  ;;  %3815 = vmatpush.bf16.msra.mxu2 %v7106_v0 }
 0xed2   :  { %3777 = vmatpush.bf16.msrb.mxu3 %v7122_v28  ;;  %3790 = vmatpush.bf16.msrb.mxu0 %v7124_v30 }
 0xed3   :  { %3803 = vmatpush.bf16.msra.mxu1 %v7130_v24  ;;  %3816 = vmatpush.bf16.msra.mxu2 %v7133_v6 }
 0xf31   :  { %v3516_v39 = vpop.f32.mrf.mxu0 }
 0xf32   :  { %v3551_v42 = vrot.slane %v3516_v39, 6  ;;  %v3529_v31 = vpop.f32.mrf.mxu1 }
 0xf33   :  { %v3552_v11 = vrot.slane %v3529_v31, 6 }
 0xf34   :  { %v3559_v55 = vadd.f32 %v3551_v42, %v7672_v25 }
 0xf35   :  { %v3560_v30 = vadd.f32 %v3552_v11, %v7675_v52 }
 0xf36   :  { %v4843_v59 = vmul.f32 -1.442695, %v3559_v55 }
 0xf37   :  { %v3503_v9 = vpop.f32.mrf.mxu3 }
 0xf38   :  { %5340 = vpow2.f32 %v4843_v59  ;;  %v3550_v63 = vrot.slane %v3503_v9, 6  ;;  %v3542_v22 = vpop.f32.mrf.mxu2 }
 0xf39   :  { %v3553_v40 = vrot.slane %v3542_v22, 6  ;;  %v3518_v4 = vpop.f32.mrf.mxu0 }
 0xf3a   :  { %v3558_v54 = vadd.f32 %v3550_v63, %v7673_v45  ;;  %v3531_v48 = vpop.f32.mrf.mxu1 }
 0xf3b   :  { %v3561_v26 = vadd.f32 %v3553_v40, %v7674_v36 }
 0xf3c   :  { %v4842_v7 = vmul.f32 -1.442695, %v3558_v54 }
 0xf3d   :  { %v4844_v47 = vmul.f32 -1.442695, %v3561_v26 }
 0xf3e   :  { %v5341_v38 = vpop.eup %5340  ;;  %5342 = vpow2.f32 %v4842_v7 }
 0xf3f   :  { %v3584_v2 = vadd.f32 1.0, %v5341_v38  ;;  %5344 = vpow2.f32 %v4844_v47  ;;  %v3505_v19 = vpop.f32.mrf.mxu3 }
 0xf40   :  { %v3544_v23 = vpop.f32.mrf.mxu2 }
 0xf41   :  { %5346 = vrcp.f32 %v3584_v2  ;;  %v3596_v53 = vand.u32 2147483648, %v3584_v2  ;;  %vm3590_vm12 = vweird.f32 %v3584_v2  ;;  %v3594_v61 = vand.u32 2147483647, %v3584_v2 }
 0xf43   :  { %v3597_v1 = vor.u32 1.1754944e-38, %v3596_v53  ;;  %vm3595_vm15 = vcmp.eq.f32.partialorder %v3594_v61, 8.507059e+37 }
 0xf44   :  { %v5343_v46 = vpop.eup %5342 }
 0xf45   :  { %v5345_v35 = vpop.eup %5344  ;;  %v3565_v16 = vadd.f32 1.0, %v5343_v46 }
 0xf46   :  { %v3604_v29 = vadd.f32 1.0, %v5345_v35 }
 0xf47   :  { %v5347_v8 = vpop.eup %5346  ;;  %5348 = vrcp.f32 %v3565_v16  ;;  %v3577_v15 = vand.u32 2147483648, %v3565_v16  ;;  %v3575_v58 = vand.u32 2147483647, %v3565_v16  ;;  %vm3571_vm0 = vweird.f32 %v3565_v16 }
 0xf48   :  { %v3586_v17 = vmul.f32 %v5347_v8, %v3584_v2  ;;  %5350 = vrcp.f32 %v3604_v29  ;;  %vm3591_vm9 = vweird.f32 %v5347_v8  ;;  %v3616_v56 = vand.u32 2147483648, %v3604_v29 }
 0xf49   :  { %vm3592_vm13 = vmor %vm3590_vm12, %vm3591_vm9  ;;  %5352 = vtanh.f32 %v3560_v30  ;;  %v3578_v14 = vor.u32 1.1754944e-38, %v3577_v15  ;;  %vm3576_vm2 = vcmp.eq.f32.partialorder %v3575_v58, 8.507059e+37  ;;  %vm3610_vm4 = vweird.f32 %v3604_v29 }
 0xf4a   :  { %v3587_v20 = vsub.f32 1.0, %v3586_v17  ;;  %v3614_v3 = vand.u32 2147483647, %v3604_v29  ;;  %v3617_v42 = vor.u32 1.1754944e-38, %v3616_v56 }
 0xf4c   :  { %v3588_v0 = vmul.f32 %v5347_v8, %v3587_v20  ;;  %vm3615_vm6 = vcmp.eq.f32.partialorder %v3614_v3, 8.507059e+37 }
 0xf4d   :  { %v5349_v28 = vpop.eup %5348 }
 0xf4e   :  { %v5351_v24 = vpop.eup %5350  ;;  %v3589_v6 = vadd.f32 %v5347_v8, %v3588_v0  ;;  %v3567_v21 = vmul.f32 %v5349_v28, %v3565_v16  ;;  %vm3572_vm14 = vweird.f32 %v5349_v28 }
 0xf4f   :  { %v3606_v62 = vmul.f32 %v5351_v24, %v3604_v29  ;;  %vm3573_vm1 = vmor %vm3571_vm0, %vm3572_vm14  ;;  %v5353_v13 = vpop.eup %5352  ;;  %vm3611_vm3 = vweird.f32 %v5351_v24 }
 0xf50   :  { %v3568_v34 = vsub.f32 1.0, %v3567_v21  ;;  %v3593_v12 = vsel %vm3592_vm13, %v5347_v8, %v3589_v6  ;;  %vm3612_vm5 = vmor %vm3610_vm4, %vm3611_vm3 }
 0xf51   :  { %v3607_v57 = vsub.f32 1.0, %v3606_v62  ;;  %v3598_v49 = vsel %vm3595_vm15, %v3597_v1, %v3593_v12 }
 0xf52   :  { %v3569_v33 = vmul.f32 %v5349_v28, %v3568_v34  ;;  %v3623_v37 = vmul.f32 %v3621_v43, %v3598_v49 }
 0xf53   :  { %v3608_v27 = vmul.f32 %v5351_v24, %v3607_v57 }
 0xf54   :  { %v3570_v10 = vadd.f32 %v5349_v28, %v3569_v33 }
 0xf55   :  { %v3609_v44 = vadd.f32 %v5351_v24, %v3608_v27 }
 0xf56   :  { %v3574_v18 = vsel %vm3573_vm1, %v5349_v28, %v3570_v10 }
 0xf57   :  { %v3579_v41 = vsel %vm3576_vm2, %v3578_v14, %v3574_v18  ;;  %v3613_v39 = vsel %vm3612_vm5, %v5351_v24, %v3609_v44 }
 0xf58   :  { %v3624_v60 = vmul.f32 %v5353_v13, %v3579_v41  ;;  %v3618_v31 = vsel %vm3615_vm6, %v3617_v42, %v3613_v39 }
 0xf5a   :  { %v7463_v5 = vadd.f32 %v3624_v60, %v3623_v37 }
 0xf5c   :  { %5354 = vtanh.f32 %v7463_v5  ;;  %v3759_v60 = vrot.slane %v7463_v5, 6 }
 0xf62   :  { %v5355_v32 = vpop.eup %5354 }
 0xf63   :  { %v7466_v55 = vmul.f32 %v5355_v32, %v3618_v31 }
 0xf65   :  { %v3628_v59 = vpack.c.bf16 %v7466_v55, %v7466_v55 }
 0xf67   :  { %v3630_v9 = vrot.slane %v3628_v59, 1 }
 0xf69   :  { %3640 = vmatmul.bf16.vlgmr.msra.gmra.mxu3 %v3630_v9  ;;  %3653 = vmatmul.bf16.vlgmr.msra.gmra.mxu0 %v3630_v9 }
 0xf6a   :  { %3666 = vmatmul.bf16.vlgmr.msrb.gmra.mxu1 %v3630_v9  ;;  %3679 = vmatmul.bf16.vlgmr.msrb.gmra.mxu2 %v3630_v9 }
 0xfe6   :  { %v3654_v63 = vpop.f32.mrf.mxu0 }
 0xfe7   :  { %v3689_v22 = vrot.slane %v3654_v63, 4  ;;  %v3667_v40 = vpop.f32.mrf.mxu1 }
 0xfe8   :  { %v3690_v6 = vrot.slane %v3667_v40, 4 }
 0xfe9   :  { %v3697_v4 = vadd.f32 %v3689_v22, %v7672_v25 }
 0xfea   :  { %v3698_v61 = vadd.f32 %v3690_v6, %v7675_v52 }
 0xfeb   :  { %v4846_v54 = vmul.f32 -1.442695, %v3697_v4 }
 0xfec   :  { %v3641_v48 = vpop.f32.mrf.mxu3 }
 0xfed   :  { %5356 = vpow2.f32 %v4846_v54  ;;  %v3688_v26 = vrot.slane %v3641_v48, 4  ;;  %v3680_v7 = vpop.f32.mrf.mxu2  ;;  %v3907_v48 = vsel %vm1762_vm10, %v7422_v51, %v7466_v55  ;;  %v5106_v51 = vld [vmem:[%s7623_s17 + $0x74] sm:$0xf] }
 0xfee   :  { %v3691_v47 = vrot.slane %v3680_v7, 4  ;;  %v3656_v38 = vpop.f32.mrf.mxu0 }
 0xfef   :  { %v3696_v2 = vadd.f32 %v3688_v26, %v7673_v45  ;;  %v3669_v19 = vpop.f32.mrf.mxu1  ;;  %v4909_v38 = vld [vmem:[%s7623_s17 + $0x70] sm:$0xf] }
 0xff0   :  { %v3699_v23 = vadd.f32 %v3691_v47, %v7674_v36  ;;  %v4911_v19 = vld [vmem:[%s7623_s17 + $0x78] sm:$0xf0] }
 0xff1   :  { %v4845_v46 = vmul.f32 -1.442695, %v3696_v2  ;;  %v5107_v2 = vld [vmem:[%s7623_s17 + $0x74] sm:$0xf0] }
 0xff2   :  { %v4847_v35 = vmul.f32 -1.442695, %v3699_v23  ;;  %v4910_v55 = vor.u32 %v5107_v2, %v4909_v38  ;;  %v4914_v23 = vor.u32 %v5106_v51, %v4911_v19  ;;  %v4853_v2 = vld [vmem:[%s7623_s17] sm:$0xf]  ;;  %v5093_v51 = vld [vmem:[%s7623_s17 + $0x4] sm:$0xf0] }
 0xff3   :  { %v5357_v16 = vpop.eup %5356  ;;  %5358 = vpow2.f32 %v4845_v46  ;;  %v4901_v46 = vld [vmem:[%s7623_s17 + $0x60] sm:$0xf]  ;;  %v4855_v19 = vld [vmem:[%s7623_s17 + $0x8] sm:$0xf0] }
 0xff4   :  { %v3722_v29 = vadd.f32 1.0, %v5357_v16  ;;  %5360 = vpow2.f32 %v4847_v35  ;;  %v3643_v8 = vpop.f32.mrf.mxu3  ;;  %4013 = vmatpush.bf16.msra.mxu3 %v4910_v55  ;;  %4027 = vmatpush.bf16.msra.mxu0 %v4914_v23  ;;  %v5105_v35 = vld [vmem:[%s7623_s17 + $0x64] sm:$0xf0]  ;;  %v5104_v16 = vld [vmem:[%s7623_s17 + $0x64] sm:$0xf]  ;;  %v4854_v23 = vor.u32 %v5093_v51, %v4853_v2 }
 0xff5   :  { %v3682_v17 = vpop.f32.mrf.mxu2  ;;  %v4903_v8 = vld [vmem:[%s7623_s17 + $0x68] sm:$0xf0]  ;;  %v5092_v55 = vld [vmem:[%s7623_s17 + $0x4] sm:$0xf] }
 0xff6   :  { %5362 = vrcp.f32 %v3722_v29  ;;  %v3734_v33 = vand.u32 2147483648, %v3722_v29  ;;  %vm3728_vm9 = vweird.f32 %v3722_v29  ;;  %v3732_v1 = vand.u32 2147483647, %v3722_v29 }
 0xff7   :  { %v4906_v17 = vor.u32 %v5104_v16, %v4903_v8 }
 0xff8   :  { %v3735_v18 = vor.u32 1.1754944e-38, %v3734_v33  ;;  %vm3733_vm14 = vcmp.eq.f32.partialorder %v3732_v1, 8.507059e+37  ;;  %v4887_v33 = vld [vmem:[%s7623_s17 + $0x48] sm:$0xf0] }
 0xff9   :  { %v5359_v11 = vpop.eup %5358  ;;  %4028 = vmatpush.bf16.msra.mxu0 %v4906_v17 }
 0xffa   :  { %v5361_v20 = vpop.eup %5360  ;;  %v3703_v0 = vadd.f32 1.0, %v5359_v11  ;;  %v4893_v11 = vld [vmem:[%s7623_s17 + $0x50] sm:$0xf] }
 0xffb   :  { %v3742_v28 = vadd.f32 1.0, %v5361_v20  ;;  %v5103_v20 = vld [vmem:[%s7623_s17 + $0x54] sm:$0xf0] }
 0xffc   :  { %v5363_v30 = vpop.eup %5362  ;;  %5364 = vrcp.f32 %v3703_v0  ;;  %v3715_v10 = vand.u32 2147483648, %v3703_v0  ;;  %v3713_v43 = vand.u32 2147483647, %v3703_v0  ;;  %vm3709_vm15 = vweird.f32 %v3703_v0 }
 0xffd   :  { %v3724_v24 = vmul.f32 %v5363_v30, %v3722_v29  ;;  %5366 = vrcp.f32 %v3742_v28  ;;  %vm3729_vm7 = vweird.f32 %v5363_v30  ;;  %v3754_v9 = vand.u32 2147483648, %v3742_v28 }
 0xffe   :  { %vm3730_vm12 = vmor %vm3728_vm9, %vm3729_vm7  ;;  %5368 = vtanh.f32 %v3698_v61  ;;  %v3716_v37 = vor.u32 1.1754944e-38, %v3715_v10  ;;  %vm3714_vm1 = vcmp.eq.f32.partialorder %v3713_v43, 8.507059e+37  ;;  %vm3748_vm3 = vweird.f32 %v3742_v28  ;;  %v4885_v61 = vld [vmem:[%s7623_s17 + $0x40] sm:$0xf] }
 0xfff   :  { %v3725_v21 = vsub.f32 1.0, %v3724_v24  ;;  %v3752_v63 = vand.u32 2147483647, %v3742_v28  ;;  %v3755_v40 = vor.u32 1.1754944e-38, %v3754_v9  ;;  %v4902_v29 = vor.u32 %v5105_v35, %v4901_v46  ;;  %v4895_v24 = vld [vmem:[%s7623_s17 + $0x58] sm:$0xf0] }
0x1000   :  { %v4858_v35 = vor.u32 %v5092_v55, %v4855_v19 }
0x1001   :  { %v3726_v53 = vmul.f32 %v5363_v30, %v3725_v21  ;;  %vm3753_vm5 = vcmp.eq.f32.partialorder %v3752_v63, 8.507059e+37  ;;  %4014 = vmatpush.bf16.msra.mxu3 %v4902_v29 }
0x1002   :  { %v5365_v62 = vpop.eup %5364 }
0x1003   :  { %v5367_v34 = vpop.eup %5366  ;;  %v3727_v15 = vadd.f32 %v5363_v30, %v3726_v53  ;;  %v3705_v12 = vmul.f32 %v5365_v62, %v3703_v0  ;;  %vm3710_vm13 = vweird.f32 %v5365_v62  ;;  %v5102_v0 = vld [vmem:[%s7623_s17 + $0x54] sm:$0xf] }
0x1004   :  { %v3744_v58 = vmul.f32 %v5367_v34, %v3742_v28  ;;  %vm3711_vm0 = vmor %vm3709_vm15, %vm3710_vm13  ;;  %v5369_v56 = vpop.eup %5368  ;;  %vm3749_vm2 = vweird.f32 %v5367_v34  ;;  %v4898_v53 = vor.u32 %v5102_v0, %v4895_v24 }
0x1005   :  { %v3706_v57 = vsub.f32 1.0, %v3705_v12  ;;  %v3731_v49 = vsel %vm3730_vm12, %v5363_v30, %v3727_v15  ;;  %vm3750_vm4 = vmor %vm3748_vm3, %vm3749_vm2  ;;  %v4894_v30 = vor.u32 %v5103_v20, %v4893_v11  ;;  %v5100_v15 = vld [vmem:[%s7623_s17 + $0x44] sm:$0xf] }
0x1006   :  { %v3745_v13 = vsub.f32 1.0, %v3744_v58  ;;  %v3736_v27 = vsel %vm3733_vm14, %v3735_v18, %v3731_v49  ;;  %4029 = vmatpush.bf16.msra.mxu0 %v4898_v53  ;;  %v4877_v49 = vld [vmem:[%s7623_s17 + $0x30] sm:$0xf] }
0x1007   :  { %v3707_v14 = vmul.f32 %v5365_v62, %v3706_v57  ;;  %v3761_v42 = vmul.f32 %v3759_v60, %v3736_v27  ;;  %4015 = vmatpush.bf16.msra.mxu3 %v4894_v30  ;;  %v4879_v27 = vld [vmem:[%s7623_s17 + $0x38] sm:$0xf0] }
0x1008   :  { %v3746_v39 = vmul.f32 %v5367_v34, %v3745_v13 }
0x1009   :  { %v3708_v41 = vadd.f32 %v5365_v62, %v3707_v14  ;;  %v5099_v14 = vld [vmem:[%s7623_s17 + $0x34] sm:$0xf0] }
0x100a   :  { %v3747_v59 = vadd.f32 %v5367_v34, %v3746_v39  ;;  %v4878_v13 = vor.u32 %v5099_v14, %v4877_v49  ;;  %v4869_v39 = vld [vmem:[%s7623_s17 + $0x20] sm:$0xf] }
0x100b   :  { %v3712_v44 = vsel %vm3711_vm0, %v5365_v62, %v3708_v41  ;;  %v5098_v41 = vld [vmem:[%s7623_s17 + $0x34] sm:$0xf] }
0x100c   :  { %v3717_v3 = vsel %vm3714_vm1, %v3716_v37, %v3712_v44  ;;  %v3751_v22 = vsel %vm3750_vm4, %v5367_v34, %v3747_v59  ;;  %v5101_v34 = vld [vmem:[%s7623_s17 + $0x44] sm:$0xf0]  ;;  %v4882_v44 = vor.u32 %v5098_v41, %v4879_v27 }
0x100d   :  { %v3762_v32 = vmul.f32 %v5369_v56, %v3717_v3  ;;  %v3756_v4 = vsel %vm3753_vm5, %v3755_v40, %v3751_v22  ;;  %v4886_v12 = vor.u32 %v5101_v34, %v4885_v61  ;;  %v4861_v22 = vld [vmem:[%s7623_s17 + $0x10] sm:$0xf]  ;;  %v5095_v40 = vld [vmem:[%s7623_s17 + $0x14] sm:$0xf0] }
0x100f   :  { %v7475_v31 = vadd.f32 %v3762_v32, %v3761_v42  ;;  %4016 = vmatpush.bf16.msra.mxu3 %v4886_v12  ;;  %v5097_v42 = vld [vmem:[%s7623_s17 + $0x24] sm:$0xf0] }
0x1010   :  { %v4870_v59 = vor.u32 %v5097_v42, %v4869_v39 }
0x1011   :  { %5370 = vtanh.f32 %v7475_v31  ;;  %v3897_v14 = vrot.slane %v7475_v31, 6 }
0x1013   :  { %4017 = vmatpush.bf16.msra.mxu3 %v4878_v13 }
0x1017   :  { %v5371_v5 = vpop.eup %5370  ;;  %4018 = vmatpush.bf16.msra.mxu3 %v4870_v59 }
0x1018   :  { %v3765_v54 = vmul.f32 %v5371_v5, %v3756_v4  ;;  %v5094_v5 = vld [vmem:[%s7623_s17 + $0x14] sm:$0xf] }
0x101a   :  { %v3766_v26 = vpack.c.bf16 %v3765_v54, %v3765_v54  ;;  %v7482_v7 = vsel %vm1764_vm11, %v3907_v48, %v3765_v54  ;;  %v4862_v48 = vor.u32 %v5095_v40, %v4861_v22 }
0x101c   :  { %v3768_v47 = vrot.slane %v3766_v26, 2  ;;  %v4863_v26 = vld [vmem:[%s7623_s17 + $0x18] sm:$0xf0]  ;;  %4019 = vmatpush.bf16.msra.mxu3 %v4862_v48 }
0x101d   :  { %v4866_v38 = vor.u32 %v5094_v5, %v4863_v26 }
0x101e   :  { %3778 = vmatmul.bf16.vlgmr.msrb.gmra.mxu3 %v3768_v47  ;;  %3791 = vmatmul.bf16.vlgmr.msrb.gmra.mxu0 %v3768_v47 }
0x101f   :  { %3804 = vmatmul.bf16.vlgmr.msra.gmra.mxu1 %v3768_v47  ;;  %3817 = vmatmul.bf16.vlgmr.msra.gmra.mxu2 %v3768_v47 }
0x1020   :  { %4020 = vmatpush.bf16.msra.mxu3 %v4854_v23 }
0x109b   :  { %v3792_v28 = vpop.f32.mrf.mxu0 }
0x109c   :  { %v3827_v6 = vrot.slane %v3792_v28, 2  ;;  %v7520_v21 = vpop.f32.mrf.mxu1 }
0x109d   :  { %v3828_v20 = vrot.slane %v7520_v21, 2 }
0x109e   :  { %v3835_v62 = vadd.f32 %v3827_v6, %v7672_v25  ;;  %v4890_v25 = vor.u32 %v5100_v15, %v4887_v33 }
0x109f   :  { %v3836_v24 = vadd.f32 %v3828_v20, %v7675_v52 }
0x10a0   :  { %v4849_v58 = vmul.f32 -1.442695, %v3835_v62  ;;  %4030 = vmatpush.bf16.msra.mxu0 %v4890_v25 }
0x10a1   :  { %v3779_v1 = vpop.f32.mrf.mxu3 }
0x10a2   :  { %5372 = vpow2.f32 %v4849_v58  ;;  %v3826_v57 = vrot.slane %v3779_v1, 2  ;;  %v3818_v10 = vpop.f32.mrf.mxu2 }
0x10a3   :  { %v3829_v43 = vrot.slane %v3818_v10, 2  ;;  %v3794_v18 = vpop.f32.mrf.mxu0 }
0x10a4   :  { %v3834_v37 = vadd.f32 %v3826_v57, %v7673_v45  ;;  %v3807_v60 = vpop.f32.mrf.mxu1  ;;  %4031 = vmatpush.bf16.msra.mxu0 %v4882_v44  ;;  %v5096_v45 = vld [vmem:[%s7623_s17 + $0x24] sm:$0xf] }
0x10a5   :  { %v3837_v56 = vadd.f32 %v3829_v43, %v7674_v36  ;;  %v4871_v36 = vld [vmem:[%s7623_s17 + $0x28] sm:$0xf0] }
0x10a6   :  { %v4848_v3 = vmul.f32 -1.442695, %v3834_v37  ;;  %v4874_v63 = vor.u32 %v5096_v45, %v4871_v36 }
0x10a7   :  { %v4850_v32 = vmul.f32 -1.442695, %v3837_v56 }
0x10a8   :  { %v5373_v9 = vpop.eup %5372  ;;  %5374 = vpow2.f32 %v4848_v3  ;;  %4032 = vmatpush.bf16.msra.mxu0 %v4874_v63 }
0x10a9   :  { %v3860_v4 = vadd.f32 1.0, %v5373_v9  ;;  %5376 = vpow2.f32 %v4850_v32  ;;  %v3781_v54 = vpop.f32.mrf.mxu3  ;;  %v3927_v9 = vld [vmem:[%s7624_s18] sm:$0x3] }
0x10aa   :  { %v3820_v47 = vpop.f32.mrf.mxu2  ;;  %v3930_v22 = vperm.slane %v3927_v9, 1  ;;  %v3929_v40 = vperm.slane %v3927_v9, 0 }
0x10ab   :  { %5378 = vrcp.f32 %v3860_v4  ;;  %v3872_v61 = vand.u32 2147483648, %v3860_v4  ;;  %vm3866_vm11 = vweird.f32 %v3860_v4  ;;  %v3870_v15 = vand.u32 2147483647, %v3860_v4 }
0x10ac   :  { %4033 = vmatpush.bf16.msra.mxu0 %v4866_v38 }
0x10ad   :  { %v3873_v1 = vor.u32 1.1754944e-38, %v3872_v61  ;;  %vm3871_vm9 = vcmp.eq.f32.partialorder %v3870_v15, 8.507059e+37 }
0x10ae   :  { %v5375_v46 = vpop.eup %5374 }
0x10af   :  { %v5377_v16 = vpop.eup %5376  ;;  %v3841_v29 = vadd.f32 1.0, %v5375_v46 }
0x10b0   :  { %v3880_v8 = vadd.f32 1.0, %v5377_v16  ;;  %4034 = vmatpush.bf16.msra.mxu0 %v4858_v35 }
0x10b1   :  { %v5379_v17 = vpop.eup %5378  ;;  %5380 = vrcp.f32 %v3841_v29  ;;  %v3853_v33 = vand.u32 2147483648, %v3841_v29  ;;  %v3851_v21 = vand.u32 2147483647, %v3841_v29  ;;  %vm3847_vm12 = vweird.f32 %v3841_v29 }
0x10b2   :  { %v3862_v11 = vmul.f32 %v5379_v17, %v3860_v4  ;;  %5382 = vrcp.f32 %v3880_v8  ;;  %vm3867_vm10 = vweird.f32 %v5379_v17  ;;  %v3892_v56 = vand.u32 2147483648, %v3880_v8 }
0x10b3   :  { %vm3868_vm6 = vmor %vm3866_vm11, %vm3867_vm10  ;;  %5384 = vtanh.f32 %v3836_v24  ;;  %v3854_v49 = vor.u32 1.1754944e-38, %v3853_v33  ;;  %vm3852_vm14 = vcmp.eq.f32.partialorder %v3851_v21, 8.507059e+37  ;;  %vm3886_vm0 = vweird.f32 %v3880_v8 }
0x10b4   :  { %v3863_v0 = vsub.f32 1.0, %v3862_v11  ;;  %v3890_v3 = vand.u32 2147483647, %v3880_v8  ;;  %v3893_v42 = vor.u32 1.1754944e-38, %v3892_v56 }
0x10b6   :  { %v3864_v28 = vmul.f32 %v5379_v17, %v3863_v0  ;;  %vm3891_vm2 = vcmp.eq.f32.partialorder %v3890_v3, 8.507059e+37 }
0x10b7   :  { %v5381_v30 = vpop.eup %5380 }
0x10b8   :  { %v5383_v6 = vpop.eup %5382  ;;  %v3865_v53 = vadd.f32 %v5379_v17, %v3864_v28  ;;  %v3843_v62 = vmul.f32 %v5381_v30, %v3841_v29  ;;  %vm3848_vm7 = vweird.f32 %v5381_v30 }
0x10b9   :  { %v3882_v34 = vmul.f32 %v5383_v6, %v3880_v8  ;;  %vm3849_vm13 = vmor %vm3847_vm12, %vm3848_vm7  ;;  %v5385_v18 = vpop.eup %5384  ;;  %vm3887_vm15 = vweird.f32 %v5383_v6 }
0x10ba   :  { %v3844_v12 = vsub.f32 1.0, %v3843_v62  ;;  %v3869_v58 = vsel %vm3868_vm6, %v5379_v17, %v3865_v53  ;;  %vm3888_vm1 = vmor %vm3886_vm0, %vm3887_vm15 }
0x10bb   :  { %v3883_v57 = vsub.f32 1.0, %v3882_v34  ;;  %v3874_v10 = vsel %vm3871_vm9, %v3873_v1, %v3869_v58 }
0x10bc   :  { %v3845_v25 = vmul.f32 %v5381_v30, %v3844_v12  ;;  %v3899_v27 = vmul.f32 %v3897_v14, %v3874_v10 }
0x10bd   :  { %v3884_v41 = vmul.f32 %v5383_v6, %v3883_v57 }
0x10be   :  { %v3846_v52 = vadd.f32 %v5381_v30, %v3845_v25 }
0x10bf   :  { %v3885_v44 = vadd.f32 %v5383_v6, %v3884_v41 }
0x10c0   :  { %v3850_v43 = vsel %vm3849_vm13, %v5381_v30, %v3846_v52 }
0x10c1   :  { %v3855_v13 = vsel %vm3852_vm14, %v3854_v49, %v3850_v43  ;;  %v3889_v39 = vsel %vm3888_vm1, %v5383_v6, %v3885_v44 }
0x10c2   :  { %v3900_v37 = vmul.f32 %v5385_v18, %v3855_v13  ;;  %v3894_v31 = vsel %vm3891_vm2, %v3893_v42, %v3889_v39 }
0x10c4   :  { %v3901_v60 = vadd.f32 %v3900_v37, %v3899_v27 }
0x10c6   :  { %5386 = vtanh.f32 %v3901_v60 }
0x10cc   :  { %v5387_v32 = vpop.eup %5386 }
0x10cd   :  { %v3903_v59 = vmul.f32 %v5387_v32, %v3894_v31 }
0x10cf   :  { %v3909_v45 = vsel %vm1766_vm8, %v7482_v7, %v3903_v59 }
0x10d0   :  { %v3910_v36 = vpack.c.bf16 %v3909_v45, %v7380_v50 }
0x10d2   :  { %4021 = vmatmul.bf16.vlgmr.msra.gmra.mxu3 %v3910_v36  ;;  %4035 = vmatmul.bf16.vlgmr.msra.gmra.mxu0 %v3910_v36 }
0x114f   :  { %v4036_v63 = vpop.f32.mrf.mxu0 }
0x1150   :  { %v4037_v4 = vadd.f32 %v4036_v63, %v3930_v22 }
0x1155   :  { %v4022_v5 = vpop.f32.mrf.mxu3 }
0x1156   :  { %v4023_v54 = vadd.f32 %v4022_v5, %v3929_v40 }
0x1157   :  { %v4038_v26 = vpop.f32.mrf.mxu0 }
0x1158   :  { %v4041_v48 = vmax.f32 %v4023_v54, %v4037_v4  ;;  %v4039_v38 = vadd.f32 %v4038_v26, %v3930_v22 }
0x115a   :  { %4042 = vmax.xlane.f32.xlu2 %v4041_v48 }
0x115d   :  { %v4024_v47 = vpop.f32.mrf.mxu3 }
0x115e   :  { %v4025_v7 = vadd.f32 %v4024_v47, %v3929_v40 }
0x1160   :  { %v4044_v2 = vmax.f32 %v4025_v7, %v4039_v38 }
0x1162   :  { %4045 = vmax.xlane.f32.xlu1 %v4044_v2 }
0x11cd   :  { %v4043_v50 = vpop.xlane.xlu2 %4042 }
0x11ce   :  { %v4047_v51 = vsub.f32 %v4023_v54, %v4043_v50  ;;  %v4048_v55 = vsub.f32 %v4037_v4, %v4043_v50 }
0x11d0   :  { %v4051_v19 = vmul.f32 1.442695, %v4047_v51  ;;  %v4053_v23 = vmul.f32 1.442695, %v4048_v55 }
0x11d2   :  { %5388 = vpow2.f32 %v4051_v19 }
0x11d3   :  { %5390 = vpow2.f32 %v4053_v23 }
0x11d5   :  { %v4046_v46 = vpop.xlane.xlu1 %4045 }
0x11d6   :  { %v4049_v35 = vsub.f32 %v4025_v7, %v4046_v46  ;;  %v4050_v16 = vsub.f32 %v4039_v38, %v4046_v46 }
0x11d8   :  { %v5389_v29 = vpop.eup %5388  ;;  %v4055_v8 = vmul.f32 1.442695, %v4049_v35  ;;  %v4057_v17 = vmul.f32 1.442695, %v4050_v16 }
0x11d9   :  { %v5391_v11 = vpop.eup %5390 }
0x11da   :  { %5392 = vpow2.f32 %v4055_v8  ;;  %v4059_v20 = vadd.f32 %v5391_v11, %v5389_v29 }
0x11db   :  { %5394 = vpow2.f32 %v4057_v17 }
0x11dc   :  { %4060 = vadd.xlane.f32.xlu2 %v4059_v20 }
0x11e0   :  { %v5393_v0 = vpop.eup %5392 }
0x11e1   :  { %v5395_v28 = vpop.eup %5394 }
0x11e2   :  { %v4062_v30 = vadd.f32 %v5395_v28, %v5393_v0 }
0x11e4   :  { %4063 = vadd.xlane.f32.xlu1 %v4062_v30 }
0x124f   :  { %v4061_v24 = vpop.xlane.xlu2 %4060 }
0x1250   :  { %5396 = vlog2.f32 %v4061_v24 }
0x1256   :  { %v5397_v6 = vpop.eup %5396 }
0x1257   :  { %v4066_v53 = vmul.f32 0.6931472, %v5397_v6  ;;  %v4064_v62 = vpop.xlane.xlu1 %4063 }
0x1258   :  { %5398 = vlog2.f32 %v4064_v62 }
0x1259   :  { %v4069_v61 = vsub.f32 %v4047_v51, %v4066_v53  ;;  %v4070_v34 = vsub.f32 %v4048_v55, %v4066_v53 }
0x125b   :  { %4073 = vst [vmem:[%s7625_s19] sm:$0xff] %v4069_v61 }
0x125c   :  { %4074 = vst [vmem:[%s7625_s19 + $0x8] sm:$0xff] %v4070_v34 }
0x125e   :  { %v5399_v15 = vpop.eup %5398 }
0x125f   :  { %v4068_v12 = vmul.f32 0.6931472, %v5399_v15 }
0x1261   :  { %v4071_v33 = vsub.f32 %v4049_v35, %v4068_v12  ;;  %v4072_v58 = vsub.f32 %v4050_v16, %v4068_v12 }
0x1263   :  { %4075 = vst [vmem:[%s7625_s19 + $0x10] sm:$0xff] %v4071_v33 }
0x1264   :  { %4076 = vst [vmem:[%s7625_s19 + $0x18] sm:$0xff] %v4072_v58 }

</bundles_post_ra>
